<compile_context>
chip_gen: v5e
topology: v5e:2x2
jax: 0.10.0
libtpu: 0.0.40
codegen_flags: <defaults>
</compile_context>

<pallas_src>
import functools

import jax
import jax.numpy as jnp
from jax import lax
from jax.experimental import pallas as pl
from jax.experimental.pallas import tpu as pltpu


def _sigmoid(x):
    # sigmoid(x) = 0.5 * tanh(0.5 x) + 0.5 : one EUP push instead of exp+recip.
    return 0.5 * jnp.tanh(0.5 * x) + 0.5


def _make_convlstm_kernel(Bb, C, H, W, Tc):
    HW = H * W
    BHW = Bb * HW

    def kernel(x_ref, wt_ref, b_ref, mask_ref, out_ref, sum_ref, ssq_ref,
               xh_sc, c_sc, k_sc):
        """ConvLSTM over one time-chunk for one batch block.

        grid = (batch_blocks, time_chunks); axis 0 "parallel", axis 1
        "arbitrary" (sequential recurrence, state carried in VMEM scratch).

        x_ref   : (Tc, C, Bb*H*W)     input frames, channels on sublanes
        wt_ref  : (4C, 18C) bf16      fused gate weights, cols = (tap, src, cin)
        b_ref   : (4C, 1)             gate biases (gate order i, f, o, g)
        mask_ref: (9, Bb*H*W)         0/1 conv-boundary masks, one per 3x3 tap
        out_ref : (Bb, Tc, C, H*W)    h_t, lane-dense per-batch slabs
        sum_ref : (C, 1)              per-channel sum of h   (BN stats)
        ssq_ref : (C, 1)              per-channel sum of h^2 (BN stats)
        xh_sc   : (2C, Bb*H*W)        persistent [x_t ; h_{t-1}] block
        c_sc    : (C, Bb*H*W)         cell state
        k_sc    : (18C, Bb*H*W) bf16  fused im2col^T staging buffer
        """
        s = pl.program_id(1)

        @pl.when(s == 0)
        def _():
            xh_sc[...] = jnp.zeros_like(xh_sc)      # h_{-1}=0 lives in rows [C:)
            c_sc[...] = jnp.zeros_like(c_sc)
            sum_ref[...] = jnp.zeros_like(sum_ref)
            ssq_ref[...] = jnp.zeros_like(ssq_ref)

        # Static unroll over the time chunk (small Tc); cross-step state flows
        # through the VMEM scratch refs, which bounds live ranges.
        for t in range(Tc):
            xh_sc[0:C, :] = x_ref[t]                # drop x_t into rows [0:C)
            xh = xh_sc[...]                         # (2C, BHW) = [x_t ; h_{t-1}]

            # im2col^T: one XLU lane rotation per 3x3 tap.  The mask zeroes
            # every wrapped lane (any wrap <=> y+oy or x+ox out of the image /
            # crossing a batch segment), i.e. exact zero-padding semantics.
            # (Mask kept as a cheap VPU multiply rather than a vst.msk store
            # mask so the bf16 packed store stays a plain aligned store.)
            for k in range(9):
                oy, ox = k // 3 - 1, k % 3 - 1
                off = oy * W + ox
                if off == 0:
                    rolled = xh
                else:
                    # rolled[:, j] == xh[:, (j + off) % BHW]
                    rolled = pltpu.roll(xh, shift=(-off) % BHW, axis=1)
                k_sc[2 * C * k:2 * C * (k + 1), :] = (
                    rolled * mask_ref[k:k + 1, :]).astype(jnp.bfloat16)

            # Single fused MXU matmul: all 4 gates, both sources, all 9 taps.
            gates = jnp.dot(wt_ref[...], k_sc[...],
                            preferred_element_type=jnp.float32) + b_ref[...]

            i_g = _sigmoid(gates[0 * C:1 * C, :])
            f_g = _sigmoid(gates[1 * C:2 * C, :])
            o_g = _sigmoid(gates[2 * C:3 * C, :])
            g_g = jnp.tanh(gates[3 * C:4 * C, :])

            c_next = f_g * c_sc[...] + i_g * g_g
            h_next = o_g * jnp.tanh(c_next)
            c_sc[...] = c_next
            xh_sc[C:2 * C, :] = h_next              # h feeds next step in place

            # Lane-dense output stores (HW multiple of 128 -> unmasked vst).
            for b in range(Bb):
                out_ref[b, t, :, :] = h_next[:, b * HW:(b + 1) * HW]

            # BatchNorm statistics accumulated on the fly.
            sum_ref[...] += jnp.sum(h_next, axis=1, keepdims=True)
            ssq_ref[...] += jnp.sum(h_next * h_next, axis=1, keepdims=True)

    return kernel


def _bn_relu_kernel(count, y_ref, sum_ref, ssq_ref, gamma_ref, beta_ref, out_ref):
    """BatchNorm2d (training-mode batch stats, affine) + ReLU on (nb, C, HW)."""
    inv_n = 1.0 / count
    mean = sum_ref[...] * inv_n                          # (C, 1)
    var = jnp.maximum(ssq_ref[...] * inv_n - mean * mean, 0.0)   # biased var
    scale = gamma_ref[...] * lax.rsqrt(var + 1e-5)
    shift = beta_ref[...] - mean * scale
    out = y_ref[...] * scale[None, :, :] + shift[None, :, :]
    out_ref[...] = jnp.maximum(out, 0.0)


def _repack_conv_weights(W_pt, b_pt, C):
    # W_pt: (4C, 2C, 3, 3) OIHW; input channels [0:C] = x, [C:2C] = h.
    # Fused layout: W_T[o, ((kh*3+kw)*2 + src)*C + c] = W_pt[o, src*C + c, kh, kw]
    Wk = W_pt.reshape(4 * C, 2, C, 3, 3)              # (o, src, c, kh, kw)
    Wk = jnp.transpose(Wk, (0, 3, 4, 1, 2))           # (o, kh, kw, src, c)
    W_T = Wk.reshape(4 * C, 9 * 2 * C)                # (4C, 18C)
    return W_T, b_pt.reshape(4 * C, 1)


def _make_tap_masks(Bb, H, W):
    # masks[k, b*H*W + y*W + x] == 1 iff (y + oy, x + ox) is inside the image,
    # (oy, ox) = (k//3 - 1, k%3 - 1): implements zero padding, keeps the
    # lane-flattened batch segments isolated, and zeroes every roll wrap.
    HW = H * W
    pos = jnp.arange(Bb * HW) % HW
    yy = pos // W
    xx = pos % W
    masks = []
    for k in range(9):
        oy, ox = k // 3 - 1, k % 3 - 1
        valid = ((yy + oy >= 0) & (yy + oy < H) &
                 (xx + ox >= 0) & (xx + ox < W))
        masks.append(valid.astype(jnp.float32))
    return jnp.stack(masks, axis=0)                   # (9, Bb*H*W)


def _choose_time_chunk(T, C, lanes):
    # Keep the whole sequence resident per grid step when the x block is small
    # (removes per-step grid overhead); otherwise chunk T so the pipelined
    # x / out blocks stay within ~2 MiB each.  The chunk must divide T because
    # the recurrence carries scratch state across chunks (no ragged tail).
    budget = 2 << 20
    frame_bytes = C * lanes * 4
    if T * frame_bytes <= budget:
        return T
    cap = max(1, budget // frame_bytes)
    for d in range(min(cap, T), 0, -1):
        if T % d == 0:
            return d
    return 1


def init_params(key, C):
    """Deterministic synthetic parameters matching the module's shapes."""
    k1, k2 = jax.random.split(key)
    W_pt = jax.random.normal(k1, (4 * C, 2 * C, 3, 3), jnp.float32) * 0.1  # OIHW
    b_pt = jax.random.normal(k2, (4 * C,), jnp.float32) * 0.1
    gamma = jnp.ones((C,), jnp.float32)   # nn.BatchNorm2d default affine init
    beta = jnp.zeros((C,), jnp.float32)
    return W_pt, b_pt, gamma, beta


def recurrent_forward(x_nchw, W_pt, b_pt, gamma, beta, sequence_size):
    BT, C, H, W = x_nchw.shape
    assert BT % sequence_size == 0
    T = sequence_size
    B = BT // T
    HW = H * W

    # ---- batch / time tiling ------------------------------------------------
    # v7x has 2 TensorCores: a leading "parallel" batch axis gives ~2x there
    # (and is just an index_map on single-core v5e/v6e); it also halves the
    # per-core staging VMEM.
    n_bblk = 2 if (B % 2 == 0 and (B // 2) * HW >= 256) else 1
    Bb = B // n_bblk
    BHW = Bb * HW
    Tc = _choose_time_chunk(T, C, BHW)
    n_tc = T // Tc

    # (B*T, C, H, W) -> (n_bblk, T, C, Bb*H*W): channels on sublanes, flattened
    # (batch-in-block, spatial) on lanes.  H*W stays contiguous.
    x = x_nchw.reshape(n_bblk, Bb, T, C, HW).astype(jnp.float32)
    x = jnp.transpose(x, (0, 2, 3, 1, 4)).reshape(n_bblk, T, C, BHW)

    W_T, bias = _repack_conv_weights(W_pt.astype(jnp.float32),
                                     b_pt.astype(jnp.float32), C)
    masks = _make_tap_masks(Bb, H, W)

    h_seq, sum_parts, ssq_parts = pl.pallas_call(
        _make_convlstm_kernel(Bb, C, H, W, Tc),
        out_shape=(jax.ShapeDtypeStruct((n_bblk, Bb, T, C, HW), jnp.float32),
                   jax.ShapeDtypeStruct((n_bblk, C, 1), jnp.float32),
                   jax.ShapeDtypeStruct((n_bblk, C, 1), jnp.float32)),
        grid=(n_bblk, n_tc),
        in_specs=[
            pl.BlockSpec((None, Tc, C, BHW), lambda g, s: (g, s, 0, 0)),
            pl.BlockSpec((4 * C, 18 * C), lambda g, s: (0, 0)),
            pl.BlockSpec((4 * C, 1), lambda g, s: (0, 0)),
            pl.BlockSpec((9, BHW), lambda g, s: (0, 0)),
        ],
        out_specs=(
            pl.BlockSpec((None, Bb, Tc, C, HW), lambda g, s: (g, 0, s, 0, 0)),
            pl.BlockSpec((None, C, 1), lambda g, s: (g, 0, 0)),
            pl.BlockSpec((None, C, 1), lambda g, s: (g, 0, 0)),
        ),
        scratch_shapes=[
            pltpu.VMEM((2 * C, BHW), jnp.float32),        # [x ; h] block
            pltpu.VMEM((C, BHW), jnp.float32),            # cell state
            pltpu.VMEM((18 * C, BHW), jnp.bfloat16),      # fused im2col^T (bf16)
        ],
        compiler_params=pltpu.CompilerParams(
            dimension_semantics=("parallel", "arbitrary")),
    )(x, W_T.astype(jnp.bfloat16), bias, masks)

    # Tiny (n_bblk, C, 1) partial-stat reduction.
    ch_sum = jnp.sum(sum_parts, axis=0)
    ch_ssq = jnp.sum(ssq_parts, axis=0)

    # ---- BatchNorm + ReLU ----------------------------------------------------
    N = BT
    y = h_seq.reshape(N, C, HW)        # pure reshape: (g, b, t) -> b_global*T + t
    # ~2 MiB blocks: with double-buffered input + output this stays well under
    # v5e's 16 MiB scoped-VMEM default; cdiv grid handles any N (no divisor
    # search degenerating to nb=1), Pallas masks the ragged tail block.
    nb = max(1, min(N, (2 << 20) // (C * HW * 4)))
    count = float(N * HW)

    out = pl.pallas_call(
        functools.partial(_bn_relu_kernel, count),
        out_shape=jax.ShapeDtypeStruct((N, C, HW), jnp.float32),
        grid=(pl.cdiv(N, nb),),
        in_specs=[
            pl.BlockSpec((nb, C, HW), lambda i: (i, 0, 0)),
            pl.BlockSpec((C, 1), lambda i: (0, 0)),
            pl.BlockSpec((C, 1), lambda i: (0, 0)),
            pl.BlockSpec((C, 1), lambda i: (0, 0)),
            pl.BlockSpec((C, 1), lambda i: (0, 0)),
        ],
        out_specs=pl.BlockSpec((nb, C, HW), lambda i: (i, 0, 0)),
        compiler_params=pltpu.CompilerParams(
            dimension_semantics=("parallel",)),
    )(y, ch_sum, ch_ssq,
      gamma.reshape(C, 1).astype(jnp.float32),
      beta.reshape(C, 1).astype(jnp.float32))

    return out.reshape(BT, C, H, W)                   # pure reshape, no transpose


def reference_forward(x_nchw, W_pt, b_pt, gamma, beta, T):
    """Pure-JAX f32 reference mirroring the PyTorch module (NCHW)."""
    BT, C, H, W = x_nchw.shape
    B = BT // T
    x = x_nchw.reshape(B, T, C, H, W)
    h = jnp.zeros((B, C, H, W), jnp.float32)
    c = jnp.zeros((B, C, H, W), jnp.float32)
    hs = []
    for t in range(T):
        comb = jnp.concatenate([x[:, t], h], axis=1)
        conv = lax.conv_general_dilated(
            comb, W_pt, window_strides=(1, 1), padding=((1, 1), (1, 1)),
            dimension_numbers=("NCHW", "OIHW", "NCHW")) + b_pt[None, :, None, None]
        cc_i, cc_f, cc_o, cc_g = jnp.split(conv, 4, axis=1)
        i = jax.nn.sigmoid(cc_i)
        f = jax.nn.sigmoid(cc_f)
        o = jax.nn.sigmoid(cc_o)
        g = jnp.tanh(cc_g)
        c = f * c + i * g
        h = o * jnp.tanh(c)
        hs.append(h)
    y = jnp.stack(hs, axis=1).reshape(BT, C, H, W)
    mean = y.mean(axis=(0, 2, 3), keepdims=True)
    var = ((y - mean) ** 2).mean(axis=(0, 2, 3), keepdims=True)
    yn = (y - mean) / jnp.sqrt(var + 1e-5)
    yn = yn * gamma.reshape(1, C, 1, 1) + beta.reshape(1, C, 1, 1)
    return jnp.maximum(yn, 0.0)


if __name__ == "__main__":
    factor, in_channels, sequence_size = 2, 8, 4
    C = in_channels // factor                      # ConvLSTM input_dim = hidden_dim = 4
    B, H, W = 2, 16, 16

    key = jax.random.PRNGKey(0)
    kx, kp = jax.random.split(key)
    x = jax.random.normal(kx, (B * sequence_size, C, H, W), jnp.float32)
    W_pt, b_pt, gamma, beta = init_params(kp, C)

    out = recurrent_forward(x, W_pt, b_pt, gamma, beta, sequence_size)
    out = jax.block_until_ready(out)
    assert out.shape == (B * sequence_size, C, H, W)
    assert bool(jnp.all(jnp.isfinite(out)))

    ref = reference_forward(x, W_pt, b_pt, gamma, beta, sequence_size)
    max_err = float(jnp.max(jnp.abs(out - ref)))
    mean_err = float(jnp.mean(jnp.abs(out - ref)))
    # The gate matmul is staged in bf16 on the MXU (per perf review), so the
    # gate pre-activations are rounded to bf16; the tolerance is sized for that
    # (BN amplifies errors by ~1/std(h)) while still catching layout/algo bugs.
    assert jnp.allclose(out, ref, atol=5e-2, rtol=5e-2), (
        f"max abs err {max_err}, mean abs err {mean_err}")
    assert mean_err < 2e-2, f"mean abs err {mean_err}"

    print("KERNEL_OK")
</pallas_src>

<mosaic_0001>
module attributes {stable_mosaic.version = 11 : i64} {
  func.func @kernel(%arg0: i32, %arg1: i32, %arg2: memref<1x4x4x256xf32, #tpu.memory_space<vmem>>, %arg3: memref<16x72xbf16, #tpu.memory_space<vmem>>, %arg4: memref<16x1xf32, #tpu.memory_space<vmem>>, %arg5: memref<9x256xf32, #tpu.memory_space<vmem>>, %arg6: memref<1x1x4x4x256xf32, #tpu.memory_space<vmem>>, %arg7: memref<1x4x1xf32, #tpu.memory_space<vmem>>, %arg8: memref<1x4x1xf32, #tpu.memory_space<vmem>>, %arg9: memref<8x256xf32, #tpu.memory_space<vmem>>, %arg10: memref<4x256xf32, #tpu.memory_space<vmem>>, %arg11: memref<72x256xbf16, #tpu.memory_space<vmem>>) attributes {dimension_semantics = [#tpu.dimension_semantics<parallel>, #tpu.dimension_semantics<arbitrary>], iteration_bounds = array<i64: 2, 1>, scalar_prefetch = 0 : i64, scratch_operands = 3 : i64, tpu.core_type = #tpu.core_type<tc>, window_params = [{transform_indices = @transform_0, window_bounds = array<i64: 1, 4, 4, 256>}, {pipeline_mode = #tpu.pipeline_mode<synchronous>, transform_indices = @transform_1, window_bounds = array<i64: 16, 72>}, {pipeline_mode = #tpu.pipeline_mode<synchronous>, transform_indices = @transform_2, window_bounds = array<i64: 16, 1>}, {pipeline_mode = #tpu.pipeline_mode<synchronous>, transform_indices = @transform_3, window_bounds = array<i64: 9, 256>}, {transform_indices = @transform_4, window_bounds = array<i64: 1, 1, 4, 4, 256>}, {transform_indices = @transform_5, window_bounds = array<i64: 1, 4, 1>}, {transform_indices = @transform_6, window_bounds = array<i64: 1, 4, 1>}]} {
    %c0_i32 = arith.constant 0 : i32
    %0 = arith.cmpi eq, %arg1, %c0_i32 : i32
    %1 = arith.extui %0 : i1 to i32
    %c0_i32_0 = arith.constant 0 : i32
    %2 = arith.cmpi ne, %1, %c0_i32_0 : i32
    scf.if %2 {
      %cst_348 = arith.constant 0.000000e+00 : f32
      %471 = vector.broadcast %cst_348 : f32 to vector<8x256xf32>
      %c0_349 = arith.constant 0 : index
      %c0_350 = arith.constant 0 : index
      %472 = vector.load %arg9[%c0_349, %c0_350] : memref<8x256xf32, #tpu.memory_space<vmem>>, vector<8x256xf32>
      tpu.vector_store %arg9[%c0_349, %c0_350], %471 {strides = array<i32>} : memref<8x256xf32, #tpu.memory_space<vmem>>, vector<8x256xf32>,
      %cst_351 = arith.constant 0.000000e+00 : f32
      %473 = vector.broadcast %cst_351 : f32 to vector<4x256xf32>
      %c0_352 = arith.constant 0 : index
      %c0_353 = arith.constant 0 : index
      %474 = vector.load %arg10[%c0_352, %c0_353] : memref<4x256xf32, #tpu.memory_space<vmem>>, vector<4x256xf32>
      tpu.vector_store %arg10[%c0_352, %c0_353], %473 {strides = array<i32>} : memref<4x256xf32, #tpu.memory_space<vmem>>, vector<4x256xf32>,
      %cst_354 = arith.constant 0.000000e+00 : f32
      %475 = vector.broadcast %cst_354 : f32 to vector<4x1xf32>
      %c0_355 = arith.constant 0 : index
      %c0_356 = arith.constant 0 : index
      %c0_357 = arith.constant 0 : index
      %476 = vector.load %arg7[%c0_355, %c0_356, %c0_357] : memref<1x4x1xf32, #tpu.memory_space<vmem>>, vector<1x4x1xf32>
      %477 = vector.shape_cast %476 : vector<1x4x1xf32> to vector<4x1xf32>
      %478 = vector.shape_cast %475 : vector<4x1xf32> to vector<1x4x1xf32>
      tpu.vector_store %arg7[%c0_355, %c0_356, %c0_357], %478 {strides = array<i32>} : memref<1x4x1xf32, #tpu.memory_space<vmem>>, vector<1x4x1xf32>,
      %cst_358 = arith.constant 0.000000e+00 : f32
      %479 = vector.broadcast %cst_358 : f32 to vector<4x1xf32>
      %c0_359 = arith.constant 0 : index
      %c0_360 = arith.constant 0 : index
      %c0_361 = arith.constant 0 : index
      %480 = vector.load %arg8[%c0_359, %c0_360, %c0_361] : memref<1x4x1xf32, #tpu.memory_space<vmem>>, vector<1x4x1xf32>
      %481 = vector.shape_cast %480 : vector<1x4x1xf32> to vector<4x1xf32>
      %482 = vector.shape_cast %479 : vector<4x1xf32> to vector<1x4x1xf32>
      tpu.vector_store %arg8[%c0_359, %c0_360, %c0_361], %482 {strides = array<i32>} : memref<1x4x1xf32, #tpu.memory_space<vmem>>, vector<1x4x1xf32>,
    } else {
    }
    %c0 = arith.constant 0 : index
    %c0_1 = arith.constant 0 : index
    %c0_2 = arith.constant 0 : index
    %c0_3 = arith.constant 0 : index
    %3 = vector.load %arg2[%c0, %c0_1, %c0_2, %c0_3] : memref<1x4x4x256xf32, #tpu.memory_space<vmem>>, vector<1x1x4x256xf32>
    %4 = vector.shape_cast %3 : vector<1x1x4x256xf32> to vector<4x256xf32>
    %c0_4 = arith.constant 0 : index
    %c0_5 = arith.constant 0 : index
    %5 = vector.load %arg9[%c0_4, %c0_5] : memref<8x256xf32, #tpu.memory_space<vmem>>, vector<4x256xf32>
    tpu.vector_store %arg9[%c0_4, %c0_5], %4 {strides = array<i32>} : memref<8x256xf32, #tpu.memory_space<vmem>>, vector<4x256xf32>,
    %c0_6 = arith.constant 0 : index
    %c0_7 = arith.constant 0 : index
    %6 = vector.load %arg9[%c0_6, %c0_7] : memref<8x256xf32, #tpu.memory_space<vmem>>, vector<8x256xf32>
    %c17_i32 = arith.constant 17 : i32
    %7 = tpu.dynamic_rotate %6 by %c17_i32 dim 1 : vector<8x256xf32>, i32 -> vector<8x256xf32>
    %c0_8 = arith.constant 0 : index
    %c0_9 = arith.constant 0 : index
    %8 = vector.load %arg5[%c0_8, %c0_9] : memref<9x256xf32, #tpu.memory_space<vmem>>, vector<1x256xf32>
    %9 = vector.broadcast %8 : vector<1x256xf32> to vector<8x256xf32>
    %10 = arith.mulf %7, %9 : vector<8x256xf32>
    %11 = arith.truncf %10 : vector<8x256xf32> to vector<8x256xbf16>
    %c0_10 = arith.constant 0 : index
    %c0_11 = arith.constant 0 : index
    %12 = vector.load %arg11[%c0_10, %c0_11] : memref<72x256xbf16, #tpu.memory_space<vmem>>, vector<8x256xbf16>
    tpu.vector_store %arg11[%c0_10, %c0_11], %11 {strides = array<i32>} : memref<72x256xbf16, #tpu.memory_space<vmem>>, vector<8x256xbf16>,
    %c16_i32 = arith.constant 16 : i32
    %13 = tpu.dynamic_rotate %6 by %c16_i32 dim 1 : vector<8x256xf32>, i32 -> vector<8x256xf32>
    %c1 = arith.constant 1 : index
    %c0_12 = arith.constant 0 : index
    %14 = vector.load %arg5[%c1, %c0_12] : memref<9x256xf32, #tpu.memory_space<vmem>>, vector<1x256xf32>
    %15 = vector.broadcast %14 : vector<1x256xf32> to vector<8x256xf32>
    %16 = arith.mulf %13, %15 : vector<8x256xf32>
    %17 = arith.truncf %16 : vector<8x256xf32> to vector<8x256xbf16>
    %c8 = arith.constant 8 : index
    %c0_13 = arith.constant 0 : index
    %18 = vector.load %arg11[%c8, %c0_13] : memref<72x256xbf16, #tpu.memory_space<vmem>>, vector<8x256xbf16>
    tpu.vector_store %arg11[%c8, %c0_13], %17 {strides = array<i32>} : memref<72x256xbf16, #tpu.memory_space<vmem>>, vector<8x256xbf16>,
    %c15_i32 = arith.constant 15 : i32
    %19 = tpu.dynamic_rotate %6 by %c15_i32 dim 1 : vector<8x256xf32>, i32 -> vector<8x256xf32>
    %c2 = arith.constant 2 : index
    %c0_14 = arith.constant 0 : index
    %20 = vector.load %arg5[%c2, %c0_14] : memref<9x256xf32, #tpu.memory_space<vmem>>, vector<1x256xf32>
    %21 = vector.broadcast %20 : vector<1x256xf32> to vector<8x256xf32>
    %22 = arith.mulf %19, %21 : vector<8x256xf32>
    %23 = arith.truncf %22 : vector<8x256xf32> to vector<8x256xbf16>
    %c16 = arith.constant 16 : index
    %c0_15 = arith.constant 0 : index
    %24 = vector.load %arg11[%c16, %c0_15] : memref<72x256xbf16, #tpu.memory_space<vmem>>, vector<8x256xbf16>
    tpu.vector_store %arg11[%c16, %c0_15], %23 {strides = array<i32>} : memref<72x256xbf16, #tpu.memory_space<vmem>>, vector<8x256xbf16>,
    %c1_i32 = arith.constant 1 : i32
    %25 = tpu.dynamic_rotate %6 by %c1_i32 dim 1 : vector<8x256xf32>, i32 -> vector<8x256xf32>
    %c3 = arith.constant 3 : index
    %c0_16 = arith.constant 0 : index
    %26 = vector.load %arg5[%c3, %c0_16] : memref<9x256xf32, #tpu.memory_space<vmem>>, vector<1x256xf32>
    %27 = vector.broadcast %26 : vector<1x256xf32> to vector<8x256xf32>
    %28 = arith.mulf %25, %27 : vector<8x256xf32>
    %29 = arith.truncf %28 : vector<8x256xf32> to vector<8x256xbf16>
    %c24 = arith.constant 24 : index
    %c0_17 = arith.constant 0 : index
    %30 = vector.load %arg11[%c24, %c0_17] : memref<72x256xbf16, #tpu.memory_space<vmem>>, vector<8x256xbf16>
    tpu.vector_store %arg11[%c24, %c0_17], %29 {strides = array<i32>} : memref<72x256xbf16, #tpu.memory_space<vmem>>, vector<8x256xbf16>,
    %c4 = arith.constant 4 : index
    %c0_18 = arith.constant 0 : index
    %31 = vector.load %arg5[%c4, %c0_18] : memref<9x256xf32, #tpu.memory_space<vmem>>, vector<1x256xf32>
    %32 = vector.broadcast %31 : vector<1x256xf32> to vector<8x256xf32>
    %33 = arith.mulf %6, %32 : vector<8x256xf32>
    %34 = arith.truncf %33 : vector<8x256xf32> to vector<8x256xbf16>
    %c32 = arith.constant 32 : index
    %c0_19 = arith.constant 0 : index
    %35 = vector.load %arg11[%c32, %c0_19] : memref<72x256xbf16, #tpu.memory_space<vmem>>, vector<8x256xbf16>
    tpu.vector_store %arg11[%c32, %c0_19], %34 {strides = array<i32>} : memref<72x256xbf16, #tpu.memory_space<vmem>>, vector<8x256xbf16>,
    %c255_i32 = arith.constant 255 : i32
    %36 = tpu.dynamic_rotate %6 by %c255_i32 dim 1 : vector<8x256xf32>, i32 -> vector<8x256xf32>
    %c5 = arith.constant 5 : index
    %c0_20 = arith.constant 0 : index
    %37 = vector.load %arg5[%c5, %c0_20] : memref<9x256xf32, #tpu.memory_space<vmem>>, vector<1x256xf32>
    %38 = vector.broadcast %37 : vector<1x256xf32> to vector<8x256xf32>
    %39 = arith.mulf %36, %38 : vector<8x256xf32>
    %40 = arith.truncf %39 : vector<8x256xf32> to vector<8x256xbf16>
    %c40 = arith.constant 40 : index
    %c0_21 = arith.constant 0 : index
    %41 = vector.load %arg11[%c40, %c0_21] : memref<72x256xbf16, #tpu.memory_space<vmem>>, vector<8x256xbf16>
    tpu.vector_store %arg11[%c40, %c0_21], %40 {strides = array<i32>} : memref<72x256xbf16, #tpu.memory_space<vmem>>, vector<8x256xbf16>,
    %c241_i32 = arith.constant 241 : i32
    %42 = tpu.dynamic_rotate %6 by %c241_i32 dim 1 : vector<8x256xf32>, i32 -> vector<8x256xf32>
    %c6 = arith.constant 6 : index
    %c0_22 = arith.constant 0 : index
    %43 = vector.load %arg5[%c6, %c0_22] : memref<9x256xf32, #tpu.memory_space<vmem>>, vector<1x256xf32>
    %44 = vector.broadcast %43 : vector<1x256xf32> to vector<8x256xf32>
    %45 = arith.mulf %42, %44 : vector<8x256xf32>
    %46 = arith.truncf %45 : vector<8x256xf32> to vector<8x256xbf16>
    %c48 = arith.constant 48 : index
    %c0_23 = arith.constant 0 : index
    %47 = vector.load %arg11[%c48, %c0_23] : memref<72x256xbf16, #tpu.memory_space<vmem>>, vector<8x256xbf16>
    tpu.vector_store %arg11[%c48, %c0_23], %46 {strides = array<i32>} : memref<72x256xbf16, #tpu.memory_space<vmem>>, vector<8x256xbf16>,
    %c240_i32 = arith.constant 240 : i32
    %48 = tpu.dynamic_rotate %6 by %c240_i32 dim 1 : vector<8x256xf32>, i32 -> vector<8x256xf32>
    %c7 = arith.constant 7 : index
    %c0_24 = arith.constant 0 : index
    %49 = vector.load %arg5[%c7, %c0_24] : memref<9x256xf32, #tpu.memory_space<vmem>>, vector<1x256xf32>
    %50 = vector.broadcast %49 : vector<1x256xf32> to vector<8x256xf32>
    %51 = arith.mulf %48, %50 : vector<8x256xf32>
    %52 = arith.truncf %51 : vector<8x256xf32> to vector<8x256xbf16>
    %c56 = arith.constant 56 : index
    %c0_25 = arith.constant 0 : index
    %53 = vector.load %arg11[%c56, %c0_25] : memref<72x256xbf16, #tpu.memory_space<vmem>>, vector<8x256xbf16>
    tpu.vector_store %arg11[%c56, %c0_25], %52 {strides = array<i32>} : memref<72x256xbf16, #tpu.memory_space<vmem>>, vector<8x256xbf16>,
    %c239_i32 = arith.constant 239 : i32
    %54 = tpu.dynamic_rotate %6 by %c239_i32 dim 1 : vector<8x256xf32>, i32 -> vector<8x256xf32>
    %c8_26 = arith.constant 8 : index
    %c0_27 = arith.constant 0 : index
    %55 = vector.load %arg5[%c8_26, %c0_27] : memref<9x256xf32, #tpu.memory_space<vmem>>, vector<1x256xf32>
    %56 = vector.broadcast %55 : vector<1x256xf32> to vector<8x256xf32>
    %57 = arith.mulf %54, %56 : vector<8x256xf32>
    %58 = arith.truncf %57 : vector<8x256xf32> to vector<8x256xbf16>
    %c64 = arith.constant 64 : index
    %c0_28 = arith.constant 0 : index
    %59 = vector.load %arg11[%c64, %c0_28] : memref<72x256xbf16, #tpu.memory_space<vmem>>, vector<8x256xbf16>
    tpu.vector_store %arg11[%c64, %c0_28], %58 {strides = array<i32>} : memref<72x256xbf16, #tpu.memory_space<vmem>>, vector<8x256xbf16>,
    %c0_29 = arith.constant 0 : index
    %c0_30 = arith.constant 0 : index
    %60 = vector.load %arg3[%c0_29, %c0_30] : memref<16x72xbf16, #tpu.memory_space<vmem>>, vector<16x72xbf16>
    %c0_31 = arith.constant 0 : index
    %c0_32 = arith.constant 0 : index
    %61 = vector.load %arg11[%c0_31, %c0_32] : memref<72x256xbf16, #tpu.memory_space<vmem>>, vector<72x256xbf16>
    %cst = arith.constant dense<0.000000e+00> : vector<16x256xf32>
    %62 = tpu.matmul %60, %61, %cst {dimension_numbers = #tpu.dot_dimension_numbers<[1], [0], [0], [1], [0, 0, 1, 1], [], []>} : vector<16x72xbf16>, vector<72x256xbf16>, vector<16x256xf32> -> vector<16x256xf32>
    %c0_33 = arith.constant 0 : index
    %c0_34 = arith.constant 0 : index
    %63 = vector.load %arg4[%c0_33, %c0_34] : memref<16x1xf32, #tpu.memory_space<vmem>>, vector<16x1xf32>
    %64 = vector.broadcast %63 : vector<16x1xf32> to vector<16x256xf32>
    %65 = arith.addf %62, %64 : vector<16x256xf32>
    %66 = vector.extract_strided_slice %65 {offsets = [0, 0], sizes = [4, 256], strides = [1, 1]} : vector<16x256xf32> to vector<4x256xf32>
    %cst_35 = arith.constant 5.000000e-01 : f32
    %67 = vector.broadcast %cst_35 : f32 to vector<4x256xf32>
    %68 = arith.mulf %67, %66 : vector<4x256xf32>
    %69 = math.tanh %68 : vector<4x256xf32>
    %cst_36 = arith.constant 5.000000e-01 : f32
    %70 = vector.broadcast %cst_36 : f32 to vector<4x256xf32>
    %71 = arith.mulf %70, %69 : vector<4x256xf32>
    %cst_37 = arith.constant 5.000000e-01 : f32
    %72 = vector.broadcast %cst_37 : f32 to vector<4x256xf32>
    %73 = arith.addf %71, %72 : vector<4x256xf32>
    %74 = vector.extract_strided_slice %65 {offsets = [4, 0], sizes = [4, 256], strides = [1, 1]} : vector<16x256xf32> to vector<4x256xf32>
    %cst_38 = arith.constant 5.000000e-01 : f32
    %75 = vector.broadcast %cst_38 : f32 to vector<4x256xf32>
    %76 = arith.mulf %75, %74 : vector<4x256xf32>
    %77 = math.tanh %76 : vector<4x256xf32>
    %cst_39 = arith.constant 5.000000e-01 : f32
    %78 = vector.broadcast %cst_39 : f32 to vector<4x256xf32>
    %79 = arith.mulf %78, %77 : vector<4x256xf32>
    %cst_40 = arith.constant 5.000000e-01 : f32
    %80 = vector.broadcast %cst_40 : f32 to vector<4x256xf32>
    %81 = arith.addf %79, %80 : vector<4x256xf32>
    %82 = vector.extract_strided_slice %65 {offsets = [8, 0], sizes = [4, 256], strides = [1, 1]} : vector<16x256xf32> to vector<4x256xf32>
    %cst_41 = arith.constant 5.000000e-01 : f32
    %83 = vector.broadcast %cst_41 : f32 to vector<4x256xf32>
    %84 = arith.mulf %83, %82 : vector<4x256xf32>
    %85 = math.tanh %84 : vector<4x256xf32>
    %cst_42 = arith.constant 5.000000e-01 : f32
    %86 = vector.broadcast %cst_42 : f32 to vector<4x256xf32>
    %87 = arith.mulf %86, %85 : vector<4x256xf32>
    %cst_43 = arith.constant 5.000000e-01 : f32
    %88 = vector.broadcast %cst_43 : f32 to vector<4x256xf32>
    %89 = arith.addf %87, %88 : vector<4x256xf32>
    %90 = vector.extract_strided_slice %65 {offsets = [12, 0], sizes = [4, 256], strides = [1, 1]} : vector<16x256xf32> to vector<4x256xf32>
    %91 = math.tanh %90 : vector<4x256xf32>
    %c0_44 = arith.constant 0 : index
    %c0_45 = arith.constant 0 : index
    %92 = vector.load %arg10[%c0_44, %c0_45] : memref<4x256xf32, #tpu.memory_space<vmem>>, vector<4x256xf32>
    %93 = arith.mulf %81, %92 : vector<4x256xf32>
    %94 = arith.mulf %73, %91 : vector<4x256xf32>
    %95 = arith.addf %93, %94 : vector<4x256xf32>
    %96 = math.tanh %95 : vector<4x256xf32>
    %97 = arith.mulf %89, %96 : vector<4x256xf32>
    %c0_46 = arith.constant 0 : index
    %c0_47 = arith.constant 0 : index
    %98 = vector.load %arg10[%c0_46, %c0_47] : memref<4x256xf32, #tpu.memory_space<vmem>>, vector<4x256xf32>
    tpu.vector_store %arg10[%c0_46, %c0_47], %95 {strides = array<i32>} : memref<4x256xf32, #tpu.memory_space<vmem>>, vector<4x256xf32>,
    %c4_48 = arith.constant 4 : index
    %c0_49 = arith.constant 0 : index
    %99 = vector.load %arg9[%c4_48, %c0_49] : memref<8x256xf32, #tpu.memory_space<vmem>>, vector<4x256xf32>
    tpu.vector_store %arg9[%c4_48, %c0_49], %97 {strides = array<i32>} : memref<8x256xf32, #tpu.memory_space<vmem>>, vector<4x256xf32>,
    %c0_50 = arith.constant 0 : index
    %c0_51 = arith.constant 0 : index
    %c0_52 = arith.constant 0 : index
    %c0_53 = arith.constant 0 : index
    %c0_54 = arith.constant 0 : index
    %100 = vector.load %arg6[%c0_50, %c0_51, %c0_52, %c0_53, %c0_54] : memref<1x1x4x4x256xf32, #tpu.memory_space<vmem>>, vector<1x1x1x4x256xf32>
    %101 = vector.shape_cast %100 : vector<1x1x1x4x256xf32> to vector<4x256xf32>
    %102 = vector.shape_cast %97 : vector<4x256xf32> to vector<1x1x1x4x256xf32>
    tpu.vector_store %arg6[%c0_50, %c0_51, %c0_52, %c0_53, %c0_54], %102 {strides = array<i32>} : memref<1x1x4x4x256xf32, #tpu.memory_space<vmem>>, vector<1x1x1x4x256xf32>,
    %c0_55 = arith.constant 0 : index
    %c0_56 = arith.constant 0 : index
    %c0_57 = arith.constant 0 : index
    %103 = vector.load %arg7[%c0_55, %c0_56, %c0_57] : memref<1x4x1xf32, #tpu.memory_space<vmem>>, vector<1x4x1xf32>
    %104 = vector.shape_cast %103 : vector<1x4x1xf32> to vector<4x1xf32>
    %cst_58 = arith.constant dense<0.000000e+00> : vector<4xf32>
    %105 = vector.multi_reduction <add>, %97, %cst_58 [1] : vector<4x256xf32> to vector<4xf32>
    %106 = vector.shape_cast %105 : vector<4xf32> to vector<4x1xf32>
    %107 = arith.addf %104, %106 : vector<4x1xf32>
    %c0_59 = arith.constant 0 : index
    %c0_60 = arith.constant 0 : index
    %c0_61 = arith.constant 0 : index
    %108 = vector.load %arg7[%c0_59, %c0_60, %c0_61] : memref<1x4x1xf32, #tpu.memory_space<vmem>>, vector<1x4x1xf32>
    %109 = vector.shape_cast %108 : vector<1x4x1xf32> to vector<4x1xf32>
    %110 = vector.shape_cast %107 : vector<4x1xf32> to vector<1x4x1xf32>
    tpu.vector_store %arg7[%c0_59, %c0_60, %c0_61], %110 {strides = array<i32>} : memref<1x4x1xf32, #tpu.memory_space<vmem>>, vector<1x4x1xf32>,
    %c0_62 = arith.constant 0 : index
    %c0_63 = arith.constant 0 : index
    %c0_64 = arith.constant 0 : index
    %111 = vector.load %arg8[%c0_62, %c0_63, %c0_64] : memref<1x4x1xf32, #tpu.memory_space<vmem>>, vector<1x4x1xf32>
    %112 = vector.shape_cast %111 : vector<1x4x1xf32> to vector<4x1xf32>
    %113 = arith.mulf %97, %97 : vector<4x256xf32>
    %cst_65 = arith.constant dense<0.000000e+00> : vector<4xf32>
    %114 = vector.multi_reduction <add>, %113, %cst_65 [1] : vector<4x256xf32> to vector<4xf32>
    %115 = vector.shape_cast %114 : vector<4xf32> to vector<4x1xf32>
    %116 = arith.addf %112, %115 : vector<4x1xf32>
    %c0_66 = arith.constant 0 : index
    %c0_67 = arith.constant 0 : index
    %c0_68 = arith.constant 0 : index
    %117 = vector.load %arg8[%c0_66, %c0_67, %c0_68] : memref<1x4x1xf32, #tpu.memory_space<vmem>>, vector<1x4x1xf32>
    %118 = vector.shape_cast %117 : vector<1x4x1xf32> to vector<4x1xf32>
    %119 = vector.shape_cast %116 : vector<4x1xf32> to vector<1x4x1xf32>
    tpu.vector_store %arg8[%c0_66, %c0_67, %c0_68], %119 {strides = array<i32>} : memref<1x4x1xf32, #tpu.memory_space<vmem>>, vector<1x4x1xf32>,
    %c0_69 = arith.constant 0 : index
    %c1_70 = arith.constant 1 : index
    %c0_71 = arith.constant 0 : index
    %c0_72 = arith.constant 0 : index
    %120 = vector.load %arg2[%c0_69, %c1_70, %c0_71, %c0_72] : memref<1x4x4x256xf32, #tpu.memory_space<vmem>>, vector<1x1x4x256xf32>
    %121 = vector.shape_cast %120 : vector<1x1x4x256xf32> to vector<4x256xf32>
    %c0_73 = arith.constant 0 : index
    %c0_74 = arith.constant 0 : index
    %122 = vector.load %arg9[%c0_73, %c0_74] : memref<8x256xf32, #tpu.memory_space<vmem>>, vector<4x256xf32>
    tpu.vector_store %arg9[%c0_73, %c0_74], %121 {strides = array<i32>} : memref<8x256xf32, #tpu.memory_space<vmem>>, vector<4x256xf32>,
    %c0_75 = arith.constant 0 : index
    %c0_76 = arith.constant 0 : index
    %123 = vector.load %arg9[%c0_75, %c0_76] : memref<8x256xf32, #tpu.memory_space<vmem>>, vector<8x256xf32>
    %c17_i32_77 = arith.constant 17 : i32
    %124 = tpu.dynamic_rotate %123 by %c17_i32_77 dim 1 : vector<8x256xf32>, i32 -> vector<8x256xf32>
    %c0_78 = arith.constant 0 : index
    %c0_79 = arith.constant 0 : index
    %125 = vector.load %arg5[%c0_78, %c0_79] : memref<9x256xf32, #tpu.memory_space<vmem>>, vector<1x256xf32>
    %126 = vector.broadcast %125 : vector<1x256xf32> to vector<8x256xf32>
    %127 = arith.mulf %124, %126 : vector<8x256xf32>
    %128 = arith.truncf %127 : vector<8x256xf32> to vector<8x256xbf16>
    %c0_80 = arith.constant 0 : index
    %c0_81 = arith.constant 0 : index
    %129 = vector.load %arg11[%c0_80, %c0_81] : memref<72x256xbf16, #tpu.memory_space<vmem>>, vector<8x256xbf16>
    tpu.vector_store %arg11[%c0_80, %c0_81], %128 {strides = array<i32>} : memref<72x256xbf16, #tpu.memory_space<vmem>>, vector<8x256xbf16>,
    %c16_i32_82 = arith.constant 16 : i32
    %130 = tpu.dynamic_rotate %123 by %c16_i32_82 dim 1 : vector<8x256xf32>, i32 -> vector<8x256xf32>
    %c1_83 = arith.constant 1 : index
    %c0_84 = arith.constant 0 : index
    %131 = vector.load %arg5[%c1_83, %c0_84] : memref<9x256xf32, #tpu.memory_space<vmem>>, vector<1x256xf32>
    %132 = vector.broadcast %131 : vector<1x256xf32> to vector<8x256xf32>
    %133 = arith.mulf %130, %132 : vector<8x256xf32>
    %134 = arith.truncf %133 : vector<8x256xf32> to vector<8x256xbf16>
    %c8_85 = arith.constant 8 : index
    %c0_86 = arith.constant 0 : index
    %135 = vector.load %arg11[%c8_85, %c0_86] : memref<72x256xbf16, #tpu.memory_space<vmem>>, vector<8x256xbf16>
    tpu.vector_store %arg11[%c8_85, %c0_86], %134 {strides = array<i32>} : memref<72x256xbf16, #tpu.memory_space<vmem>>, vector<8x256xbf16>,
    %c15_i32_87 = arith.constant 15 : i32
    %136 = tpu.dynamic_rotate %123 by %c15_i32_87 dim 1 : vector<8x256xf32>, i32 -> vector<8x256xf32>
    %c2_88 = arith.constant 2 : index
    %c0_89 = arith.constant 0 : index
    %137 = vector.load %arg5[%c2_88, %c0_89] : memref<9x256xf32, #tpu.memory_space<vmem>>, vector<1x256xf32>
    %138 = vector.broadcast %137 : vector<1x256xf32> to vector<8x256xf32>
    %139 = arith.mulf %136, %138 : vector<8x256xf32>
    %140 = arith.truncf %139 : vector<8x256xf32> to vector<8x256xbf16>
    %c16_90 = arith.constant 16 : index
    %c0_91 = arith.constant 0 : index
    %141 = vector.load %arg11[%c16_90, %c0_91] : memref<72x256xbf16, #tpu.memory_space<vmem>>, vector<8x256xbf16>
    tpu.vector_store %arg11[%c16_90, %c0_91], %140 {strides = array<i32>} : memref<72x256xbf16, #tpu.memory_space<vmem>>, vector<8x256xbf16>,
    %c1_i32_92 = arith.constant 1 : i32
    %142 = tpu.dynamic_rotate %123 by %c1_i32_92 dim 1 : vector<8x256xf32>, i32 -> vector<8x256xf32>
    %c3_93 = arith.constant 3 : index
    %c0_94 = arith.constant 0 : index
    %143 = vector.load %arg5[%c3_93, %c0_94] : memref<9x256xf32, #tpu.memory_space<vmem>>, vector<1x256xf32>
    %144 = vector.broadcast %143 : vector<1x256xf32> to vector<8x256xf32>
    %145 = arith.mulf %142, %144 : vector<8x256xf32>
    %146 = arith.truncf %145 : vector<8x256xf32> to vector<8x256xbf16>
    %c24_95 = arith.constant 24 : index
    %c0_96 = arith.constant 0 : index
    %147 = vector.load %arg11[%c24_95, %c0_96] : memref<72x256xbf16, #tpu.memory_space<vmem>>, vector<8x256xbf16>
    tpu.vector_store %arg11[%c24_95, %c0_96], %146 {strides = array<i32>} : memref<72x256xbf16, #tpu.memory_space<vmem>>, vector<8x256xbf16>,
    %c4_97 = arith.constant 4 : index
    %c0_98 = arith.constant 0 : index
    %148 = vector.load %arg5[%c4_97, %c0_98] : memref<9x256xf32, #tpu.memory_space<vmem>>, vector<1x256xf32>
    %149 = vector.broadcast %148 : vector<1x256xf32> to vector<8x256xf32>
    %150 = arith.mulf %123, %149 : vector<8x256xf32>
    %151 = arith.truncf %150 : vector<8x256xf32> to vector<8x256xbf16>
    %c32_99 = arith.constant 32 : index
    %c0_100 = arith.constant 0 : index
    %152 = vector.load %arg11[%c32_99, %c0_100] : memref<72x256xbf16, #tpu.memory_space<vmem>>, vector<8x256xbf16>
    tpu.vector_store %arg11[%c32_99, %c0_100], %151 {strides = array<i32>} : memref<72x256xbf16, #tpu.memory_space<vmem>>, vector<8x256xbf16>,
    %c255_i32_101 = arith.constant 255 : i32
    %153 = tpu.dynamic_rotate %123 by %c255_i32_101 dim 1 : vector<8x256xf32>, i32 -> vector<8x256xf32>
    %c5_102 = arith.constant 5 : index
    %c0_103 = arith.constant 0 : index
    %154 = vector.load %arg5[%c5_102, %c0_103] : memref<9x256xf32, #tpu.memory_space<vmem>>, vector<1x256xf32>
    %155 = vector.broadcast %154 : vector<1x256xf32> to vector<8x256xf32>
    %156 = arith.mulf %153, %155 : vector<8x256xf32>
    %157 = arith.truncf %156 : vector<8x256xf32> to vector<8x256xbf16>
    %c40_104 = arith.constant 40 : index
    %c0_105 = arith.constant 0 : index
    %158 = vector.load %arg11[%c40_104, %c0_105] : memref<72x256xbf16, #tpu.memory_space<vmem>>, vector<8x256xbf16>
    tpu.vector_store %arg11[%c40_104, %c0_105], %157 {strides = array<i32>} : memref<72x256xbf16, #tpu.memory_space<vmem>>, vector<8x256xbf16>,
    %c241_i32_106 = arith.constant 241 : i32
    %159 = tpu.dynamic_rotate %123 by %c241_i32_106 dim 1 : vector<8x256xf32>, i32 -> vector<8x256xf32>
    %c6_107 = arith.constant 6 : index
    %c0_108 = arith.constant 0 : index
    %160 = vector.load %arg5[%c6_107, %c0_108] : memref<9x256xf32, #tpu.memory_space<vmem>>, vector<1x256xf32>
    %161 = vector.broadcast %160 : vector<1x256xf32> to vector<8x256xf32>
    %162 = arith.mulf %159, %161 : vector<8x256xf32>
    %163 = arith.truncf %162 : vector<8x256xf32> to vector<8x256xbf16>
    %c48_109 = arith.constant 48 : index
    %c0_110 = arith.constant 0 : index
    %164 = vector.load %arg11[%c48_109, %c0_110] : memref<72x256xbf16, #tpu.memory_space<vmem>>, vector<8x256xbf16>
    tpu.vector_store %arg11[%c48_109, %c0_110], %163 {strides = array<i32>} : memref<72x256xbf16, #tpu.memory_space<vmem>>, vector<8x256xbf16>,
    %c240_i32_111 = arith.constant 240 : i32
    %165 = tpu.dynamic_rotate %123 by %c240_i32_111 dim 1 : vector<8x256xf32>, i32 -> vector<8x256xf32>
    %c7_112 = arith.constant 7 : index
    %c0_113 = arith.constant 0 : index
    %166 = vector.load %arg5[%c7_112, %c0_113] : memref<9x256xf32, #tpu.memory_space<vmem>>, vector<1x256xf32>
    %167 = vector.broadcast %166 : vector<1x256xf32> to vector<8x256xf32>
    %168 = arith.mulf %165, %167 : vector<8x256xf32>
    %169 = arith.truncf %168 : vector<8x256xf32> to vector<8x256xbf16>
    %c56_114 = arith.constant 56 : index
    %c0_115 = arith.constant 0 : index
    %170 = vector.load %arg11[%c56_114, %c0_115] : memref<72x256xbf16, #tpu.memory_space<vmem>>, vector<8x256xbf16>
    tpu.vector_store %arg11[%c56_114, %c0_115], %169 {strides = array<i32>} : memref<72x256xbf16, #tpu.memory_space<vmem>>, vector<8x256xbf16>,
    %c239_i32_116 = arith.constant 239 : i32
    %171 = tpu.dynamic_rotate %123 by %c239_i32_116 dim 1 : vector<8x256xf32>, i32 -> vector<8x256xf32>
    %c8_117 = arith.constant 8 : index
    %c0_118 = arith.constant 0 : index
    %172 = vector.load %arg5[%c8_117, %c0_118] : memref<9x256xf32, #tpu.memory_space<vmem>>, vector<1x256xf32>
    %173 = vector.broadcast %172 : vector<1x256xf32> to vector<8x256xf32>
    %174 = arith.mulf %171, %173 : vector<8x256xf32>
    %175 = arith.truncf %174 : vector<8x256xf32> to vector<8x256xbf16>
    %c64_119 = arith.constant 64 : index
    %c0_120 = arith.constant 0 : index
    %176 = vector.load %arg11[%c64_119, %c0_120] : memref<72x256xbf16, #tpu.memory_space<vmem>>, vector<8x256xbf16>
    tpu.vector_store %arg11[%c64_119, %c0_120], %175 {strides = array<i32>} : memref<72x256xbf16, #tpu.memory_space<vmem>>, vector<8x256xbf16>,
    %c0_121 = arith.constant 0 : index
    %c0_122 = arith.constant 0 : index
    %177 = vector.load %arg3[%c0_121, %c0_122] : memref<16x72xbf16, #tpu.memory_space<vmem>>, vector<16x72xbf16>
    %c0_123 = arith.constant 0 : index
    %c0_124 = arith.constant 0 : index
    %178 = vector.load %arg11[%c0_123, %c0_124] : memref<72x256xbf16, #tpu.memory_space<vmem>>, vector<72x256xbf16>
    %cst_125 = arith.constant dense<0.000000e+00> : vector<16x256xf32>
    %179 = tpu.matmul %177, %178, %cst_125 {dimension_numbers = #tpu.dot_dimension_numbers<[1], [0], [0], [1], [0, 0, 1, 1], [], []>} : vector<16x72xbf16>, vector<72x256xbf16>, vector<16x256xf32> -> vector<16x256xf32>
    %c0_126 = arith.constant 0 : index
    %c0_127 = arith.constant 0 : index
    %180 = vector.load %arg4[%c0_126, %c0_127] : memref<16x1xf32, #tpu.memory_space<vmem>>, vector<16x1xf32>
    %181 = vector.broadcast %180 : vector<16x1xf32> to vector<16x256xf32>
    %182 = arith.addf %179, %181 : vector<16x256xf32>
    %183 = vector.extract_strided_slice %182 {offsets = [0, 0], sizes = [4, 256], strides = [1, 1]} : vector<16x256xf32> to vector<4x256xf32>
    %cst_128 = arith.constant 5.000000e-01 : f32
    %184 = vector.broadcast %cst_128 : f32 to vector<4x256xf32>
    %185 = arith.mulf %184, %183 : vector<4x256xf32>
    %186 = math.tanh %185 : vector<4x256xf32>
    %cst_129 = arith.constant 5.000000e-01 : f32
    %187 = vector.broadcast %cst_129 : f32 to vector<4x256xf32>
    %188 = arith.mulf %187, %186 : vector<4x256xf32>
    %cst_130 = arith.constant 5.000000e-01 : f32
    %189 = vector.broadcast %cst_130 : f32 to vector<4x256xf32>
    %190 = arith.addf %188, %189 : vector<4x256xf32>
    %191 = vector.extract_strided_slice %182 {offsets = [4, 0], sizes = [4, 256], strides = [1, 1]} : vector<16x256xf32> to vector<4x256xf32>
    %cst_131 = arith.constant 5.000000e-01 : f32
    %192 = vector.broadcast %cst_131 : f32 to vector<4x256xf32>
    %193 = arith.mulf %192, %191 : vector<4x256xf32>
    %194 = math.tanh %193 : vector<4x256xf32>
    %cst_132 = arith.constant 5.000000e-01 : f32
    %195 = vector.broadcast %cst_132 : f32 to vector<4x256xf32>
    %196 = arith.mulf %195, %194 : vector<4x256xf32>
    %cst_133 = arith.constant 5.000000e-01 : f32
    %197 = vector.broadcast %cst_133 : f32 to vector<4x256xf32>
    %198 = arith.addf %196, %197 : vector<4x256xf32>
    %199 = vector.extract_strided_slice %182 {offsets = [8, 0], sizes = [4, 256], strides = [1, 1]} : vector<16x256xf32> to vector<4x256xf32>
    %cst_134 = arith.constant 5.000000e-01 : f32
    %200 = vector.broadcast %cst_134 : f32 to vector<4x256xf32>
    %201 = arith.mulf %200, %199 : vector<4x256xf32>
    %202 = math.tanh %201 : vector<4x256xf32>
    %cst_135 = arith.constant 5.000000e-01 : f32
    %203 = vector.broadcast %cst_135 : f32 to vector<4x256xf32>
    %204 = arith.mulf %203, %202 : vector<4x256xf32>
    %cst_136 = arith.constant 5.000000e-01 : f32
    %205 = vector.broadcast %cst_136 : f32 to vector<4x256xf32>
    %206 = arith.addf %204, %205 : vector<4x256xf32>
    %207 = vector.extract_strided_slice %182 {offsets = [12, 0], sizes = [4, 256], strides = [1, 1]} : vector<16x256xf32> to vector<4x256xf32>
    %208 = math.tanh %207 : vector<4x256xf32>
    %c0_137 = arith.constant 0 : index
    %c0_138 = arith.constant 0 : index
    %209 = vector.load %arg10[%c0_137, %c0_138] : memref<4x256xf32, #tpu.memory_space<vmem>>, vector<4x256xf32>
    %210 = arith.mulf %198, %209 : vector<4x256xf32>
    %211 = arith.mulf %190, %208 : vector<4x256xf32>
    %212 = arith.addf %210, %211 : vector<4x256xf32>
    %213 = math.tanh %212 : vector<4x256xf32>
    %214 = arith.mulf %206, %213 : vector<4x256xf32>
    %c0_139 = arith.constant 0 : index
    %c0_140 = arith.constant 0 : index
    %215 = vector.load %arg10[%c0_139, %c0_140] : memref<4x256xf32, #tpu.memory_space<vmem>>, vector<4x256xf32>
    tpu.vector_store %arg10[%c0_139, %c0_140], %212 {strides = array<i32>} : memref<4x256xf32, #tpu.memory_space<vmem>>, vector<4x256xf32>,
    %c4_141 = arith.constant 4 : index
    %c0_142 = arith.constant 0 : index
    %216 = vector.load %arg9[%c4_141, %c0_142] : memref<8x256xf32, #tpu.memory_space<vmem>>, vector<4x256xf32>
    tpu.vector_store %arg9[%c4_141, %c0_142], %214 {strides = array<i32>} : memref<8x256xf32, #tpu.memory_space<vmem>>, vector<4x256xf32>,
    %c0_143 = arith.constant 0 : index
    %c0_144 = arith.constant 0 : index
    %c1_145 = arith.constant 1 : index
    %c0_146 = arith.constant 0 : index
    %c0_147 = arith.constant 0 : index
    %217 = vector.load %arg6[%c0_143, %c0_144, %c1_145, %c0_146, %c0_147] : memref<1x1x4x4x256xf32, #tpu.memory_space<vmem>>, vector<1x1x1x4x256xf32>
    %218 = vector.shape_cast %217 : vector<1x1x1x4x256xf32> to vector<4x256xf32>
    %219 = vector.shape_cast %214 : vector<4x256xf32> to vector<1x1x1x4x256xf32>
    tpu.vector_store %arg6[%c0_143, %c0_144, %c1_145, %c0_146, %c0_147], %219 {strides = array<i32>} : memref<1x1x4x4x256xf32, #tpu.memory_space<vmem>>, vector<1x1x1x4x256xf32>,
    %c0_148 = arith.constant 0 : index
    %c0_149 = arith.constant 0 : index
    %c0_150 = arith.constant 0 : index
    %220 = vector.load %arg7[%c0_148, %c0_149, %c0_150] : memref<1x4x1xf32, #tpu.memory_space<vmem>>, vector<1x4x1xf32>
    %221 = vector.shape_cast %220 : vector<1x4x1xf32> to vector<4x1xf32>
    %cst_151 = arith.constant dense<0.000000e+00> : vector<4xf32>
    %222 = vector.multi_reduction <add>, %214, %cst_151 [1] : vector<4x256xf32> to vector<4xf32>
    %223 = vector.shape_cast %222 : vector<4xf32> to vector<4x1xf32>
    %224 = arith.addf %221, %223 : vector<4x1xf32>
    %c0_152 = arith.constant 0 : index
    %c0_153 = arith.constant 0 : index
    %c0_154 = arith.constant 0 : index
    %225 = vector.load %arg7[%c0_152, %c0_153, %c0_154] : memref<1x4x1xf32, #tpu.memory_space<vmem>>, vector<1x4x1xf32>
    %226 = vector.shape_cast %225 : vector<1x4x1xf32> to vector<4x1xf32>
    %227 = vector.shape_cast %224 : vector<4x1xf32> to vector<1x4x1xf32>
    tpu.vector_store %arg7[%c0_152, %c0_153, %c0_154], %227 {strides = array<i32>} : memref<1x4x1xf32, #tpu.memory_space<vmem>>, vector<1x4x1xf32>,
    %c0_155 = arith.constant 0 : index
    %c0_156 = arith.constant 0 : index
    %c0_157 = arith.constant 0 : index
    %228 = vector.load %arg8[%c0_155, %c0_156, %c0_157] : memref<1x4x1xf32, #tpu.memory_space<vmem>>, vector<1x4x1xf32>
    %229 = vector.shape_cast %228 : vector<1x4x1xf32> to vector<4x1xf32>
    %230 = arith.mulf %214, %214 : vector<4x256xf32>
    %cst_158 = arith.constant dense<0.000000e+00> : vector<4xf32>
    %231 = vector.multi_reduction <add>, %230, %cst_158 [1] : vector<4x256xf32> to vector<4xf32>
    %232 = vector.shape_cast %231 : vector<4xf32> to vector<4x1xf32>
    %233 = arith.addf %229, %232 : vector<4x1xf32>
    %c0_159 = arith.constant 0 : index
    %c0_160 = arith.constant 0 : index
    %c0_161 = arith.constant 0 : index
    %234 = vector.load %arg8[%c0_159, %c0_160, %c0_161] : memref<1x4x1xf32, #tpu.memory_space<vmem>>, vector<1x4x1xf32>
    %235 = vector.shape_cast %234 : vector<1x4x1xf32> to vector<4x1xf32>
    %236 = vector.shape_cast %233 : vector<4x1xf32> to vector<1x4x1xf32>
    tpu.vector_store %arg8[%c0_159, %c0_160, %c0_161], %236 {strides = array<i32>} : memref<1x4x1xf32, #tpu.memory_space<vmem>>, vector<1x4x1xf32>,
    %c0_162 = arith.constant 0 : index
    %c2_163 = arith.constant 2 : index
    %c0_164 = arith.constant 0 : index
    %c0_165 = arith.constant 0 : index
    %237 = vector.load %arg2[%c0_162, %c2_163, %c0_164, %c0_165] : memref<1x4x4x256xf32, #tpu.memory_space<vmem>>, vector<1x1x4x256xf32>
    %238 = vector.shape_cast %237 : vector<1x1x4x256xf32> to vector<4x256xf32>
    %c0_166 = arith.constant 0 : index
    %c0_167 = arith.constant 0 : index
    %239 = vector.load %arg9[%c0_166, %c0_167] : memref<8x256xf32, #tpu.memory_space<vmem>>, vector<4x256xf32>
    tpu.vector_store %arg9[%c0_166, %c0_167], %238 {strides = array<i32>} : memref<8x256xf32, #tpu.memory_space<vmem>>, vector<4x256xf32>,
    %c0_168 = arith.constant 0 : index
    %c0_169 = arith.constant 0 : index
    %240 = vector.load %arg9[%c0_168, %c0_169] : memref<8x256xf32, #tpu.memory_space<vmem>>, vector<8x256xf32>
    %c17_i32_170 = arith.constant 17 : i32
    %241 = tpu.dynamic_rotate %240 by %c17_i32_170 dim 1 : vector<8x256xf32>, i32 -> vector<8x256xf32>
    %c0_171 = arith.constant 0 : index
    %c0_172 = arith.constant 0 : index
    %242 = vector.load %arg5[%c0_171, %c0_172] : memref<9x256xf32, #tpu.memory_space<vmem>>, vector<1x256xf32>
    %243 = vector.broadcast %242 : vector<1x256xf32> to vector<8x256xf32>
    %244 = arith.mulf %241, %243 : vector<8x256xf32>
    %245 = arith.truncf %244 : vector<8x256xf32> to vector<8x256xbf16>
    %c0_173 = arith.constant 0 : index
    %c0_174 = arith.constant 0 : index
    %246 = vector.load %arg11[%c0_173, %c0_174] : memref<72x256xbf16, #tpu.memory_space<vmem>>, vector<8x256xbf16>
    tpu.vector_store %arg11[%c0_173, %c0_174], %245 {strides = array<i32>} : memref<72x256xbf16, #tpu.memory_space<vmem>>, vector<8x256xbf16>,
    %c16_i32_175 = arith.constant 16 : i32
    %247 = tpu.dynamic_rotate %240 by %c16_i32_175 dim 1 : vector<8x256xf32>, i32 -> vector<8x256xf32>
    %c1_176 = arith.constant 1 : index
    %c0_177 = arith.constant 0 : index
    %248 = vector.load %arg5[%c1_176, %c0_177] : memref<9x256xf32, #tpu.memory_space<vmem>>, vector<1x256xf32>
    %249 = vector.broadcast %248 : vector<1x256xf32> to vector<8x256xf32>
    %250 = arith.mulf %247, %249 : vector<8x256xf32>
    %251 = arith.truncf %250 : vector<8x256xf32> to vector<8x256xbf16>
    %c8_178 = arith.constant 8 : index
    %c0_179 = arith.constant 0 : index
    %252 = vector.load %arg11[%c8_178, %c0_179] : memref<72x256xbf16, #tpu.memory_space<vmem>>, vector<8x256xbf16>
    tpu.vector_store %arg11[%c8_178, %c0_179], %251 {strides = array<i32>} : memref<72x256xbf16, #tpu.memory_space<vmem>>, vector<8x256xbf16>,
    %c15_i32_180 = arith.constant 15 : i32
    %253 = tpu.dynamic_rotate %240 by %c15_i32_180 dim 1 : vector<8x256xf32>, i32 -> vector<8x256xf32>
    %c2_181 = arith.constant 2 : index
    %c0_182 = arith.constant 0 : index
    %254 = vector.load %arg5[%c2_181, %c0_182] : memref<9x256xf32, #tpu.memory_space<vmem>>, vector<1x256xf32>
    %255 = vector.broadcast %254 : vector<1x256xf32> to vector<8x256xf32>
    %256 = arith.mulf %253, %255 : vector<8x256xf32>
    %257 = arith.truncf %256 : vector<8x256xf32> to vector<8x256xbf16>
    %c16_183 = arith.constant 16 : index
    %c0_184 = arith.constant 0 : index
    %258 = vector.load %arg11[%c16_183, %c0_184] : memref<72x256xbf16, #tpu.memory_space<vmem>>, vector<8x256xbf16>
    tpu.vector_store %arg11[%c16_183, %c0_184], %257 {strides = array<i32>} : memref<72x256xbf16, #tpu.memory_space<vmem>>, vector<8x256xbf16>,
    %c1_i32_185 = arith.constant 1 : i32
    %259 = tpu.dynamic_rotate %240 by %c1_i32_185 dim 1 : vector<8x256xf32>, i32 -> vector<8x256xf32>
    %c3_186 = arith.constant 3 : index
    %c0_187 = arith.constant 0 : index
    %260 = vector.load %arg5[%c3_186, %c0_187] : memref<9x256xf32, #tpu.memory_space<vmem>>, vector<1x256xf32>
    %261 = vector.broadcast %260 : vector<1x256xf32> to vector<8x256xf32>
    %262 = arith.mulf %259, %261 : vector<8x256xf32>
    %263 = arith.truncf %262 : vector<8x256xf32> to vector<8x256xbf16>
    %c24_188 = arith.constant 24 : index
    %c0_189 = arith.constant 0 : index
    %264 = vector.load %arg11[%c24_188, %c0_189] : memref<72x256xbf16, #tpu.memory_space<vmem>>, vector<8x256xbf16>
    tpu.vector_store %arg11[%c24_188, %c0_189], %263 {strides = array<i32>} : memref<72x256xbf16, #tpu.memory_space<vmem>>, vector<8x256xbf16>,
    %c4_190 = arith.constant 4 : index
    %c0_191 = arith.constant 0 : index
    %265 = vector.load %arg5[%c4_190, %c0_191] : memref<9x256xf32, #tpu.memory_space<vmem>>, vector<1x256xf32>
    %266 = vector.broadcast %265 : vector<1x256xf32> to vector<8x256xf32>
    %267 = arith.mulf %240, %266 : vector<8x256xf32>
    %268 = arith.truncf %267 : vector<8x256xf32> to vector<8x256xbf16>
    %c32_192 = arith.constant 32 : index
    %c0_193 = arith.constant 0 : index
    %269 = vector.load %arg11[%c32_192, %c0_193] : memref<72x256xbf16, #tpu.memory_space<vmem>>, vector<8x256xbf16>
    tpu.vector_store %arg11[%c32_192, %c0_193], %268 {strides = array<i32>} : memref<72x256xbf16, #tpu.memory_space<vmem>>, vector<8x256xbf16>,
    %c255_i32_194 = arith.constant 255 : i32
    %270 = tpu.dynamic_rotate %240 by %c255_i32_194 dim 1 : vector<8x256xf32>, i32 -> vector<8x256xf32>
    %c5_195 = arith.constant 5 : index
    %c0_196 = arith.constant 0 : index
    %271 = vector.load %arg5[%c5_195, %c0_196] : memref<9x256xf32, #tpu.memory_space<vmem>>, vector<1x256xf32>
    %272 = vector.broadcast %271 : vector<1x256xf32> to vector<8x256xf32>
    %273 = arith.mulf %270, %272 : vector<8x256xf32>
    %274 = arith.truncf %273 : vector<8x256xf32> to vector<8x256xbf16>
    %c40_197 = arith.constant 40 : index
    %c0_198 = arith.constant 0 : index
    %275 = vector.load %arg11[%c40_197, %c0_198] : memref<72x256xbf16, #tpu.memory_space<vmem>>, vector<8x256xbf16>
    tpu.vector_store %arg11[%c40_197, %c0_198], %274 {strides = array<i32>} : memref<72x256xbf16, #tpu.memory_space<vmem>>, vector<8x256xbf16>,
    %c241_i32_199 = arith.constant 241 : i32
    %276 = tpu.dynamic_rotate %240 by %c241_i32_199 dim 1 : vector<8x256xf32>, i32 -> vector<8x256xf32>
    %c6_200 = arith.constant 6 : index
    %c0_201 = arith.constant 0 : index
    %277 = vector.load %arg5[%c6_200, %c0_201] : memref<9x256xf32, #tpu.memory_space<vmem>>, vector<1x256xf32>
    %278 = vector.broadcast %277 : vector<1x256xf32> to vector<8x256xf32>
    %279 = arith.mulf %276, %278 : vector<8x256xf32>
    %280 = arith.truncf %279 : vector<8x256xf32> to vector<8x256xbf16>
    %c48_202 = arith.constant 48 : index
    %c0_203 = arith.constant 0 : index
    %281 = vector.load %arg11[%c48_202, %c0_203] : memref<72x256xbf16, #tpu.memory_space<vmem>>, vector<8x256xbf16>
    tpu.vector_store %arg11[%c48_202, %c0_203], %280 {strides = array<i32>} : memref<72x256xbf16, #tpu.memory_space<vmem>>, vector<8x256xbf16>,
    %c240_i32_204 = arith.constant 240 : i32
    %282 = tpu.dynamic_rotate %240 by %c240_i32_204 dim 1 : vector<8x256xf32>, i32 -> vector<8x256xf32>
    %c7_205 = arith.constant 7 : index
    %c0_206 = arith.constant 0 : index
    %283 = vector.load %arg5[%c7_205, %c0_206] : memref<9x256xf32, #tpu.memory_space<vmem>>, vector<1x256xf32>
    %284 = vector.broadcast %283 : vector<1x256xf32> to vector<8x256xf32>
    %285 = arith.mulf %282, %284 : vector<8x256xf32>
    %286 = arith.truncf %285 : vector<8x256xf32> to vector<8x256xbf16>
    %c56_207 = arith.constant 56 : index
    %c0_208 = arith.constant 0 : index
    %287 = vector.load %arg11[%c56_207, %c0_208] : memref<72x256xbf16, #tpu.memory_space<vmem>>, vector<8x256xbf16>
    tpu.vector_store %arg11[%c56_207, %c0_208], %286 {strides = array<i32>} : memref<72x256xbf16, #tpu.memory_space<vmem>>, vector<8x256xbf16>,
    %c239_i32_209 = arith.constant 239 : i32
    %288 = tpu.dynamic_rotate %240 by %c239_i32_209 dim 1 : vector<8x256xf32>, i32 -> vector<8x256xf32>
    %c8_210 = arith.constant 8 : index
    %c0_211 = arith.constant 0 : index
    %289 = vector.load %arg5[%c8_210, %c0_211] : memref<9x256xf32, #tpu.memory_space<vmem>>, vector<1x256xf32>
    %290 = vector.broadcast %289 : vector<1x256xf32> to vector<8x256xf32>
    %291 = arith.mulf %288, %290 : vector<8x256xf32>
    %292 = arith.truncf %291 : vector<8x256xf32> to vector<8x256xbf16>
    %c64_212 = arith.constant 64 : index
    %c0_213 = arith.constant 0 : index
    %293 = vector.load %arg11[%c64_212, %c0_213] : memref<72x256xbf16, #tpu.memory_space<vmem>>, vector<8x256xbf16>
    tpu.vector_store %arg11[%c64_212, %c0_213], %292 {strides = array<i32>} : memref<72x256xbf16, #tpu.memory_space<vmem>>, vector<8x256xbf16>,
    %c0_214 = arith.constant 0 : index
    %c0_215 = arith.constant 0 : index
    %294 = vector.load %arg3[%c0_214, %c0_215] : memref<16x72xbf16, #tpu.memory_space<vmem>>, vector<16x72xbf16>
    %c0_216 = arith.constant 0 : index
    %c0_217 = arith.constant 0 : index
    %295 = vector.load %arg11[%c0_216, %c0_217] : memref<72x256xbf16, #tpu.memory_space<vmem>>, vector<72x256xbf16>
    %cst_218 = arith.constant dense<0.000000e+00> : vector<16x256xf32>
    %296 = tpu.matmul %294, %295, %cst_218 {dimension_numbers = #tpu.dot_dimension_numbers<[1], [0], [0], [1], [0, 0, 1, 1], [], []>} : vector<16x72xbf16>, vector<72x256xbf16>, vector<16x256xf32> -> vector<16x256xf32>
    %c0_219 = arith.constant 0 : index
    %c0_220 = arith.constant 0 : index
    %297 = vector.load %arg4[%c0_219, %c0_220] : memref<16x1xf32, #tpu.memory_space<vmem>>, vector<16x1xf32>
    %298 = vector.broadcast %297 : vector<16x1xf32> to vector<16x256xf32>
    %299 = arith.addf %296, %298 : vector<16x256xf32>
    %300 = vector.extract_strided_slice %299 {offsets = [0, 0], sizes = [4, 256], strides = [1, 1]} : vector<16x256xf32> to vector<4x256xf32>
    %cst_221 = arith.constant 5.000000e-01 : f32
    %301 = vector.broadcast %cst_221 : f32 to vector<4x256xf32>
    %302 = arith.mulf %301, %300 : vector<4x256xf32>
    %303 = math.tanh %302 : vector<4x256xf32>
    %cst_222 = arith.constant 5.000000e-01 : f32
    %304 = vector.broadcast %cst_222 : f32 to vector<4x256xf32>
    %305 = arith.mulf %304, %303 : vector<4x256xf32>
    %cst_223 = arith.constant 5.000000e-01 : f32
    %306 = vector.broadcast %cst_223 : f32 to vector<4x256xf32>
    %307 = arith.addf %305, %306 : vector<4x256xf32>
    %308 = vector.extract_strided_slice %299 {offsets = [4, 0], sizes = [4, 256], strides = [1, 1]} : vector<16x256xf32> to vector<4x256xf32>
    %cst_224 = arith.constant 5.000000e-01 : f32
    %309 = vector.broadcast %cst_224 : f32 to vector<4x256xf32>
    %310 = arith.mulf %309, %308 : vector<4x256xf32>
    %311 = math.tanh %310 : vector<4x256xf32>
    %cst_225 = arith.constant 5.000000e-01 : f32
    %312 = vector.broadcast %cst_225 : f32 to vector<4x256xf32>
    %313 = arith.mulf %312, %311 : vector<4x256xf32>
    %cst_226 = arith.constant 5.000000e-01 : f32
    %314 = vector.broadcast %cst_226 : f32 to vector<4x256xf32>
    %315 = arith.addf %313, %314 : vector<4x256xf32>
    %316 = vector.extract_strided_slice %299 {offsets = [8, 0], sizes = [4, 256], strides = [1, 1]} : vector<16x256xf32> to vector<4x256xf32>
    %cst_227 = arith.constant 5.000000e-01 : f32
    %317 = vector.broadcast %cst_227 : f32 to vector<4x256xf32>
    %318 = arith.mulf %317, %316 : vector<4x256xf32>
    %319 = math.tanh %318 : vector<4x256xf32>
    %cst_228 = arith.constant 5.000000e-01 : f32
    %320 = vector.broadcast %cst_228 : f32 to vector<4x256xf32>
    %321 = arith.mulf %320, %319 : vector<4x256xf32>
    %cst_229 = arith.constant 5.000000e-01 : f32
    %322 = vector.broadcast %cst_229 : f32 to vector<4x256xf32>
    %323 = arith.addf %321, %322 : vector<4x256xf32>
    %324 = vector.extract_strided_slice %299 {offsets = [12, 0], sizes = [4, 256], strides = [1, 1]} : vector<16x256xf32> to vector<4x256xf32>
    %325 = math.tanh %324 : vector<4x256xf32>
    %c0_230 = arith.constant 0 : index
    %c0_231 = arith.constant 0 : index
    %326 = vector.load %arg10[%c0_230, %c0_231] : memref<4x256xf32, #tpu.memory_space<vmem>>, vector<4x256xf32>
    %327 = arith.mulf %315, %326 : vector<4x256xf32>
    %328 = arith.mulf %307, %325 : vector<4x256xf32>
    %329 = arith.addf %327, %328 : vector<4x256xf32>
    %330 = math.tanh %329 : vector<4x256xf32>
    %331 = arith.mulf %323, %330 : vector<4x256xf32>
    %c0_232 = arith.constant 0 : index
    %c0_233 = arith.constant 0 : index
    %332 = vector.load %arg10[%c0_232, %c0_233] : memref<4x256xf32, #tpu.memory_space<vmem>>, vector<4x256xf32>
    tpu.vector_store %arg10[%c0_232, %c0_233], %329 {strides = array<i32>} : memref<4x256xf32, #tpu.memory_space<vmem>>, vector<4x256xf32>,
    %c4_234 = arith.constant 4 : index
    %c0_235 = arith.constant 0 : index
    %333 = vector.load %arg9[%c4_234, %c0_235] : memref<8x256xf32, #tpu.memory_space<vmem>>, vector<4x256xf32>
    tpu.vector_store %arg9[%c4_234, %c0_235], %331 {strides = array<i32>} : memref<8x256xf32, #tpu.memory_space<vmem>>, vector<4x256xf32>,
    %c0_236 = arith.constant 0 : index
    %c0_237 = arith.constant 0 : index
    %c2_238 = arith.constant 2 : index
    %c0_239 = arith.constant 0 : index
    %c0_240 = arith.constant 0 : index
    %334 = vector.load %arg6[%c0_236, %c0_237, %c2_238, %c0_239, %c0_240] : memref<1x1x4x4x256xf32, #tpu.memory_space<vmem>>, vector<1x1x1x4x256xf32>
    %335 = vector.shape_cast %334 : vector<1x1x1x4x256xf32> to vector<4x256xf32>
    %336 = vector.shape_cast %331 : vector<4x256xf32> to vector<1x1x1x4x256xf32>
    tpu.vector_store %arg6[%c0_236, %c0_237, %c2_238, %c0_239, %c0_240], %336 {strides = array<i32>} : memref<1x1x4x4x256xf32, #tpu.memory_space<vmem>>, vector<1x1x1x4x256xf32>,
    %c0_241 = arith.constant 0 : index
    %c0_242 = arith.constant 0 : index
    %c0_243 = arith.constant 0 : index
    %337 = vector.load %arg7[%c0_241, %c0_242, %c0_243] : memref<1x4x1xf32, #tpu.memory_space<vmem>>, vector<1x4x1xf32>
    %338 = vector.shape_cast %337 : vector<1x4x1xf32> to vector<4x1xf32>
    %cst_244 = arith.constant dense<0.000000e+00> : vector<4xf32>
    %339 = vector.multi_reduction <add>, %331, %cst_244 [1] : vector<4x256xf32> to vector<4xf32>
    %340 = vector.shape_cast %339 : vector<4xf32> to vector<4x1xf32>
    %341 = arith.addf %338, %340 : vector<4x1xf32>
    %c0_245 = arith.constant 0 : index
    %c0_246 = arith.constant 0 : index
    %c0_247 = arith.constant 0 : index
    %342 = vector.load %arg7[%c0_245, %c0_246, %c0_247] : memref<1x4x1xf32, #tpu.memory_space<vmem>>, vector<1x4x1xf32>
    %343 = vector.shape_cast %342 : vector<1x4x1xf32> to vector<4x1xf32>
    %344 = vector.shape_cast %341 : vector<4x1xf32> to vector<1x4x1xf32>
    tpu.vector_store %arg7[%c0_245, %c0_246, %c0_247], %344 {strides = array<i32>} : memref<1x4x1xf32, #tpu.memory_space<vmem>>, vector<1x4x1xf32>,
    %c0_248 = arith.constant 0 : index
    %c0_249 = arith.constant 0 : index
    %c0_250 = arith.constant 0 : index
    %345 = vector.load %arg8[%c0_248, %c0_249, %c0_250] : memref<1x4x1xf32, #tpu.memory_space<vmem>>, vector<1x4x1xf32>
    %346 = vector.shape_cast %345 : vector<1x4x1xf32> to vector<4x1xf32>
    %347 = arith.mulf %331, %331 : vector<4x256xf32>
    %cst_251 = arith.constant dense<0.000000e+00> : vector<4xf32>
    %348 = vector.multi_reduction <add>, %347, %cst_251 [1] : vector<4x256xf32> to vector<4xf32>
    %349 = vector.shape_cast %348 : vector<4xf32> to vector<4x1xf32>
    %350 = arith.addf %346, %349 : vector<4x1xf32>
    %c0_252 = arith.constant 0 : index
    %c0_253 = arith.constant 0 : index
    %c0_254 = arith.constant 0 : index
    %351 = vector.load %arg8[%c0_252, %c0_253, %c0_254] : memref<1x4x1xf32, #tpu.memory_space<vmem>>, vector<1x4x1xf32>
    %352 = vector.shape_cast %351 : vector<1x4x1xf32> to vector<4x1xf32>
    %353 = vector.shape_cast %350 : vector<4x1xf32> to vector<1x4x1xf32>
    tpu.vector_store %arg8[%c0_252, %c0_253, %c0_254], %353 {strides = array<i32>} : memref<1x4x1xf32, #tpu.memory_space<vmem>>, vector<1x4x1xf32>,
    %c0_255 = arith.constant 0 : index
    %c3_256 = arith.constant 3 : index
    %c0_257 = arith.constant 0 : index
    %c0_258 = arith.constant 0 : index
    %354 = vector.load %arg2[%c0_255, %c3_256, %c0_257, %c0_258] : memref<1x4x4x256xf32, #tpu.memory_space<vmem>>, vector<1x1x4x256xf32>
    %355 = vector.shape_cast %354 : vector<1x1x4x256xf32> to vector<4x256xf32>
    %c0_259 = arith.constant 0 : index
    %c0_260 = arith.constant 0 : index
    %356 = vector.load %arg9[%c0_259, %c0_260] : memref<8x256xf32, #tpu.memory_space<vmem>>, vector<4x256xf32>
    tpu.vector_store %arg9[%c0_259, %c0_260], %355 {strides = array<i32>} : memref<8x256xf32, #tpu.memory_space<vmem>>, vector<4x256xf32>,
    %c0_261 = arith.constant 0 : index
    %c0_262 = arith.constant 0 : index
    %357 = vector.load %arg9[%c0_261, %c0_262] : memref<8x256xf32, #tpu.memory_space<vmem>>, vector<8x256xf32>
    %c17_i32_263 = arith.constant 17 : i32
    %358 = tpu.dynamic_rotate %357 by %c17_i32_263 dim 1 : vector<8x256xf32>, i32 -> vector<8x256xf32>
    %c0_264 = arith.constant 0 : index
    %c0_265 = arith.constant 0 : index
    %359 = vector.load %arg5[%c0_264, %c0_265] : memref<9x256xf32, #tpu.memory_space<vmem>>, vector<1x256xf32>
    %360 = vector.broadcast %359 : vector<1x256xf32> to vector<8x256xf32>
    %361 = arith.mulf %358, %360 : vector<8x256xf32>
    %362 = arith.truncf %361 : vector<8x256xf32> to vector<8x256xbf16>
    %c0_266 = arith.constant 0 : index
    %c0_267 = arith.constant 0 : index
    %363 = vector.load %arg11[%c0_266, %c0_267] : memref<72x256xbf16, #tpu.memory_space<vmem>>, vector<8x256xbf16>
    tpu.vector_store %arg11[%c0_266, %c0_267], %362 {strides = array<i32>} : memref<72x256xbf16, #tpu.memory_space<vmem>>, vector<8x256xbf16>,
    %c16_i32_268 = arith.constant 16 : i32
    %364 = tpu.dynamic_rotate %357 by %c16_i32_268 dim 1 : vector<8x256xf32>, i32 -> vector<8x256xf32>
    %c1_269 = arith.constant 1 : index
    %c0_270 = arith.constant 0 : index
    %365 = vector.load %arg5[%c1_269, %c0_270] : memref<9x256xf32, #tpu.memory_space<vmem>>, vector<1x256xf32>
    %366 = vector.broadcast %365 : vector<1x256xf32> to vector<8x256xf32>
    %367 = arith.mulf %364, %366 : vector<8x256xf32>
    %368 = arith.truncf %367 : vector<8x256xf32> to vector<8x256xbf16>
    %c8_271 = arith.constant 8 : index
    %c0_272 = arith.constant 0 : index
    %369 = vector.load %arg11[%c8_271, %c0_272] : memref<72x256xbf16, #tpu.memory_space<vmem>>, vector<8x256xbf16>
    tpu.vector_store %arg11[%c8_271, %c0_272], %368 {strides = array<i32>} : memref<72x256xbf16, #tpu.memory_space<vmem>>, vector<8x256xbf16>,
    %c15_i32_273 = arith.constant 15 : i32
    %370 = tpu.dynamic_rotate %357 by %c15_i32_273 dim 1 : vector<8x256xf32>, i32 -> vector<8x256xf32>
    %c2_274 = arith.constant 2 : index
    %c0_275 = arith.constant 0 : index
    %371 = vector.load %arg5[%c2_274, %c0_275] : memref<9x256xf32, #tpu.memory_space<vmem>>, vector<1x256xf32>
    %372 = vector.broadcast %371 : vector<1x256xf32> to vector<8x256xf32>
    %373 = arith.mulf %370, %372 : vector<8x256xf32>
    %374 = arith.truncf %373 : vector<8x256xf32> to vector<8x256xbf16>
    %c16_276 = arith.constant 16 : index
    %c0_277 = arith.constant 0 : index
    %375 = vector.load %arg11[%c16_276, %c0_277] : memref<72x256xbf16, #tpu.memory_space<vmem>>, vector<8x256xbf16>
    tpu.vector_store %arg11[%c16_276, %c0_277], %374 {strides = array<i32>} : memref<72x256xbf16, #tpu.memory_space<vmem>>, vector<8x256xbf16>,
    %c1_i32_278 = arith.constant 1 : i32
    %376 = tpu.dynamic_rotate %357 by %c1_i32_278 dim 1 : vector<8x256xf32>, i32 -> vector<8x256xf32>
    %c3_279 = arith.constant 3 : index
    %c0_280 = arith.constant 0 : index
    %377 = vector.load %arg5[%c3_279, %c0_280] : memref<9x256xf32, #tpu.memory_space<vmem>>, vector<1x256xf32>
    %378 = vector.broadcast %377 : vector<1x256xf32> to vector<8x256xf32>
    %379 = arith.mulf %376, %378 : vector<8x256xf32>
    %380 = arith.truncf %379 : vector<8x256xf32> to vector<8x256xbf16>
    %c24_281 = arith.constant 24 : index
    %c0_282 = arith.constant 0 : index
    %381 = vector.load %arg11[%c24_281, %c0_282] : memref<72x256xbf16, #tpu.memory_space<vmem>>, vector<8x256xbf16>
    tpu.vector_store %arg11[%c24_281, %c0_282], %380 {strides = array<i32>} : memref<72x256xbf16, #tpu.memory_space<vmem>>, vector<8x256xbf16>,
    %c4_283 = arith.constant 4 : index
    %c0_284 = arith.constant 0 : index
    %382 = vector.load %arg5[%c4_283, %c0_284] : memref<9x256xf32, #tpu.memory_space<vmem>>, vector<1x256xf32>
    %383 = vector.broadcast %382 : vector<1x256xf32> to vector<8x256xf32>
    %384 = arith.mulf %357, %383 : vector<8x256xf32>
    %385 = arith.truncf %384 : vector<8x256xf32> to vector<8x256xbf16>
    %c32_285 = arith.constant 32 : index
    %c0_286 = arith.constant 0 : index
    %386 = vector.load %arg11[%c32_285, %c0_286] : memref<72x256xbf16, #tpu.memory_space<vmem>>, vector<8x256xbf16>
    tpu.vector_store %arg11[%c32_285, %c0_286], %385 {strides = array<i32>} : memref<72x256xbf16, #tpu.memory_space<vmem>>, vector<8x256xbf16>,
    %c255_i32_287 = arith.constant 255 : i32
    %387 = tpu.dynamic_rotate %357 by %c255_i32_287 dim 1 : vector<8x256xf32>, i32 -> vector<8x256xf32>
    %c5_288 = arith.constant 5 : index
    %c0_289 = arith.constant 0 : index
    %388 = vector.load %arg5[%c5_288, %c0_289] : memref<9x256xf32, #tpu.memory_space<vmem>>, vector<1x256xf32>
    %389 = vector.broadcast %388 : vector<1x256xf32> to vector<8x256xf32>
    %390 = arith.mulf %387, %389 : vector<8x256xf32>
    %391 = arith.truncf %390 : vector<8x256xf32> to vector<8x256xbf16>
    %c40_290 = arith.constant 40 : index
    %c0_291 = arith.constant 0 : index
    %392 = vector.load %arg11[%c40_290, %c0_291] : memref<72x256xbf16, #tpu.memory_space<vmem>>, vector<8x256xbf16>
    tpu.vector_store %arg11[%c40_290, %c0_291], %391 {strides = array<i32>} : memref<72x256xbf16, #tpu.memory_space<vmem>>, vector<8x256xbf16>,
    %c241_i32_292 = arith.constant 241 : i32
    %393 = tpu.dynamic_rotate %357 by %c241_i32_292 dim 1 : vector<8x256xf32>, i32 -> vector<8x256xf32>
    %c6_293 = arith.constant 6 : index
    %c0_294 = arith.constant 0 : index
    %394 = vector.load %arg5[%c6_293, %c0_294] : memref<9x256xf32, #tpu.memory_space<vmem>>, vector<1x256xf32>
    %395 = vector.broadcast %394 : vector<1x256xf32> to vector<8x256xf32>
    %396 = arith.mulf %393, %395 : vector<8x256xf32>
    %397 = arith.truncf %396 : vector<8x256xf32> to vector<8x256xbf16>
    %c48_295 = arith.constant 48 : index
    %c0_296 = arith.constant 0 : index
    %398 = vector.load %arg11[%c48_295, %c0_296] : memref<72x256xbf16, #tpu.memory_space<vmem>>, vector<8x256xbf16>
    tpu.vector_store %arg11[%c48_295, %c0_296], %397 {strides = array<i32>} : memref<72x256xbf16, #tpu.memory_space<vmem>>, vector<8x256xbf16>,
    %c240_i32_297 = arith.constant 240 : i32
    %399 = tpu.dynamic_rotate %357 by %c240_i32_297 dim 1 : vector<8x256xf32>, i32 -> vector<8x256xf32>
    %c7_298 = arith.constant 7 : index
    %c0_299 = arith.constant 0 : index
    %400 = vector.load %arg5[%c7_298, %c0_299] : memref<9x256xf32, #tpu.memory_space<vmem>>, vector<1x256xf32>
    %401 = vector.broadcast %400 : vector<1x256xf32> to vector<8x256xf32>
    %402 = arith.mulf %399, %401 : vector<8x256xf32>
    %403 = arith.truncf %402 : vector<8x256xf32> to vector<8x256xbf16>
    %c56_300 = arith.constant 56 : index
    %c0_301 = arith.constant 0 : index
    %404 = vector.load %arg11[%c56_300, %c0_301] : memref<72x256xbf16, #tpu.memory_space<vmem>>, vector<8x256xbf16>
    tpu.vector_store %arg11[%c56_300, %c0_301], %403 {strides = array<i32>} : memref<72x256xbf16, #tpu.memory_space<vmem>>, vector<8x256xbf16>,
    %c239_i32_302 = arith.constant 239 : i32
    %405 = tpu.dynamic_rotate %357 by %c239_i32_302 dim 1 : vector<8x256xf32>, i32 -> vector<8x256xf32>
    %c8_303 = arith.constant 8 : index
    %c0_304 = arith.constant 0 : index
    %406 = vector.load %arg5[%c8_303, %c0_304] : memref<9x256xf32, #tpu.memory_space<vmem>>, vector<1x256xf32>
    %407 = vector.broadcast %406 : vector<1x256xf32> to vector<8x256xf32>
    %408 = arith.mulf %405, %407 : vector<8x256xf32>
    %409 = arith.truncf %408 : vector<8x256xf32> to vector<8x256xbf16>
    %c64_305 = arith.constant 64 : index
    %c0_306 = arith.constant 0 : index
    %410 = vector.load %arg11[%c64_305, %c0_306] : memref<72x256xbf16, #tpu.memory_space<vmem>>, vector<8x256xbf16>
    tpu.vector_store %arg11[%c64_305, %c0_306], %409 {strides = array<i32>} : memref<72x256xbf16, #tpu.memory_space<vmem>>, vector<8x256xbf16>,
    %c0_307 = arith.constant 0 : index
    %c0_308 = arith.constant 0 : index
    %411 = vector.load %arg3[%c0_307, %c0_308] : memref<16x72xbf16, #tpu.memory_space<vmem>>, vector<16x72xbf16>
    %c0_309 = arith.constant 0 : index
    %c0_310 = arith.constant 0 : index
    %412 = vector.load %arg11[%c0_309, %c0_310] : memref<72x256xbf16, #tpu.memory_space<vmem>>, vector<72x256xbf16>
    %cst_311 = arith.constant dense<0.000000e+00> : vector<16x256xf32>
    %413 = tpu.matmul %411, %412, %cst_311 {dimension_numbers = #tpu.dot_dimension_numbers<[1], [0], [0], [1], [0, 0, 1, 1], [], []>} : vector<16x72xbf16>, vector<72x256xbf16>, vector<16x256xf32> -> vector<16x256xf32>
    %c0_312 = arith.constant 0 : index
    %c0_313 = arith.constant 0 : index
    %414 = vector.load %arg4[%c0_312, %c0_313] : memref<16x1xf32, #tpu.memory_space<vmem>>, vector<16x1xf32>
    %415 = vector.broadcast %414 : vector<16x1xf32> to vector<16x256xf32>
    %416 = arith.addf %413, %415 : vector<16x256xf32>
    %417 = vector.extract_strided_slice %416 {offsets = [0, 0], sizes = [4, 256], strides = [1, 1]} : vector<16x256xf32> to vector<4x256xf32>
    %cst_314 = arith.constant 5.000000e-01 : f32
    %418 = vector.broadcast %cst_314 : f32 to vector<4x256xf32>
    %419 = arith.mulf %418, %417 : vector<4x256xf32>
    %420 = math.tanh %419 : vector<4x256xf32>
    %cst_315 = arith.constant 5.000000e-01 : f32
    %421 = vector.broadcast %cst_315 : f32 to vector<4x256xf32>
    %422 = arith.mulf %421, %420 : vector<4x256xf32>
    %cst_316 = arith.constant 5.000000e-01 : f32
    %423 = vector.broadcast %cst_316 : f32 to vector<4x256xf32>
    %424 = arith.addf %422, %423 : vector<4x256xf32>
    %425 = vector.extract_strided_slice %416 {offsets = [4, 0], sizes = [4, 256], strides = [1, 1]} : vector<16x256xf32> to vector<4x256xf32>
    %cst_317 = arith.constant 5.000000e-01 : f32
    %426 = vector.broadcast %cst_317 : f32 to vector<4x256xf32>
    %427 = arith.mulf %426, %425 : vector<4x256xf32>
    %428 = math.tanh %427 : vector<4x256xf32>
    %cst_318 = arith.constant 5.000000e-01 : f32
    %429 = vector.broadcast %cst_318 : f32 to vector<4x256xf32>
    %430 = arith.mulf %429, %428 : vector<4x256xf32>
    %cst_319 = arith.constant 5.000000e-01 : f32
    %431 = vector.broadcast %cst_319 : f32 to vector<4x256xf32>
    %432 = arith.addf %430, %431 : vector<4x256xf32>
    %433 = vector.extract_strided_slice %416 {offsets = [8, 0], sizes = [4, 256], strides = [1, 1]} : vector<16x256xf32> to vector<4x256xf32>
    %cst_320 = arith.constant 5.000000e-01 : f32
    %434 = vector.broadcast %cst_320 : f32 to vector<4x256xf32>
    %435 = arith.mulf %434, %433 : vector<4x256xf32>
    %436 = math.tanh %435 : vector<4x256xf32>
    %cst_321 = arith.constant 5.000000e-01 : f32
    %437 = vector.broadcast %cst_321 : f32 to vector<4x256xf32>
    %438 = arith.mulf %437, %436 : vector<4x256xf32>
    %cst_322 = arith.constant 5.000000e-01 : f32
    %439 = vector.broadcast %cst_322 : f32 to vector<4x256xf32>
    %440 = arith.addf %438, %439 : vector<4x256xf32>
    %441 = vector.extract_strided_slice %416 {offsets = [12, 0], sizes = [4, 256], strides = [1, 1]} : vector<16x256xf32> to vector<4x256xf32>
    %442 = math.tanh %441 : vector<4x256xf32>
    %c0_323 = arith.constant 0 : index
    %c0_324 = arith.constant 0 : index
    %443 = vector.load %arg10[%c0_323, %c0_324] : memref<4x256xf32, #tpu.memory_space<vmem>>, vector<4x256xf32>
    %444 = arith.mulf %432, %443 : vector<4x256xf32>
    %445 = arith.mulf %424, %442 : vector<4x256xf32>
    %446 = arith.addf %444, %445 : vector<4x256xf32>
    %447 = math.tanh %446 : vector<4x256xf32>
    %448 = arith.mulf %440, %447 : vector<4x256xf32>
    %c0_325 = arith.constant 0 : index
    %c0_326 = arith.constant 0 : index
    %449 = vector.load %arg10[%c0_325, %c0_326] : memref<4x256xf32, #tpu.memory_space<vmem>>, vector<4x256xf32>
    tpu.vector_store %arg10[%c0_325, %c0_326], %446 {strides = array<i32>} : memref<4x256xf32, #tpu.memory_space<vmem>>, vector<4x256xf32>,
    %c4_327 = arith.constant 4 : index
    %c0_328 = arith.constant 0 : index
    %450 = vector.load %arg9[%c4_327, %c0_328] : memref<8x256xf32, #tpu.memory_space<vmem>>, vector<4x256xf32>
    tpu.vector_store %arg9[%c4_327, %c0_328], %448 {strides = array<i32>} : memref<8x256xf32, #tpu.memory_space<vmem>>, vector<4x256xf32>,
    %c0_329 = arith.constant 0 : index
    %c0_330 = arith.constant 0 : index
    %c3_331 = arith.constant 3 : index
    %c0_332 = arith.constant 0 : index
    %c0_333 = arith.constant 0 : index
    %451 = vector.load %arg6[%c0_329, %c0_330, %c3_331, %c0_332, %c0_333] : memref<1x1x4x4x256xf32, #tpu.memory_space<vmem>>, vector<1x1x1x4x256xf32>
    %452 = vector.shape_cast %451 : vector<1x1x1x4x256xf32> to vector<4x256xf32>
    %453 = vector.shape_cast %448 : vector<4x256xf32> to vector<1x1x1x4x256xf32>
    tpu.vector_store %arg6[%c0_329, %c0_330, %c3_331, %c0_332, %c0_333], %453 {strides = array<i32>} : memref<1x1x4x4x256xf32, #tpu.memory_space<vmem>>, vector<1x1x1x4x256xf32>,
    %c0_334 = arith.constant 0 : index
    %c0_335 = arith.constant 0 : index
    %c0_336 = arith.constant 0 : index
    %454 = vector.load %arg7[%c0_334, %c0_335, %c0_336] : memref<1x4x1xf32, #tpu.memory_space<vmem>>, vector<1x4x1xf32>
    %455 = vector.shape_cast %454 : vector<1x4x1xf32> to vector<4x1xf32>
    %cst_337 = arith.constant dense<0.000000e+00> : vector<4xf32>
    %456 = vector.multi_reduction <add>, %448, %cst_337 [1] : vector<4x256xf32> to vector<4xf32>
    %457 = vector.shape_cast %456 : vector<4xf32> to vector<4x1xf32>
    %458 = arith.addf %455, %457 : vector<4x1xf32>
    %c0_338 = arith.constant 0 : index
    %c0_339 = arith.constant 0 : index
    %c0_340 = arith.constant 0 : index
    %459 = vector.load %arg7[%c0_338, %c0_339, %c0_340] : memref<1x4x1xf32, #tpu.memory_space<vmem>>, vector<1x4x1xf32>
    %460 = vector.shape_cast %459 : vector<1x4x1xf32> to vector<4x1xf32>
    %461 = vector.shape_cast %458 : vector<4x1xf32> to vector<1x4x1xf32>
    tpu.vector_store %arg7[%c0_338, %c0_339, %c0_340], %461 {strides = array<i32>} : memref<1x4x1xf32, #tpu.memory_space<vmem>>, vector<1x4x1xf32>,
    %c0_341 = arith.constant 0 : index
    %c0_342 = arith.constant 0 : index
    %c0_343 = arith.constant 0 : index
    %462 = vector.load %arg8[%c0_341, %c0_342, %c0_343] : memref<1x4x1xf32, #tpu.memory_space<vmem>>, vector<1x4x1xf32>
    %463 = vector.shape_cast %462 : vector<1x4x1xf32> to vector<4x1xf32>
    %464 = arith.mulf %448, %448 : vector<4x256xf32>
    %cst_344 = arith.constant dense<0.000000e+00> : vector<4xf32>
    %465 = vector.multi_reduction <add>, %464, %cst_344 [1] : vector<4x256xf32> to vector<4xf32>
    %466 = vector.shape_cast %465 : vector<4xf32> to vector<4x1xf32>
    %467 = arith.addf %463, %466 : vector<4x1xf32>
    %c0_345 = arith.constant 0 : index
    %c0_346 = arith.constant 0 : index
    %c0_347 = arith.constant 0 : index
    %468 = vector.load %arg8[%c0_345, %c0_346, %c0_347] : memref<1x4x1xf32, #tpu.memory_space<vmem>>, vector<1x4x1xf32>
    %469 = vector.shape_cast %468 : vector<1x4x1xf32> to vector<4x1xf32>
    %470 = vector.shape_cast %467 : vector<4x1xf32> to vector<1x4x1xf32>
    tpu.vector_store %arg8[%c0_345, %c0_346, %c0_347], %470 {strides = array<i32>} : memref<1x4x1xf32, #tpu.memory_space<vmem>>, vector<1x4x1xf32>,
    return
  }
  func.func @transform_0(%arg0: i32, %arg1: i32) -> (i32, i32, i32, i32) {
    %c0_i32 = arith.constant 0 : i32
    %c0_i32_0 = arith.constant 0 : i32
    %c0_i32_1 = arith.constant 0 : i32
    return %arg0, %arg1, %c0_i32, %c0_i32_0 : i32, i32, i32, i32
  }
  func.func @transform_1(%arg0: i32, %arg1: i32) -> (i32, i32) {
    %c0_i32 = arith.constant 0 : i32
    %c0_i32_0 = arith.constant 0 : i32
    %c0_i32_1 = arith.constant 0 : i32
    return %c0_i32, %c0_i32_0 : i32, i32
  }
  func.func @transform_2(%arg0: i32, %arg1: i32) -> (i32, i32) {
    %c0_i32 = arith.constant 0 : i32
    %c0_i32_0 = arith.constant 0 : i32
    %c0_i32_1 = arith.constant 0 : i32
    return %c0_i32, %c0_i32_0 : i32, i32
  }
  func.func @transform_3(%arg0: i32, %arg1: i32) -> (i32, i32) {
    %c0_i32 = arith.constant 0 : i32
    %c0_i32_0 = arith.constant 0 : i32
    %c0_i32_1 = arith.constant 0 : i32
    return %c0_i32, %c0_i32_0 : i32, i32
  }
  func.func @transform_4(%arg0: i32, %arg1: i32) -> (i32, i32, i32, i32, i32) {
    %c0_i32 = arith.constant 0 : i32
    %c0_i32_0 = arith.constant 0 : i32
    %c0_i32_1 = arith.constant 0 : i32
    %c0_i32_2 = arith.constant 0 : i32
    return %arg0, %c0_i32, %arg1, %c0_i32_0, %c0_i32_1 : i32, i32, i32, i32, i32
  }
  func.func @transform_5(%arg0: i32, %arg1: i32) -> (i32, i32, i32) {
    %c0_i32 = arith.constant 0 : i32
    %c0_i32_0 = arith.constant 0 : i32
    %c0_i32_1 = arith.constant 0 : i32
    return %arg0, %c0_i32, %c0_i32_0 : i32, i32, i32
  }
  func.func @transform_6(%arg0: i32, %arg1: i32) -> (i32, i32, i32) {
    %c0_i32 = arith.constant 0 : i32
    %c0_i32_0 = arith.constant 0 : i32
    %c0_i32_1 = arith.constant 0 : i32
    return %arg0, %c0_i32, %c0_i32_0 : i32, i32, i32
  }
}

</mosaic_0001>

<bundles_post_ra>
// kernel: tpu_custom_call.1
= control target key start
LH: loop header
LB: loop body
LE: loop exit
PB: predicated region body
PF: predicated region fallthrough
CT: control target
= control target key end

     0   :  { %s3020_s0 = inlined_call_operand.hbm [shape: f32[2,4,4,256], index: 0, kind: input, shape index: {}]   ;;  %s3021_s1 = inlined_call_operand.vmem [shape: bf16[16,72], index: 1, kind: input, shape index: {}]   ;;  %s3022_s2 = inlined_call_operand.vmem [shape: f32[16,1], index: 2, kind: input, shape index: {}]   ;;  %s3023_s3 = inlined_call_operand.hbm [shape: f32[9,256], index: 3, kind: input, shape index: {}]   ;;  %s3024_s4 = inlined_call_operand.hbm [shape: f32[2,1,4,4,256], index: 4, kind: output, shape index: {0}]   ;;  %s3025_s5 = inlined_call_operand.vmem [shape: f32[2,4,1], index: 5, kind: output, shape index: {1}]   ;;  %s3026_s6 = inlined_call_operand.vmem [shape: f32[2,4,1], index: 6, kind: output, shape index: {2}]  }
   0x1   :  { %3031 = sst [smem:[#allocation17_spill]] %s3023_s3 }
   0x2   :  { %12 = vsyncpa [#allocation6], 0 }
   0x3   :  { %14 = vsyncpa [#allocation6 + $0x1], 0 }
   0x4   :  { %15 = vsyncpa [#allocation9], 0 }
   0x5   :  { %16 = vsyncpa [#allocation7], 0 }
   0x6   :  { %18 = vsyncpa [#allocation7 + $0x1], 0  ;;  %s2518_s21 = smov 0   ;;  %s2520_s22 = smov 0  }
   0x7   :  { %s2522_s23 = smov 0   ;;  %s2524_s24 = smov 0  }
   0x8   :  { %s2526_s25 = smov 0   ;;  %s2528_s26 = smov 0  }
   0x9 LB: > { %3032 = sst [smem:[#allocation14_spill]] %s2464_s26  ;;  %s1947_s27 = sadd.s32 4294967295, %s2464_s26   ;;  %s2464_s26 = sphi %s2528_s26, %s24_s26   ;;  %s2460_s25 = sphi %s2526_s25, %s3050_s25   ;;  %s2456_s24 = sphi %s2524_s24, %s3049_s24   ;;  %s2452_s23 = sphi %s2522_s23, %s3048_s23   ;;  %s2448_s22 = sphi %s2520_s22, %s3047_s22   ;;  %s2444_s21 = sphi %s2518_s21, %s3046_s21  }
   0xa   : > { %s1948_s28 = sadd.s32 4294967294, %s2464_s26   ;;  %p58_p0 = scmp.ne.s32.totalorder %s2448_s22, %s2444_s21 }
   0xb   : > { %p2552_p1 = scmp.eq.s32.totalorder %s1947_s27, 0  ;;  %p2556_p2 = scmp.eq.s32.totalorder %s1947_s27, 1 }
   0xc   : > { %p153_p3 = scmp.eq.s32.totalorder %s1948_s28, 1  ;;  %p1949_p5 = scmp.ge.s32.totalorder %s2464_s26, 1 }
   0xd   : > { %p2562_p4 = por %p2552_p1, %p58_p0  ;;  %p212_p7 = scmp.lt.s32.totalorder %s2464_s26, 3 }
   0xe   : > { %p2567_p6 = por %p153_p3, %p58_p0  ;;  %s3038_s3 = sld [smem:[#allocation17_spill]] }
   0xf   : > { %p2575_p8 = pnand %p1949_p5, %p212_p7  ;;  %s2466_s13 = smov [#allocation8]  }
  0x10   : > { %s3036_s8 = scalar_select %p2567_p6, 1, 0 }
  0x11   : > { %p2170_p9 = pneg %p2575_p8  ;;  %s231_s14 = sshll.u32 %s2466_s13, 4  ;;  %s232_s14 = int_to_ptr.vmem [resolvable:$true] %s231_s14 }
  0x12   : > { %3037 = sst [smem:[#allocation15_spill]] %s3036_s8  ;;  %p1951_p11 = scmp.ge.s32.totalorder %s2464_s26, 2 }
  0x13   : > { %p2171_p10 = pnand %p2170_p9, %p2552_p1  ;;  %s2467_s15 = smov 256  }
  0x14   : > { %s229_s11 = sshll.u32 %s3038_s3, 4  ;;  %s2468_s16 = smov 16   ;;  %s230_s11 = int_to_ptr.hbm [resolvable:$true] %s229_s11 }
  0x15   : > { %2173 = dma.hbm_to_vmem [thread:$0]  (!%p2171_p10), %s230_s11, 512, %s232_s14, [#allocation9], %s2467_s15, %s2467_s15, %s2468_s16  }
  0x16   : > { %s36_s17 = sadd.s32 1, %s2460_s25  ;;  %s45_s18 = sadd.s32 1, %s2452_s23 }
  0x17   : > { %p38_p12 = scmp.ge.s32.totalorder %s36_s17, 2  ;;  %p52_p13 = scmp.ne.s32.totalorder %s2452_s23, %s2448_s22 }
  0x18   : > { %p53_p0 = scmp.eq.s32.totalorder %s2464_s26, 0  ;;  %p2183_p7 = scmp.lt.s32.totalorder %s2464_s26, 2 }
  0x19   : > { %s3052_s17 = smov (%p38_p12, %s36_s17), 0  ;;  %p2597_p5 = por %p2556_p2, %p52_p13 }
  0x1a   : > { %3040 = sst [smem:[#allocation16_spill]] %s3052_s17  ;;  %p2591_p3 = por %p53_p0, %p52_p13 }
  0x1b   : > { %s40_s27 = ssub.s32 %s2460_s25, %s3052_s17  ;;  %s245_s28 = sand.u32 1, %s2452_s23  }
  0x1c   : > { %p43_p9 = scmp.eq.s32.totalorder %s40_s27, 0  ;;  %s1952_s9 = sshll.u32 %s245_s28, 5 }
  0x1d   : > { %s2124_s11 = sshll.u32 %s2460_s25, 5  ;;  %s249_s16 = scalar_lea.vmem [#allocation5], %s1952_s9 }
  0x1e   : > { %s2606_s10 = scalar_select %p43_p9, %s2452_s23, %s45_s18  }
  0x1f   : > { %s257_s15 = scalar_lea.hbm %s3020_s0, %s2124_s11  ;;  %s260_s3 = sshll.u32 %s249_s16, 4  ;;  %s261_s3 = int_to_ptr.vmem [resolvable:$true] %s260_s3 }
  0x20   : > { %s258_s30 = sshll.u32 %s257_s15, 4  ;;  %p2175_p2 = pnand %p2183_p7, %p2591_p3  ;;  %s259_s30 = int_to_ptr.hbm [resolvable:$true] %s258_s30 }
  0x21   : > { %s246_s8 = scalar_lea.sflag [#allocation6], %s245_s28  ;;  %s2469_s17 = smov 128  }
  0x22   : > { %s2470_s26 = smov 8   ;;  %272 = sbr.rel (%p2575_p8) target bundleno = 1568 (0x620), region = 36 }
  0x23   : > { %2177 = dma.hbm_to_vmem [thread:$0]  (!%p2175_p2), %s259_s30, 512, %s261_s3, %s246_s8, %s2469_s17, %s2469_s17, %s2470_s26  }
  0x24   : > { %s2617_s18 = sand.u32 (!%p2575_p8), 1, %s2448_s22  }
  0x25   : > { %s1956_s27 = sshll.u32 (!%p2575_p8), %s2617_s18, 5  ;;  %s275_s9 = scalar_lea.sflag (!%p2575_p8), [#allocation6], %s2617_s18 }
  0x26   : > { %s2623_s11 = scalar_lea.vmem (!%p2575_p8), [#allocation5], %s1956_s27 }
  0x27   : > { %2431 = dma.done.wait (%p2562_p4), %s275_s9, 512  }
  0x28   : > { %2433 = vsyncadd (%p2562_p4), %s275_s9, 4294966784 }
  0x29   : > { %2435 = dma.done.wait (%p2552_p1), [#allocation9], 512  }
  0x2a   : > { %2437 = vsyncadd (%p2552_p1), [#allocation9], 4294966784  ;;  %v2471_v0 = vmov 0.0   ;;  %v342_v1 = vld [vmem:[%s2623_s11] sm:$0xff]  ;;  %s2472_s3 = smov 113   ;;  %s2473_s26 = smov 111   ;;  %v357_v6 = vlaneseq }
  0x2b   : > { %336 = vst [vmem:[#allocation2] sm:$0xff] %v2471_v0  ;;  %s2474_s29 = smov 112   ;;  %s2475_s7 = smov 127   ;;  %v481_v9 = vld [vmem:[#allocation8 + $0x7] ss:$8 sm:$0x3] }
  0x2c   : > { %337 = vst [vmem:[#allocation2 + $0x8] sm:$0xff] %v2471_v0  ;;  %s2476_s8 = smov 15   ;;  %s2477_s12 = smov 1   ;;  %v2653_v8 = vand.u32 127, %v357_v6  ;;  %v483_v10 = vperm.slane %v481_v9, 0  ;;  %v484_v11 = vperm.slane %v481_v9, 1 }
  0x2d   : > { %344 = vst [vmem:[#allocation1] ss:$2 sm:$0xff] %v342_v1  ;;  %s2478_s17 = smov 17   ;;  %s2479_s19 = smov 16   ;;  %vm586_vm4 = vcmask 1043456   ;;  %vm582_vm9 = vcmask 588800  }
  0x2e   : > { %vm477_vm0 = vcmp.lt.s32.totalorder %v2653_v8, 112  ;;  %v427_v12 = vld [vmem:[#allocation8 + $0x4] ss:$8 sm:$0x3]  ;;  %vm459_vm1 = vcmp.lt.s32.totalorder %v2653_v8, 113  ;;  %vm495_vm2 = vcmp.lt.s32.totalorder %v2653_v8, 111 }
  0x2f   : > { %v429_v14 = vperm.slane %v427_v12, 0  ;;  %v430_v15 = vperm.slane %v427_v12, 1  ;;  %v463_v26 = vld [vmem:[#allocation8 + $0x6] ss:$8 sm:$0x3]  ;;  %vm441_vm3 = vcmp.lt.s32.totalorder %v2653_v8, 127 }
  0x30   : > { %v499_v27 = vld [vmem:[#allocation8 + $0x10] ss:$8 sm:$0x3]  ;;  %v465_v28 = vperm.slane %v463_v26, 0  ;;  %v466_v29 = vperm.slane %v463_v26, 1  ;;  %vm412_vm5 = vcmp.lt.s32.totalorder %v2653_v8, 1 }
  0x31   : > { %v501_v30 = vperm.slane %v499_v27, 0  ;;  %v502_v31 = vperm.slane %v499_v27, 1  ;;  %v445_v42 = vld [vmem:[#allocation8 + $0x5] ss:$8 sm:$0x3]  ;;  %vm394_vm6 = vcmp.lt.s32.totalorder %v2653_v8, 15 }
  0x32   : > { %v447_v46 = vperm.slane %v445_v42, 0  ;;  %v448_v47 = vperm.slane %v445_v42, 1  ;;  %v416_v56 = vld [vmem:[#allocation8 + $0x3] ss:$8 sm:$0x3]  ;;  %vm359_vm7 = vcmp.lt.s32.totalorder %v2653_v8, 17 }
  0x33   : > { %v398_v59 = vld [vmem:[#allocation8 + $0x2] ss:$8 sm:$0x3]  ;;  %v380_v42 = vld [vmem:[#allocation8 + $0x1] ss:$8 sm:$0x3] }
  0x34   : > { %v345_v2 = vld.sshfl [vmem:[#allocation1] sm:$0xff pattern:$0x75316420]  ;;  %v346_v3 = vld.sshfl [vmem:[#allocation1 + $0x8] sm:$0xff pattern:$0x75316420] }
  0x35   : > { %349 = vst [vmem:[#allocation2] sm:$0xf] %v345_v2  ;;  %v418_v2 = vperm.slane %v416_v56, 0  ;;  %v401_v9 = vperm.slane %v398_v59, 1  ;;  %v2695_v26 = vld [vmem:[%s3022_s2 + $0x8] sm:$0xff]  ;;  %vm376_vm8 = vcmp.lt.s32.totalorder %v2653_v8, 16 }
  0x36   : > { %350 = vst [vmem:[#allocation2 + $0x8] sm:$0xf] %v346_v3  ;;  %v419_v3 = vperm.slane %v416_v56, 1  ;;  %s2724_s9 = scalar_lea.vmem [#allocation10], %s1956_s27  ;;  %p323_p1 = scmp.lt.s32.totalorder %s2456_s24, 1  ;;  %vm339_vm10 = vcmask 3072  }
  0x37   : > { %642 = vst [vmem:[#allocation1 + $0x1] ss:$2 sm:$0xff] %v2471_v0  ;;  %s2161_s13 = sshll.u32 %s2456_s24, 5  ;;  %s2398_s15 = scalar_lea.hbm %s3024_s4, 64 }
  0x3c   : > { %v351_v4 = vld [vmem:[#allocation2] sm:$0xff] }
  0x3d   : > { %455 = vrot.lane.b32.xlu1 %v351_v4, %s2472_s3  ;;  %491 = vrot.lane.b32.xlu0 %v351_v4, %s2473_s26  ;;  %v352_v5 = vld [vmem:[#allocation2 + $0x8] sm:$0xff]  ;;  %v433_v20 = vmul.f32 %v429_v14, %v351_v4 }
  0x3e   : > { %473 = vrot.lane.b32.xlu2 %v351_v4, %s2474_s29  ;;  %v434_v21 = vmul.f32 %v430_v15, %v352_v5 }
  0x40   : > { %v435_v23 = vpack.c.bf16 %v434_v21, %v433_v20 }
  0x42   : > { %436 = vst [vmem:[#allocation4 + $0x20] sm:$0xff] %v435_v23 }
  0x45   : > { %457 = vrot.lane.b32.xlu1 %v352_v5, %s2472_s3  ;;  %493 = vrot.lane.b32.xlu0 %v352_v5, %s2473_s26 }
  0x46   : > { %475 = vrot.lane.b32.xlu2 %v352_v5, %s2474_s29 }
  0x49   : > { %v2130_v23 = vld [vmem:[#allocation4 + $0x24] sm:$0xf] }
  0x4d   : > { %439 = vrot.lane.b32.xlu1 %v352_v5, %s2475_s7  ;;  %437 = vrot.lane.b32.xlu0 %v351_v4, %s2475_s7 }
  0x4e   : > { %390 = vrot.lane.b32.xlu2 %v351_v4, %s2476_s8 }
  0x55   : > { %408 = vrot.lane.b32.xlu1 %v351_v4, %s2477_s12  ;;  %392 = vrot.lane.b32.xlu0 %v352_v5, %s2476_s8 }
  0x56   : > { %410 = vrot.lane.b32.xlu2 %v352_v5, %s2477_s12 }
  0x5d   : > { %355 = vrot.lane.b32.xlu1 %v352_v5, %s2478_s17  ;;  %353 = vrot.lane.b32.xlu0 %v351_v4, %s2478_s17 }
  0x5e   : > { %372 = vrot.lane.b32.xlu2 %v351_v4, %s2479_s19 }
  0x65   : > { %374 = vrot.lane.b32.xlu0 %v352_v5, %s2479_s19 }
  0x98   : > { %v474_v7 = vpop.permute.xlu2 %473 }
  0xa0   : > { %v476_v13 = vpop.permute.xlu2 %475 }
  0xa1   : > { %v478_v16 = vsel %vm477_vm0, %v474_v7, %v476_v13  ;;  %v479_v17 = vsel %vm477_vm0, %v476_v13, %v474_v7  ;;  %v400_v7 = vperm.slane %v398_v59, 0 }
  0xa2   : > { %v487_v18 = vmul.f32 %v483_v10, %v478_v16  ;;  %v488_v19 = vmul.f32 %v484_v11, %v479_v17 }
  0xa4   : > { %v489_v22 = vpack.c.bf16 %v488_v19, %v487_v18 }
  0xa6   : > { %490 = vst [vmem:[#allocation4 + $0x38] sm:$0xff] %v489_v22  ;;  %v1983_v22 = vld [vmem:[#allocation4 + $0x20] sm:$0xf] }
  0xa8   : > { %v391_v45 = vpop.permute.xlu2 %390 }
  0xad   : > { %v2133_v62 = vld [vmem:[#allocation4 + $0x34] sm:$0xf0]  ;;  %v1993_v63 = vld [vmem:[#allocation4 + $0x38] sm:$0xf0] }
  0xaf   : > { %v456_v24 = vpop.permute.xlu1 %455  ;;  %v492_v25 = vpop.permute.xlu0 %491 }
  0xb0   : > { %v411_v6 = vpop.permute.xlu2 %410 }
  0xb7   : > { %v458_v32 = vpop.permute.xlu1 %457  ;;  %v494_v33 = vpop.permute.xlu0 %493 }
  0xb8   : > { %v460_v34 = vsel %vm459_vm1, %v456_v24, %v458_v32  ;;  %v461_v35 = vsel %vm459_vm1, %v458_v32, %v456_v24  ;;  %v496_v36 = vsel %vm495_vm2, %v492_v25, %v494_v33  ;;  %v497_v37 = vsel %vm495_vm2, %v494_v33, %v492_v25  ;;  %v362_v24 = vld [vmem:[#allocation8] ss:$8 sm:$0x3] }
  0xb9   : > { %v469_v38 = vmul.f32 %v465_v28, %v460_v34  ;;  %v470_v39 = vmul.f32 %v466_v29, %v461_v35  ;;  %v505_v40 = vmul.f32 %v501_v30, %v496_v36  ;;  %v506_v41 = vmul.f32 %v502_v31, %v497_v37  ;;  %v2690_v25 = vld [vmem:[%s3022_s2] sm:$0xff] }
  0xba   : > { %v2480_v29 = vmov 0   ;;  %v364_v32 = vperm.slane %v362_v24, 0  ;;  %v365_v33 = vperm.slane %v362_v24, 1 }
  0xbb   : > { %v471_v43 = vpack.c.bf16 %v470_v39, %v469_v38  ;;  %v507_v44 = vpack.c.bf16 %v506_v41, %v505_v40  ;;  %2251 = vset.pattern.permute.xlu1 %v2480_v29  ;;  %2252 = vset.pattern.permute.xlu2 %v2480_v29 }
  0xbc   : > { %524 = vperm.xlu1 %2251, %v2690_v25   ;;  %529 = vperm.xlu2 %2252, %v2695_v26  }
  0xbd   : > { %472 = vst [vmem:[#allocation4 + $0x30] sm:$0xff] %v471_v43  ;;  %v562_v48 = vunpack.c.l.b16 %v507_v44  ;;  %v563_v49 = vunpack.c.h.b16 %v507_v44  ;;  %2253 = vset.pattern.permute.xlu0 %v2480_v29  ;;  %v382_v44 = vperm.slane %v380_v42, 0  ;;  %v643_v29 = vld.sshfl [vmem:[#allocation1] sm:$0xff pattern:$0x75316420] }
  0xbf   : > { %v440_v50 = vpop.permute.xlu1 %439  ;;  %v438_v51 = vpop.permute.xlu0 %437  ;;  %v572_v52 = vpack.c.b16 %v562_v48, %v562_v48  ;;  %v573_v53 = vpack.c.b16 %v563_v49, %v563_v49  ;;  %v383_v48 = vperm.slane %v380_v42, 1 }
  0xc0   : > { %v442_v54 = vsel %vm441_vm3, %v438_v51, %v440_v50  ;;  %v443_v55 = vsel %vm441_vm3, %v440_v50, %v438_v51 }
  0xc1   : > { %v451_v57 = vmul.f32 %v447_v46, %v442_v54  ;;  %v452_v58 = vmul.f32 %v448_v47, %v443_v55  ;;  %v588_v60 = vsel %vm586_vm4, %v572_v52, 0  ;;  %v591_v61 = vsel %vm586_vm4, %v573_v53, 0  ;;  %v373_v47 = vpop.permute.xlu2 %372 }
  0xc2   : > { %596 = vmatpush.bf16.msra.mxu0 %v588_v60  ;;  %610 = vmatpush.bf16.msra.mxu1 %v591_v61 }
  0xc3   : > { %v453_v1 = vpack.c.bf16 %v452_v58, %v451_v57 }
  0xc4   : > { %v1991_v4 = vld [vmem:[#allocation4 + $0x30] sm:$0xf]  ;;  %v2132_v5 = vld [vmem:[#allocation4 + $0x34] sm:$0xf] }
  0xc5   : > { %454 = vst [vmem:[#allocation4 + $0x28] sm:$0xff] %v453_v1  ;;  %v1992_v10 = vor.u32 %v2133_v62, %v1991_v4  ;;  %v1996_v11 = vor.u32 %v2132_v5, %v1993_v63 }
  0xc7   : > { %v409_v12 = vpop.permute.xlu1 %408  ;;  %v393_v13 = vpop.permute.xlu0 %392  ;;  %597 = vmatpush.bf16.msra.mxu0 %v1992_v10  ;;  %611 = vmatpush.bf16.msra.mxu1 %v1996_v11 }
  0xc8   : > { %v413_v14 = vsel %vm412_vm5, %v409_v12, %v411_v6  ;;  %v414_v15 = vsel %vm412_vm5, %v411_v6, %v409_v12  ;;  %v395_v16 = vsel %vm394_vm6, %v391_v45, %v393_v13  ;;  %v396_v17 = vsel %vm394_vm6, %v393_v13, %v391_v45 }
  0xc9   : > { %v422_v18 = vmul.f32 %v418_v2, %v414_v15  ;;  %v423_v19 = vmul.f32 %v419_v3, %v413_v14  ;;  %v404_v20 = vmul.f32 %v400_v7, %v396_v17  ;;  %v405_v21 = vmul.f32 %v401_v9, %v395_v16  ;;  %v2125_v2 = vld [vmem:[%s3021_s1] sm:$0xff] }
  0xcb   : > { %v424_v27 = vpack.c.bf16 %v423_v19, %v422_v18  ;;  %v406_v28 = vpack.c.bf16 %v405_v21, %v404_v20 }
  0xcc   : > { %v2131_v30 = vld [vmem:[#allocation4 + $0x24] sm:$0xf0]  ;;  %v1985_v31 = vld [vmem:[#allocation4 + $0x28] sm:$0xf0] }
  0xcd   : > { %425 = vst [vmem:[#allocation4 + $0x18] sm:$0xff] %v424_v27  ;;  %v1984_v34 = vor.u32 %v2131_v30, %v1983_v22  ;;  %v1988_v35 = vor.u32 %v2130_v23, %v1985_v31  ;;  %v644_v31 = vld.sshfl [vmem:[#allocation1 + $0x8] sm:$0xff pattern:$0x75316420] }
  0xce   : > { %407 = vst [vmem:[#allocation4 + $0x10] sm:$0xff] %v406_v28 }
  0xcf   : > { %v356_v36 = vpop.permute.xlu1 %355  ;;  %v354_v37 = vpop.permute.xlu0 %353  ;;  %598 = vmatpush.bf16.msra.mxu0 %v1984_v34  ;;  %612 = vmatpush.bf16.msra.mxu1 %v1988_v35 }
  0xd0   : > { %v360_v38 = vsel %vm359_vm7, %v354_v37, %v356_v36  ;;  %v361_v39 = vsel %vm359_vm7, %v356_v36, %v354_v37 }
  0xd1   : > { %v368_v40 = vmul.f32 %v364_v32, %v361_v39  ;;  %v369_v41 = vmul.f32 %v365_v33, %v360_v38 }
  0xd3   : > { %v370_v43 = vpack.c.bf16 %v369_v41, %v368_v40  ;;  %v1999_v40 = vld [vmem:[%s2623_s11 + $0x8] sm:$0xff] }
  0xd4   : > { %v2129_v45 = vld [vmem:[#allocation4 + $0x14] sm:$0xf0]  ;;  %v1977_v46 = vld [vmem:[#allocation4 + $0x18] sm:$0xf0] }
  0xd5   : > { %371 = vst [vmem:[#allocation4] sm:$0xff] %v370_v43  ;;  %v1975_v49 = vld [vmem:[#allocation4 + $0x10] sm:$0xf]  ;;  %v2128_v50 = vld [vmem:[#allocation4 + $0x14] sm:$0xf] }
  0xd6   : > { %v1976_v51 = vor.u32 %v2129_v45, %v1975_v49  ;;  %v1980_v52 = vor.u32 %v2128_v50, %v1977_v46 }
  0xd7   : > { %v375_v53 = vpop.permute.xlu0 %374 }
  0xd8   : > { %v377_v54 = vsel %vm376_vm8, %v373_v47, %v375_v53  ;;  %v378_v55 = vsel %vm376_vm8, %v375_v53, %v373_v47  ;;  %599 = vmatpush.bf16.msra.mxu0 %v1976_v51  ;;  %613 = vmatpush.bf16.msra.mxu1 %v1980_v52 }
  0xd9   : > { %v386_v56 = vmul.f32 %v382_v44, %v378_v55  ;;  %v387_v57 = vmul.f32 %v383_v48, %v377_v54 }
  0xdb   : > { %v388_v58 = vpack.c.bf16 %v387_v57, %v386_v56 }
  0xdc   : > { %v1967_v59 = vld [vmem:[#allocation4] sm:$0xf]  ;;  %v2126_v61 = vld [vmem:[#allocation4 + $0x4] sm:$0xf] }
  0xdd   : > { %389 = vst [vmem:[#allocation4 + $0x8] sm:$0xff] %v388_v58 }
  0xe4   : > { %v2127_v60 = vld [vmem:[#allocation4 + $0x4] sm:$0xf0]  ;;  %v1969_v62 = vld [vmem:[#allocation4 + $0x8] sm:$0xf0] }
  0xe5   : > { %v1968_v63 = vor.u32 %v2127_v60, %v1967_v59  ;;  %v1972_v1 = vor.u32 %v2126_v61, %v1969_v62 }
  0xe7   : > { %600 = vmatpush.bf16.msra.mxu0 %v1968_v63  ;;  %614 = vmatpush.bf16.msra.mxu1 %v1972_v1 }
  0xea   : > { %1997 = vmatmul.msk.bf16.vlgmr.msra.gmra.mxu0 %vm582_vm9, %v2125_v2  ;;  %1998 = vmatmul.msk.bf16.vlgmr.msra.gmra.mxu1 %vm582_vm9, %v2125_v2  ;;  %v789_v2 = vld [vmem:[#allocation8 + $0x4] ss:$8 sm:$0x3] }
 0x116   : > { %v530_v11 = vpop.permute.xlu2 %529 }
 0x12e   : > { %v525_v3 = vpop.permute.xlu1 %524 }
 0x167   : > { %v602_v4 = vpop.f32.mrf.mxu0  ;;  %v616_v5 = vpop.f32.mrf.mxu1 }
 0x168   : > { %v603_v6 = vadd.f32 %v602_v4, %v525_v3  ;;  %v617_v7 = vadd.f32 %v616_v5, %v525_v3  ;;  %v791_v5 = vperm.slane %v789_v2, 0 }
 0x16a   : > { %v621_v9 = vmul.f32 0.5, %v603_v6  ;;  %v622_v10 = vmul.f32 0.5, %v617_v7  ;;  %v792_v6 = vperm.slane %v789_v2, 1 }
 0x16c   : > { %2254 = vtanh.f32 %v621_v9 }
 0x16d   : > { %2256 = vtanh.f32 %v622_v10 }
 0x16f   : > { %v604_v12 = vpop.f32.mrf.mxu0  ;;  %v618_v13 = vpop.f32.mrf.mxu1 }
 0x170   : > { %v605_v14 = vadd.f32 %v604_v12, %v530_v11  ;;  %v619_v15 = vadd.f32 %v618_v13, %v530_v11 }
 0x172   : > { %v2255_v16 = vpop.eup %2254  ;;  %2258 = vtanh.f32 %v605_v14  ;;  %v629_v20 = vmul.f32 0.5, %v605_v14  ;;  %v630_v23 = vmul.f32 0.5, %v619_v15  ;;  %v853_v14 = vld [vmem:[#allocation8 + $0x10] ss:$8 sm:$0x3] }
 0x173   : > { %v2257_v17 = vpop.eup %2256  ;;  %2260 = vtanh.f32 %v619_v15  ;;  %v625_v19 = vmul.f32 0.5, %v2255_v16  ;;  %v855_v15 = vperm.slane %v853_v14, 0  ;;  %v856_v16 = vperm.slane %v853_v14, 1 }
 0x174   : > { %v626_v18 = vmul.f32 0.5, %v2257_v17  ;;  %2262 = vtanh.f32 %v629_v20 }
 0x175   : > { %v627_v27 = vadd.f32 0.5, %v625_v19  ;;  %2264 = vtanh.f32 %v630_v23  ;;  %v821_v23 = vld [vmem:[#allocation8 + $0x6] ss:$8 sm:$0x3] }
 0x176   : > { %v628_v22 = vadd.f32 0.5, %v626_v18 }
 0x177   : > { %v647_v34 = vmul.f32 %v643_v29, %v627_v27  ;;  %v823_v29 = vperm.slane %v821_v23, 0 }
 0x178   : > { %v2259_v21 = vpop.eup %2258  ;;  %v648_v36 = vmul.f32 %v644_v31, %v628_v22 }
 0x179   : > { %v2261_v24 = vpop.eup %2260  ;;  %v651_v28 = vrot.slane %v2259_v21, 4 }
 0x17a   : > { %v652_v30 = vrot.slane %v2261_v24, 4  ;;  %v2263_v41 = vpop.eup %2262  ;;  %v837_v24 = vld [vmem:[#allocation8 + $0x7] ss:$8 sm:$0x3] }
 0x17b   : > { %v655_v32 = vmul.f32 %v651_v28, %v627_v27  ;;  %v2265_v42 = vpop.eup %2264  ;;  %v633_v43 = vmul.f32 0.5, %v2263_v41  ;;  %v839_v31 = vperm.slane %v837_v24, 0 }
 0x17c   : > { %v656_v33 = vmul.f32 %v652_v30, %v628_v22  ;;  %v634_v44 = vmul.f32 0.5, %v2265_v42  ;;  %v824_v30 = vperm.slane %v821_v23, 1 }
 0x17d   : > { %v659_v35 = vrot.slane %v655_v32, 4  ;;  %v635_v47 = vadd.f32 0.5, %v633_v43  ;;  %v840_v32 = vperm.slane %v837_v24, 1 }
 0x17e   : > { %v660_v37 = vrot.slane %v656_v33, 4  ;;  %v636_v49 = vadd.f32 0.5, %v634_v44 }
 0x17f   : > { %v663_v38 = vadd.f32 %v659_v35, %v647_v34 }
 0x180   : > { %v664_v39 = vadd.f32 %v660_v37, %v648_v36 }
 0x181   : > { %2266 = vtanh.f32 %v663_v38  ;;  %677 = vst.sshfl [vmem:[#allocation1] sm:$0xff pattern:$0x75316420] %v663_v38 }
 0x182   : > { %2268 = vtanh.f32 %v664_v39  ;;  %678 = vst.sshfl [vmem:[#allocation1 + $0x8] sm:$0xff pattern:$0x75316420] %v664_v39 }
 0x183   : > { %716 = vst [vmem:[#allocation1] ss:$2 sm:$0xff] %v1999_v40 }
 0x187   : > { %v2267_v45 = vpop.eup %2266 }
 0x188   : > { %v2269_v46 = vpop.eup %2268  ;;  %v669_v48 = vrot.slane %v2267_v45, 4 }
 0x189   : > { %v670_v50 = vrot.slane %v2269_v46, 4  ;;  %v680_v51 = vld [vmem:[#allocation1 + $0x1] ss:$2 sm:$0xff] }
 0x18a   : > { %v673_v52 = vmul.f32 %v669_v48, %v635_v47  ;;  %v717_v53 = vld.sshfl [vmem:[#allocation1] sm:$0xff pattern:$0x75316420]  ;;  %v718_v54 = vld.sshfl [vmem:[#allocation1 + $0x8] sm:$0xff pattern:$0x75316420] }
 0x18b   : > { %v674_v55 = vmul.f32 %v670_v50, %v636_v49  ;;  %721 = vst [vmem:[#allocation2] sm:$0xf] %v717_v53  ;;  %v805_v50 = vld [vmem:[#allocation8 + $0x5] ss:$8 sm:$0x3] }
 0x18c   : > { %v685_v56 = vrot.slane %v673_v52, 4  ;;  %722 = vst [vmem:[#allocation2 + $0x8] sm:$0xf] %v718_v54  ;;  %v695_v57 = vsel %vm586_vm4, %v673_v52, 0.0  ;;  %v704_v58 = vmul.f32 %v673_v52, %v673_v52  ;;  %v807_v53 = vperm.slane %v805_v50, 0 }
 0x18d   : > { %v686_v59 = vrot.slane %v674_v55, 4  ;;  %994 = vst [vmem:[#allocation1 + $0x1] ss:$2 sm:$0xff] %v680_v51  ;;  %v696_v60 = vsel %vm586_vm4, %v674_v55, 0.0  ;;  %v705_v61 = vmul.f32 %v674_v55, %v674_v55  ;;  %v808_v54 = vperm.slane %v805_v50, 1 }
 0x18e   : > { %689 = vst [vmem:[#allocation2] sm:$0xf0] %v685_v56  ;;  %v2717_v62 = vadd.f32 %v696_v60, %v695_v57  ;;  %v706_v63 = vsel %vm586_vm4, %v704_v58, 0.0 }
 0x18f   : > { %690 = vst [vmem:[#allocation2 + $0x8] sm:$0xf0] %v686_v59  ;;  %v691_v1 = vsel %vm586_vm4, %v673_v52, %v686_v59  ;;  %v707_v3 = vsel %vm586_vm4, %v705_v61, 0.0  ;;  %v763_v61 = vld [vmem:[#allocation8 + $0x2] ss:$8 sm:$0x3] }
 0x190   : > { %693 = vst [vmem:[%s2724_s9] sm:$0xff] %v691_v1  ;;  %v2727_v4 = vadd.f32 %v707_v3, %v706_v63  ;;  %v779_v63 = vld [vmem:[#allocation8 + $0x3] ss:$8 sm:$0x3] }
 0x195   : > { %v723_v7 = vld [vmem:[#allocation2] sm:$0xff] }
 0x196   : > { %815 = vrot.lane.b32.xlu2 %v723_v7, %s2472_s3  ;;  %847 = vrot.lane.b32.xlu0 %v723_v7, %s2473_s26  ;;  %v724_v9 = vld [vmem:[#allocation2 + $0x8] sm:$0xff]  ;;  %v795_v10 = vmul.f32 %v791_v5, %v723_v7  ;;  %v765_v5 = vperm.slane %v763_v61, 0 }
 0x197   : > { %849 = vrot.lane.b32.xlu1 %v724_v9, %s2473_s26  ;;  %v796_v11 = vmul.f32 %v792_v6, %v724_v9  ;;  %v766_v6 = vperm.slane %v763_v61, 1 }
 0x199   : > { %v797_v12 = vpack.c.bf16 %v796_v11, %v795_v10 }
 0x19b   : > { %798 = vst [vmem:[#allocation4 + $0x20] sm:$0xff] %v797_v12  ;;  %v781_v12 = vperm.slane %v779_v63, 0 }
 0x19e   : > { %833 = vrot.lane.b32.xlu2 %v724_v9, %s2474_s29  ;;  %817 = vrot.lane.b32.xlu0 %v724_v9, %s2472_s3 }
 0x19f   : > { %831 = vrot.lane.b32.xlu1 %v723_v7, %s2474_s29 }
 0x1a6   : > { %757 = vrot.lane.b32.xlu2 %v723_v7, %s2476_s8  ;;  %799 = vrot.lane.b32.xlu0 %v723_v7, %s2475_s7 }
 0x1a7   : > { %801 = vrot.lane.b32.xlu1 %v724_v9, %s2475_s7 }
 0x1ae   : > { %775 = vrot.lane.b32.xlu2 %v724_v9, %s2477_s12  ;;  %759 = vrot.lane.b32.xlu0 %v724_v9, %s2476_s8 }
 0x1af   : > { %773 = vrot.lane.b32.xlu1 %v723_v7, %s2477_s12 }
 0x1b6   : > { %741 = vrot.lane.b32.xlu2 %v723_v7, %s2479_s19  ;;  %725 = vrot.lane.b32.xlu0 %v723_v7, %s2478_s17 }
 0x1b7   : > { %727 = vrot.lane.b32.xlu1 %v724_v9, %s2478_s17 }
 0x1be   : > { %883 = vperm.xlu2 %2252, %v2695_v26   ;;  %743 = vrot.lane.b32.xlu0 %v724_v9, %s2479_s19 }
 0x1bf   : > { %878 = vperm.xlu1 %2251, %v2690_v25  }
 0x1f0   : > { %v816_v13 = vpop.permute.xlu2 %815 }
 0x1f8   : > { %v834_v27 = vpop.permute.xlu2 %833 }
 0x200   : > { %v758_v52 = vpop.permute.xlu2 %757 }
 0x208   : > { %v848_v17 = vpop.permute.xlu0 %847 }
 0x209   : > { %v850_v18 = vpop.permute.xlu1 %849 }
 0x20a   : > { %v851_v19 = vsel %vm495_vm2, %v848_v17, %v850_v18  ;;  %v852_v20 = vsel %vm495_vm2, %v850_v18, %v848_v17 }
 0x20b   : > { %v859_v21 = vmul.f32 %v855_v15, %v851_v19  ;;  %v860_v22 = vmul.f32 %v856_v16, %v852_v20  ;;  %v776_v15 = vpop.permute.xlu2 %775 }
 0x20d   : > { %v861_v28 = vpack.c.bf16 %v860_v22, %v859_v21 }
 0x20f   : > { %v916_v33 = vunpack.c.l.b16 %v861_v28  ;;  %v917_v34 = vunpack.c.h.b16 %v861_v28  ;;  %v731_v28 = vld [vmem:[#allocation8] ss:$8 sm:$0x3] }
 0x210   : > { %v818_v35 = vpop.permute.xlu0 %817 }
 0x211   : > { %v819_v36 = vsel %vm459_vm1, %v816_v13, %v818_v35  ;;  %v820_v37 = vsel %vm459_vm1, %v818_v35, %v816_v13  ;;  %v832_v38 = vpop.permute.xlu1 %831  ;;  %v926_v39 = vpack.c.b16 %v916_v33, %v916_v33  ;;  %v927_v40 = vpack.c.b16 %v917_v34, %v917_v34 }
 0x212   : > { %v827_v41 = vmul.f32 %v823_v29, %v819_v36  ;;  %v828_v42 = vmul.f32 %v824_v30, %v820_v37  ;;  %v835_v43 = vsel %vm477_vm0, %v832_v38, %v834_v27  ;;  %v836_v44 = vsel %vm477_vm0, %v834_v27, %v832_v38  ;;  %v2022_v30 = vld [vmem:[#allocation4 + $0x20] sm:$0xf] }
 0x213   : > { %v843_v45 = vmul.f32 %v839_v31, %v835_v43  ;;  %v844_v46 = vmul.f32 %v840_v32, %v836_v44  ;;  %v940_v47 = vsel %vm586_vm4, %v926_v39, 0  ;;  %v943_v48 = vsel %vm586_vm4, %v927_v40, 0  ;;  %v2139_v31 = vld [vmem:[#allocation4 + $0x24] sm:$0xf] }
 0x214   : > { %v829_v49 = vpack.c.bf16 %v828_v42, %v827_v41  ;;  %948 = vmatpush.bf16.msra.mxu2 %v940_v47  ;;  %962 = vmatpush.bf16.msra.mxu3 %v943_v48  ;;  %v782_v13 = vperm.slane %v779_v63, 1  ;;  %v733_v34 = vperm.slane %v731_v28, 0  ;;  %v734_v35 = vperm.slane %v731_v28, 1  ;;  %v747_v44 = vld [vmem:[#allocation8 + $0x1] ss:$8 sm:$0x3] }
 0x215   : > { %v845_v51 = vpack.c.bf16 %v844_v46, %v843_v45  ;;  %v749_v48 = vperm.slane %v747_v44, 0 }
 0x216   : > { %830 = vst [vmem:[#allocation4 + $0x30] sm:$0xff] %v829_v49  ;;  %v750_v49 = vperm.slane %v747_v44, 1  ;;  %v2039_v44 = vld [vmem:[%s2623_s11 + $0x10] sm:$0xff] }
 0x217   : > { %846 = vst [vmem:[#allocation4 + $0x38] sm:$0xff] %v845_v51 }
 0x218   : > { %v800_v55 = vpop.permute.xlu0 %799 }
 0x219   : > { %v802_v56 = vpop.permute.xlu1 %801 }
 0x21a   : > { %v803_v57 = vsel %vm441_vm3, %v800_v55, %v802_v56  ;;  %v804_v58 = vsel %vm441_vm3, %v802_v56, %v800_v55 }
 0x21b   : > { %v811_v59 = vmul.f32 %v807_v53, %v803_v57  ;;  %v812_v60 = vmul.f32 %v808_v54, %v804_v58  ;;  %v742_v54 = vpop.permute.xlu2 %741 }
 0x21d   : > { %v813_v1 = vpack.c.bf16 %v812_v60, %v811_v59  ;;  %v2030_v2 = vld [vmem:[#allocation4 + $0x30] sm:$0xf]  ;;  %v2141_v3 = vld [vmem:[#allocation4 + $0x34] sm:$0xf] }
 0x21e   : > { %v2142_v7 = vld [vmem:[#allocation4 + $0x34] sm:$0xf0]  ;;  %v2032_v9 = vld [vmem:[#allocation4 + $0x38] sm:$0xf0] }
 0x21f   : > { %814 = vst [vmem:[#allocation4 + $0x28] sm:$0xff] %v813_v1  ;;  %v2031_v10 = vor.u32 %v2142_v7, %v2030_v2  ;;  %v2035_v11 = vor.u32 %v2141_v3, %v2032_v9 }
 0x220   : > { %v760_v14 = vpop.permute.xlu0 %759 }
 0x221   : > { %v761_v16 = vsel %vm394_vm6, %v758_v52, %v760_v14  ;;  %v762_v17 = vsel %vm394_vm6, %v760_v14, %v758_v52  ;;  %949 = vmatpush.bf16.msra.mxu2 %v2031_v10  ;;  %963 = vmatpush.bf16.msra.mxu3 %v2035_v11  ;;  %v774_v18 = vpop.permute.xlu1 %773 }
 0x222   : > { %v769_v19 = vmul.f32 %v765_v5, %v762_v17  ;;  %v770_v20 = vmul.f32 %v766_v6, %v761_v16  ;;  %v777_v21 = vsel %vm412_vm5, %v774_v18, %v776_v15  ;;  %v778_v22 = vsel %vm412_vm5, %v776_v15, %v774_v18  ;;  %v2134_v6 = vld [vmem:[%s3021_s1] sm:$0xff] }
 0x223   : > { %v785_v23 = vmul.f32 %v781_v12, %v778_v22  ;;  %v786_v24 = vmul.f32 %v782_v13, %v777_v21  ;;  %v884_v15 = vpop.permute.xlu2 %883 }
 0x224   : > { %v771_v27 = vpack.c.bf16 %v770_v20, %v769_v19 }
 0x225   : > { %v787_v29 = vpack.c.bf16 %v786_v24, %v785_v23 }
 0x226   : > { %772 = vst [vmem:[#allocation4 + $0x10] sm:$0xff] %v771_v27  ;;  %v2140_v32 = vld [vmem:[#allocation4 + $0x24] sm:$0xf0]  ;;  %v2024_v33 = vld [vmem:[#allocation4 + $0x28] sm:$0xf0] }
 0x227   : > { %788 = vst [vmem:[#allocation4 + $0x18] sm:$0xff] %v787_v29  ;;  %v2023_v36 = vor.u32 %v2140_v32, %v2022_v30  ;;  %v2027_v37 = vor.u32 %v2139_v31, %v2024_v33 }
 0x228   : > { %v726_v38 = vpop.permute.xlu0 %725 }
 0x229   : > { %v728_v39 = vpop.permute.xlu1 %727  ;;  %950 = vmatpush.bf16.msra.mxu2 %v2023_v36  ;;  %964 = vmatpush.bf16.msra.mxu3 %v2027_v37 }
 0x22a   : > { %v729_v40 = vsel %vm359_vm7, %v726_v38, %v728_v39  ;;  %v730_v41 = vsel %vm359_vm7, %v728_v39, %v726_v38  ;;  %v996_v38 = vld.sshfl [vmem:[#allocation1 + $0x8] sm:$0xff pattern:$0x75316420] }
 0x22b   : > { %v737_v42 = vmul.f32 %v733_v34, %v730_v41  ;;  %v738_v43 = vmul.f32 %v734_v35, %v729_v40  ;;  %v995_v35 = vld.sshfl [vmem:[#allocation1] sm:$0xff pattern:$0x75316420] }
 0x22d   : > { %v739_v45 = vpack.c.bf16 %v738_v43, %v737_v42  ;;  %v2014_v46 = vld [vmem:[#allocation4 + $0x10] sm:$0xf]  ;;  %v2137_v47 = vld [vmem:[#allocation4 + $0x14] sm:$0xf] }
 0x22e   : > { %v2138_v50 = vld [vmem:[#allocation4 + $0x14] sm:$0xf0]  ;;  %v2016_v51 = vld [vmem:[#allocation4 + $0x18] sm:$0xf0] }
 0x22f   : > { %740 = vst [vmem:[#allocation4] sm:$0xff] %v739_v45  ;;  %v2015_v52 = vor.u32 %v2138_v50, %v2014_v46  ;;  %v2019_v53 = vor.u32 %v2137_v47, %v2016_v51 }
 0x230   : > { %v744_v55 = vpop.permute.xlu0 %743 }
 0x231   : > { %v745_v56 = vsel %vm376_vm8, %v742_v54, %v744_v55  ;;  %v746_v57 = vsel %vm376_vm8, %v744_v55, %v742_v54  ;;  %951 = vmatpush.bf16.msra.mxu2 %v2015_v52  ;;  %965 = vmatpush.bf16.msra.mxu3 %v2019_v53  ;;  %v879_v7 = vpop.permute.xlu1 %878 }
 0x232   : > { %v753_v58 = vmul.f32 %v749_v48, %v746_v57  ;;  %v754_v59 = vmul.f32 %v750_v49, %v745_v56 }
 0x234   : > { %v755_v60 = vpack.c.bf16 %v754_v59, %v753_v58 }
 0x236   : > { %756 = vst [vmem:[#allocation4 + $0x8] sm:$0xff] %v755_v60  ;;  %v2006_v61 = vld [vmem:[#allocation4] sm:$0xf]  ;;  %v2135_v1 = vld [vmem:[#allocation4 + $0x4] sm:$0xf] }
 0x23d   : > { %v2136_v63 = vld [vmem:[#allocation4 + $0x4] sm:$0xf0]  ;;  %v2008_v2 = vld [vmem:[#allocation4 + $0x8] sm:$0xf0] }
 0x23e   : > { %v2007_v3 = vor.u32 %v2136_v63, %v2006_v61  ;;  %v2011_v5 = vor.u32 %v2135_v1, %v2008_v2 }
 0x240   : > { %952 = vmatpush.bf16.msra.mxu2 %v2007_v3  ;;  %966 = vmatpush.bf16.msra.mxu3 %v2011_v5 }
 0x243   : > { %2036 = vmatmul.msk.bf16.vlgmr.msra.gmra.mxu2 %vm582_vm9, %v2134_v6  ;;  %2037 = vmatmul.msk.bf16.vlgmr.msra.gmra.mxu3 %vm582_vm9, %v2134_v6 }
 0x2c6   : > { %v954_v9 = vpop.f32.mrf.mxu2  ;;  %v968_v10 = vpop.f32.mrf.mxu3 }
 0x2c7   : > { %v955_v11 = vadd.f32 %v954_v9, %v879_v7  ;;  %v969_v12 = vadd.f32 %v968_v10, %v879_v7  ;;  %v1141_v9 = vld [vmem:[#allocation8 + $0x4] ss:$8 sm:$0x3] }
 0x2c9   : > { %v973_v13 = vmul.f32 0.5, %v955_v11  ;;  %v974_v14 = vmul.f32 0.5, %v969_v12  ;;  %v1143_v12 = vperm.slane %v1141_v9, 0 }
 0x2cb   : > { %2270 = vtanh.f32 %v973_v13  ;;  %v1144_v13 = vperm.slane %v1141_v9, 1 }
 0x2cc   : > { %2272 = vtanh.f32 %v974_v14 }
 0x2ce   : > { %v956_v16 = vpop.f32.mrf.mxu2  ;;  %v970_v17 = vpop.f32.mrf.mxu3 }
 0x2cf   : > { %v957_v18 = vadd.f32 %v956_v16, %v884_v15  ;;  %v971_v19 = vadd.f32 %v970_v17, %v884_v15 }
 0x2d1   : > { %v2271_v20 = vpop.eup %2270  ;;  %2274 = vtanh.f32 %v957_v18  ;;  %v981_v24 = vmul.f32 0.5, %v957_v18  ;;  %v982_v28 = vmul.f32 0.5, %v971_v19 }
 0x2d2   : > { %v2273_v21 = vpop.eup %2272  ;;  %2276 = vtanh.f32 %v971_v19  ;;  %v977_v22 = vmul.f32 0.5, %v2271_v20  ;;  %v1205_v20 = vld [vmem:[#allocation8 + $0x10] ss:$8 sm:$0x3] }
 0x2d3   : > { %v978_v23 = vmul.f32 0.5, %v2273_v21  ;;  %2278 = vtanh.f32 %v981_v24  ;;  %v1207_v21 = vperm.slane %v1205_v20, 0 }
 0x2d4   : > { %v979_v30 = vadd.f32 0.5, %v977_v22  ;;  %2280 = vtanh.f32 %v982_v28  ;;  %v1208_v22 = vperm.slane %v1205_v20, 1 }
 0x2d5   : > { %v980_v32 = vadd.f32 0.5, %v978_v23 }
 0x2d6   : > { %v999_v37 = vmul.f32 %v995_v35, %v979_v30 }
 0x2d7   : > { %v2275_v27 = vpop.eup %2274  ;;  %v1000_v40 = vmul.f32 %v996_v38, %v980_v32 }
 0x2d8   : > { %v2277_v29 = vpop.eup %2276  ;;  %v1003_v31 = vrot.slane %v2275_v27, 4 }
 0x2d9   : > { %v1004_v33 = vrot.slane %v2277_v29, 4  ;;  %v2279_v45 = vpop.eup %2278 }
 0x2da   : > { %v1007_v34 = vmul.f32 %v1003_v31, %v979_v30  ;;  %v2281_v46 = vpop.eup %2280  ;;  %v985_v47 = vmul.f32 0.5, %v2279_v45  ;;  %v1173_v31 = vld [vmem:[#allocation8 + $0x6] ss:$8 sm:$0x3] }
 0x2db   : > { %v1008_v36 = vmul.f32 %v1004_v33, %v980_v32  ;;  %v986_v48 = vmul.f32 0.5, %v2281_v46 }
 0x2dc   : > { %v1011_v39 = vrot.slane %v1007_v34, 4  ;;  %v987_v51 = vadd.f32 0.5, %v985_v47  ;;  %v1175_v34 = vperm.slane %v1173_v31, 0 }
 0x2dd   : > { %v1012_v41 = vrot.slane %v1008_v36, 4  ;;  %v988_v53 = vadd.f32 0.5, %v986_v48 }
 0x2de   : > { %v1015_v42 = vadd.f32 %v1011_v39, %v999_v37 }
 0x2df   : > { %v1016_v43 = vadd.f32 %v1012_v41, %v1000_v40 }
 0x2e0   : > { %2282 = vtanh.f32 %v1015_v42  ;;  %1029 = vst.sshfl [vmem:[#allocation1] sm:$0xff pattern:$0x75316420] %v1015_v42 }
 0x2e1   : > { %2284 = vtanh.f32 %v1016_v43  ;;  %1030 = vst.sshfl [vmem:[#allocation1 + $0x8] sm:$0xff pattern:$0x75316420] %v1016_v43 }
 0x2e2   : > { %1068 = vst [vmem:[#allocation1] ss:$2 sm:$0xff] %v2039_v44 }
 0x2e6   : > { %v2283_v49 = vpop.eup %2282 }
 0x2e7   : > { %v2285_v50 = vpop.eup %2284  ;;  %v1021_v52 = vrot.slane %v2283_v49, 4 }
 0x2e8   : > { %v1022_v54 = vrot.slane %v2285_v50, 4  ;;  %v1032_v55 = vld [vmem:[#allocation1 + $0x1] ss:$2 sm:$0xff] }
 0x2e9   : > { %v1025_v56 = vmul.f32 %v1021_v52, %v987_v51  ;;  %v1069_v57 = vld.sshfl [vmem:[#allocation1] sm:$0xff pattern:$0x75316420]  ;;  %v1070_v58 = vld.sshfl [vmem:[#allocation1 + $0x8] sm:$0xff pattern:$0x75316420] }
 0x2ea   : > { %v1026_v59 = vmul.f32 %v1022_v54, %v988_v53  ;;  %1073 = vst [vmem:[#allocation2] sm:$0xf] %v1069_v57  ;;  %v1157_v54 = vld [vmem:[#allocation8 + $0x5] ss:$8 sm:$0x3] }
 0x2eb   : > { %v1037_v60 = vrot.slane %v1025_v56, 4  ;;  %1074 = vst [vmem:[#allocation2 + $0x8] sm:$0xf] %v1070_v58  ;;  %v1048_v61 = vsel %vm586_vm4, %v1025_v56, 0.0  ;;  %v1056_v63 = vmul.f32 %v1025_v56, %v1025_v56  ;;  %v1159_v57 = vperm.slane %v1157_v54, 0 }
 0x2ec   : > { %v1038_v1 = vrot.slane %v1026_v59, 4  ;;  %1346 = vst [vmem:[#allocation1 + $0x1] ss:$2 sm:$0xff] %v1032_v55  ;;  %v1049_v2 = vsel %vm586_vm4, %v1026_v59, 0.0  ;;  %v1057_v3 = vmul.f32 %v1026_v59, %v1026_v59  ;;  %v1160_v58 = vperm.slane %v1157_v54, 1 }
 0x2ed   : > { %1041 = vst [vmem:[#allocation2] sm:$0xf0] %v1037_v60  ;;  %v2789_v5 = vadd.f32 %v1049_v2, %v1048_v61  ;;  %v1058_v6 = vsel %vm586_vm4, %v1056_v63, 0.0 }
 0x2ee   : > { %1042 = vst [vmem:[#allocation2 + $0x8] sm:$0xf0] %v1038_v1  ;;  %v1043_v7 = vsel %vm586_vm4, %v1025_v56, %v1038_v1  ;;  %v1059_v10 = vsel %vm586_vm4, %v1057_v3, 0.0  ;;  %v1115_v3 = vld [vmem:[#allocation8 + $0x2] ss:$8 sm:$0x3] }
 0x2ef   : > { %2038 = vst [vmem:[%s2724_s9 + $0x8] sm:$0xff] %v1043_v7  ;;  %v2795_v11 = vadd.f32 %v1059_v10, %v1058_v6  ;;  %v1131_v6 = vld [vmem:[#allocation8 + $0x3] ss:$8 sm:$0x3] }
 0x2f4   : > { %v1075_v14 = vld [vmem:[#allocation2] sm:$0xff] }
 0x2f5   : > { %1167 = vrot.lane.b32.xlu2 %v1075_v14, %s2472_s3  ;;  %1199 = vrot.lane.b32.xlu0 %v1075_v14, %s2473_s26  ;;  %v1076_v15 = vld [vmem:[#allocation2 + $0x8] sm:$0xff]  ;;  %v1147_v16 = vmul.f32 %v1143_v12, %v1075_v14  ;;  %v1117_v12 = vperm.slane %v1115_v3, 0 }
 0x2f6   : > { %1201 = vrot.lane.b32.xlu1 %v1076_v15, %s2473_s26  ;;  %v1148_v17 = vmul.f32 %v1144_v13, %v1076_v15  ;;  %v1118_v13 = vperm.slane %v1115_v3, 1 }
 0x2f8   : > { %v1149_v18 = vpack.c.bf16 %v1148_v17, %v1147_v16 }
 0x2fa   : > { %1150 = vst [vmem:[#allocation4 + $0x20] sm:$0xff] %v1149_v18  ;;  %v1133_v18 = vperm.slane %v1131_v6, 0 }
 0x2fd   : > { %1185 = vrot.lane.b32.xlu2 %v1076_v15, %s2474_s29  ;;  %1169 = vrot.lane.b32.xlu0 %v1076_v15, %s2472_s3 }
 0x2fe   : > { %1183 = vrot.lane.b32.xlu1 %v1075_v14, %s2474_s29 }
 0x305   : > { %1109 = vrot.lane.b32.xlu2 %v1075_v14, %s2476_s8  ;;  %1151 = vrot.lane.b32.xlu0 %v1075_v14, %s2475_s7 }
 0x306   : > { %1153 = vrot.lane.b32.xlu1 %v1076_v15, %s2475_s7 }
 0x30d   : > { %1127 = vrot.lane.b32.xlu2 %v1076_v15, %s2477_s12  ;;  %1111 = vrot.lane.b32.xlu0 %v1076_v15, %s2476_s8 }
 0x30e   : > { %1125 = vrot.lane.b32.xlu1 %v1075_v14, %s2477_s12 }
 0x315   : > { %1093 = vrot.lane.b32.xlu2 %v1075_v14, %s2479_s19  ;;  %1077 = vrot.lane.b32.xlu0 %v1075_v14, %s2478_s17 }
 0x316   : > { %1079 = vrot.lane.b32.xlu1 %v1076_v15, %s2478_s17 }
 0x31d   : > { %1235 = vperm.xlu2 %2252, %v2695_v26   ;;  %1095 = vrot.lane.b32.xlu0 %v1076_v15, %s2479_s19  ;;  %v1189_v26 = vld [vmem:[#allocation8 + $0x7] ss:$8 sm:$0x3] }
 0x31e   : > { %1230 = vperm.xlu1 %2251, %v2690_v25   ;;  %v1176_v25 = vperm.slane %v1173_v31, 1  ;;  %v1191_v35 = vperm.slane %v1189_v26, 0  ;;  %v1192_v36 = vperm.slane %v1189_v26, 1 }
 0x34f   : > { %v1168_v19 = vpop.permute.xlu2 %1167 }
 0x357   : > { %v1186_v32 = vpop.permute.xlu2 %1185 }
 0x35f   : > { %v1110_v56 = vpop.permute.xlu2 %1109 }
 0x367   : > { %v1200_v23 = vpop.permute.xlu0 %1199 }
 0x368   : > { %v1202_v24 = vpop.permute.xlu1 %1201 }
 0x369   : > { %v1203_v27 = vsel %vm495_vm2, %v1200_v23, %v1202_v24  ;;  %v1204_v28 = vsel %vm495_vm2, %v1202_v24, %v1200_v23 }
 0x36a   : > { %v1211_v29 = vmul.f32 %v1207_v21, %v1203_v27  ;;  %v1212_v30 = vmul.f32 %v1208_v22, %v1204_v28  ;;  %v1128_v21 = vpop.permute.xlu2 %1127 }
 0x36c   : > { %v1213_v33 = vpack.c.bf16 %v1212_v30, %v1211_v29 }
 0x36e   : > { %v1268_v37 = vunpack.c.l.b16 %v1213_v33  ;;  %v1269_v38 = vunpack.c.h.b16 %v1213_v33  ;;  %v1083_v33 = vld [vmem:[#allocation8] ss:$8 sm:$0x3] }
 0x36f   : > { %v1170_v39 = vpop.permute.xlu0 %1169 }
 0x370   : > { %v1171_v40 = vsel %vm459_vm1, %v1168_v19, %v1170_v39  ;;  %v1172_v41 = vsel %vm459_vm1, %v1170_v39, %v1168_v19  ;;  %v1184_v42 = vpop.permute.xlu1 %1183  ;;  %v1278_v43 = vpack.c.b16 %v1268_v37, %v1268_v37  ;;  %v1279_v44 = vpack.c.b16 %v1269_v38, %v1269_v38 }
 0x371   : > { %v1179_v45 = vmul.f32 %v1175_v34, %v1171_v40  ;;  %v1180_v46 = vmul.f32 %v1176_v25, %v1172_v41  ;;  %v1187_v47 = vsel %vm477_vm0, %v1184_v42, %v1186_v32  ;;  %v1188_v48 = vsel %vm477_vm0, %v1186_v32, %v1184_v42  ;;  %v2062_v25 = vld [vmem:[#allocation4 + $0x20] sm:$0xf] }
 0x372   : > { %v1195_v49 = vmul.f32 %v1191_v35, %v1187_v47  ;;  %v1196_v50 = vmul.f32 %v1192_v36, %v1188_v48  ;;  %v1292_v51 = vsel %vm586_vm4, %v1278_v43, 0  ;;  %v1295_v52 = vsel %vm586_vm4, %v1279_v44, 0  ;;  %v2148_v35 = vld [vmem:[#allocation4 + $0x24] sm:$0xf] }
 0x373   : > { %v1181_v53 = vpack.c.bf16 %v1180_v46, %v1179_v45  ;;  %1300 = vmatpush.bf16.msrb.mxu0 %v1292_v51  ;;  %1314 = vmatpush.bf16.msrb.mxu1 %v1295_v52  ;;  %v1134_v19 = vperm.slane %v1131_v6, 1  ;;  %v1085_v38 = vperm.slane %v1083_v33, 0  ;;  %v1086_v39 = vperm.slane %v1083_v33, 1  ;;  %v1099_v48 = vld [vmem:[#allocation8 + $0x1] ss:$8 sm:$0x3] }
 0x374   : > { %v1197_v55 = vpack.c.bf16 %v1196_v50, %v1195_v49  ;;  %v1101_v52 = vperm.slane %v1099_v48, 0 }
 0x375   : > { %1182 = vst [vmem:[#allocation4 + $0x30] sm:$0xff] %v1181_v53  ;;  %v1102_v53 = vperm.slane %v1099_v48, 1  ;;  %v2079_v48 = vld [vmem:[%s2623_s11 + $0x18] sm:$0xff] }
 0x376   : > { %1198 = vst [vmem:[#allocation4 + $0x38] sm:$0xff] %v1197_v55 }
 0x377   : > { %v1152_v59 = vpop.permute.xlu0 %1151 }
 0x378   : > { %v1154_v60 = vpop.permute.xlu1 %1153 }
 0x379   : > { %v1155_v61 = vsel %vm441_vm3, %v1152_v59, %v1154_v60  ;;  %v1156_v63 = vsel %vm441_vm3, %v1154_v60, %v1152_v59 }
 0x37a   : > { %v1163_v1 = vmul.f32 %v1159_v57, %v1155_v61  ;;  %v1164_v2 = vmul.f32 %v1160_v58, %v1156_v63  ;;  %v1094_v58 = vpop.permute.xlu2 %1093 }
 0x37c   : > { %v1165_v7 = vpack.c.bf16 %v1164_v2, %v1163_v1  ;;  %v2070_v9 = vld [vmem:[#allocation4 + $0x30] sm:$0xf]  ;;  %v2150_v10 = vld [vmem:[#allocation4 + $0x34] sm:$0xf] }
 0x37d   : > { %v2151_v14 = vld [vmem:[#allocation4 + $0x34] sm:$0xf0]  ;;  %v2072_v15 = vld [vmem:[#allocation4 + $0x38] sm:$0xf0] }
 0x37e   : > { %1166 = vst [vmem:[#allocation4 + $0x28] sm:$0xff] %v1165_v7  ;;  %v2071_v16 = vor.u32 %v2151_v14, %v2070_v9  ;;  %v2075_v17 = vor.u32 %v2150_v10, %v2072_v15 }
 0x37f   : > { %v1112_v20 = vpop.permute.xlu0 %1111 }
 0x380   : > { %v1113_v22 = vsel %vm394_vm6, %v1110_v56, %v1112_v20  ;;  %v1114_v23 = vsel %vm394_vm6, %v1112_v20, %v1110_v56  ;;  %1301 = vmatpush.bf16.msrb.mxu0 %v2071_v16  ;;  %1315 = vmatpush.bf16.msrb.mxu1 %v2075_v17  ;;  %v1126_v24 = vpop.permute.xlu1 %1125 }
 0x381   : > { %v1121_v27 = vmul.f32 %v1117_v12, %v1114_v23  ;;  %v1122_v28 = vmul.f32 %v1118_v13, %v1113_v22  ;;  %v1129_v29 = vsel %vm412_vm5, %v1126_v24, %v1128_v21  ;;  %v1130_v30 = vsel %vm412_vm5, %v1128_v21, %v1126_v24  ;;  %v2143_v13 = vld [vmem:[%s3021_s1] sm:$0xff] }
 0x382   : > { %v1137_v31 = vmul.f32 %v1133_v18, %v1130_v30  ;;  %v1138_v26 = vmul.f32 %v1134_v19, %v1129_v29  ;;  %v1236_v21 = vpop.permute.xlu2 %1235 }
 0x383   : > { %v1123_v32 = vpack.c.bf16 %v1122_v28, %v1121_v27 }
 0x384   : > { %v1139_v34 = vpack.c.bf16 %v1138_v26, %v1137_v31 }
 0x385   : > { %1124 = vst [vmem:[#allocation4 + $0x10] sm:$0xff] %v1123_v32  ;;  %v2149_v36 = vld [vmem:[#allocation4 + $0x24] sm:$0xf0]  ;;  %v2064_v37 = vld [vmem:[#allocation4 + $0x28] sm:$0xf0] }
 0x386   : > { %1140 = vst [vmem:[#allocation4 + $0x18] sm:$0xff] %v1139_v34  ;;  %v2063_v40 = vor.u32 %v2149_v36, %v2062_v25  ;;  %v2067_v41 = vor.u32 %v2148_v35, %v2064_v37 }
 0x387   : > { %v1078_v42 = vpop.permute.xlu0 %1077 }
 0x388   : > { %v1080_v43 = vpop.permute.xlu1 %1079  ;;  %1302 = vmatpush.bf16.msrb.mxu0 %v2063_v40  ;;  %1316 = vmatpush.bf16.msrb.mxu1 %v2067_v41 }
 0x389   : > { %v1081_v44 = vsel %vm359_vm7, %v1078_v42, %v1080_v43  ;;  %v1082_v45 = vsel %vm359_vm7, %v1080_v43, %v1078_v42  ;;  %v1348_v42 = vld.sshfl [vmem:[#allocation1 + $0x8] sm:$0xff pattern:$0x75316420] }
 0x38a   : > { %v1089_v46 = vmul.f32 %v1085_v38, %v1082_v45  ;;  %v1090_v47 = vmul.f32 %v1086_v39, %v1081_v44  ;;  %v1347_v39 = vld.sshfl [vmem:[#allocation1] sm:$0xff pattern:$0x75316420] }
 0x38c   : > { %v1091_v49 = vpack.c.bf16 %v1090_v47, %v1089_v46  ;;  %v2054_v50 = vld [vmem:[#allocation4 + $0x10] sm:$0xf]  ;;  %v2146_v51 = vld [vmem:[#allocation4 + $0x14] sm:$0xf] }
 0x38d   : > { %v2147_v54 = vld [vmem:[#allocation4 + $0x14] sm:$0xf0]  ;;  %v2056_v55 = vld [vmem:[#allocation4 + $0x18] sm:$0xf0] }
 0x38e   : > { %1092 = vst [vmem:[#allocation4] sm:$0xff] %v1091_v49  ;;  %v2055_v56 = vor.u32 %v2147_v54, %v2054_v50  ;;  %v2059_v57 = vor.u32 %v2146_v51, %v2056_v55 }
 0x38f   : > { %v1096_v59 = vpop.permute.xlu0 %1095 }
 0x390   : > { %v1097_v60 = vsel %vm376_vm8, %v1094_v58, %v1096_v59  ;;  %v1098_v61 = vsel %vm376_vm8, %v1096_v59, %v1094_v58  ;;  %1303 = vmatpush.bf16.msrb.mxu0 %v2055_v56  ;;  %1317 = vmatpush.bf16.msrb.mxu1 %v2059_v57  ;;  %v1231_v14 = vpop.permute.xlu1 %1230 }
 0x391   : > { %v1105_v63 = vmul.f32 %v1101_v52, %v1098_v61  ;;  %v1106_v1 = vmul.f32 %v1102_v53, %v1097_v60 }
 0x393   : > { %v1107_v2 = vpack.c.bf16 %v1106_v1, %v1105_v63 }
 0x395   : > { %1108 = vst [vmem:[#allocation4 + $0x8] sm:$0xff] %v1107_v2  ;;  %v2046_v3 = vld [vmem:[#allocation4] sm:$0xf]  ;;  %v2144_v7 = vld [vmem:[#allocation4 + $0x4] sm:$0xf] }
 0x39c   : > { %v2145_v6 = vld [vmem:[#allocation4 + $0x4] sm:$0xf0]  ;;  %v2048_v9 = vld [vmem:[#allocation4 + $0x8] sm:$0xf0] }
 0x39d   : > { %v2047_v10 = vor.u32 %v2145_v6, %v2046_v3  ;;  %v2051_v12 = vor.u32 %v2144_v7, %v2048_v9 }
 0x39f   : > { %1304 = vmatpush.bf16.msrb.mxu0 %v2047_v10  ;;  %1318 = vmatpush.bf16.msrb.mxu1 %v2051_v12 }
 0x3a2   : > { %2076 = vmatmul.msk.bf16.vlgmr.msrb.gmra.mxu0 %vm582_vm9, %v2143_v13  ;;  %2077 = vmatmul.msk.bf16.vlgmr.msrb.gmra.mxu1 %vm582_vm9, %v2143_v13 }
 0x41f   : > { %v1306_v15 = vpop.f32.mrf.mxu0  ;;  %v1320_v16 = vpop.f32.mrf.mxu1 }
 0x420   : > { %v1307_v17 = vadd.f32 %v1306_v15, %v1231_v14  ;;  %v1321_v18 = vadd.f32 %v1320_v16, %v1231_v14  ;;  %v1493_v15 = vld [vmem:[#allocation8 + $0x4] ss:$8 sm:$0x3] }
 0x422   : > { %v1325_v19 = vmul.f32 0.5, %v1307_v17  ;;  %v1326_v20 = vmul.f32 0.5, %v1321_v18  ;;  %v1495_v18 = vperm.slane %v1493_v15, 0 }
 0x424   : > { %2286 = vtanh.f32 %v1325_v19  ;;  %v1496_v19 = vperm.slane %v1493_v15, 1 }
 0x425   : > { %2288 = vtanh.f32 %v1326_v20 }
 0x427   : > { %v1308_v22 = vpop.f32.mrf.mxu0  ;;  %v1322_v23 = vpop.f32.mrf.mxu1 }
 0x428   : > { %v1309_v24 = vadd.f32 %v1308_v22, %v1236_v21  ;;  %v1323_v27 = vadd.f32 %v1322_v23, %v1236_v21 }
 0x42a   : > { %v2287_v28 = vpop.eup %2286  ;;  %2290 = vtanh.f32 %v1309_v24  ;;  %v1333_v26 = vmul.f32 0.5, %v1309_v24  ;;  %v1334_v33 = vmul.f32 0.5, %v1323_v27 }
 0x42b   : > { %v2289_v29 = vpop.eup %2288  ;;  %2292 = vtanh.f32 %v1323_v27  ;;  %v1329_v30 = vmul.f32 0.5, %v2287_v28  ;;  %v1579_v27 = vld [vmem:[%s3022_s2 + $0x8] sm:$0xff]  ;;  %v1578_v28 = vld [vmem:[%s3022_s2] sm:$0xff] }
 0x42c   : > { %v1330_v31 = vmul.f32 0.5, %v2289_v29  ;;  %2294 = vtanh.f32 %v1333_v26 }
 0x42d   : > { %v1331_v25 = vadd.f32 0.5, %v1329_v30  ;;  %2296 = vtanh.f32 %v1334_v33  ;;  %v1557_v30 = vld [vmem:[#allocation8 + $0x10] ss:$8 sm:$0x3] }
 0x42e   : > { %v1332_v36 = vadd.f32 0.5, %v1330_v31  ;;  %v1559_v31 = vperm.slane %v1557_v30, 0  ;;  %v1560_v26 = vperm.slane %v1557_v30, 1 }
 0x42f   : > { %v1351_v41 = vmul.f32 %v1347_v39, %v1331_v25 }
 0x430   : > { %v2291_v32 = vpop.eup %2290  ;;  %v1352_v44 = vmul.f32 %v1348_v42, %v1332_v36 }
 0x431   : > { %v2293_v34 = vpop.eup %2292  ;;  %v1355_v35 = vrot.slane %v2291_v32, 4 }
 0x432   : > { %v1356_v37 = vrot.slane %v2293_v34, 4  ;;  %v2295_v49 = vpop.eup %2294 }
 0x433   : > { %v1359_v38 = vmul.f32 %v1355_v35, %v1331_v25  ;;  %v2297_v50 = vpop.eup %2296  ;;  %v1337_v51 = vmul.f32 0.5, %v2295_v49  ;;  %v1525_v35 = vld [vmem:[#allocation8 + $0x6] ss:$8 sm:$0x3] }
 0x434   : > { %v1360_v40 = vmul.f32 %v1356_v37, %v1332_v36  ;;  %v1338_v52 = vmul.f32 0.5, %v2297_v50  ;;  %v1527_v37 = vperm.slane %v1525_v35, 0 }
 0x435   : > { %v1363_v43 = vrot.slane %v1359_v38, 4  ;;  %v1339_v55 = vadd.f32 0.5, %v1337_v51  ;;  %v1528_v38 = vperm.slane %v1525_v35, 1 }
 0x436   : > { %v1364_v45 = vrot.slane %v1360_v40, 4  ;;  %v1340_v57 = vadd.f32 0.5, %v1338_v52 }
 0x437   : > { %v1367_v46 = vadd.f32 %v1363_v43, %v1351_v41 }
 0x438   : > { %v1368_v47 = vadd.f32 %v1364_v45, %v1352_v44 }
 0x439   : > { %2298 = vtanh.f32 %v1367_v46  ;;  %1381 = vst.sshfl [vmem:[#allocation1] sm:$0xff pattern:$0x75316420] %v1367_v46 }
 0x43a   : > { %2300 = vtanh.f32 %v1368_v47  ;;  %1382 = vst.sshfl [vmem:[#allocation1 + $0x8] sm:$0xff pattern:$0x75316420] %v1368_v47 }
 0x43b   : > { %1420 = vst [vmem:[#allocation1] ss:$2 sm:$0xff] %v2079_v48 }
 0x43f   : > { %v2299_v53 = vpop.eup %2298 }
 0x440   : > { %v2301_v54 = vpop.eup %2300  ;;  %v1373_v56 = vrot.slane %v2299_v53, 4 }
 0x441   : > { %v1374_v58 = vrot.slane %v2301_v54, 4  ;;  %v1384_v59 = vld [vmem:[#allocation1 + $0x1] ss:$2 sm:$0xff] }
 0x442   : > { %v1377_v60 = vmul.f32 %v1373_v56, %v1339_v55  ;;  %v1421_v61 = vld.sshfl [vmem:[#allocation1] sm:$0xff pattern:$0x75316420]  ;;  %v1422_v63 = vld.sshfl [vmem:[#allocation1 + $0x8] sm:$0xff pattern:$0x75316420] }
 0x443   : > { %v1378_v1 = vmul.f32 %v1374_v58, %v1340_v57  ;;  %1425 = vst [vmem:[#allocation2] sm:$0xf] %v1421_v61  ;;  %v1509_v58 = vld [vmem:[#allocation8 + $0x5] ss:$8 sm:$0x3] }
 0x444   : > { %v1389_v2 = vrot.slane %v1377_v60, 4  ;;  %1426 = vst [vmem:[#allocation2 + $0x8] sm:$0xf] %v1422_v63  ;;  %v1400_v3 = vsel %vm586_vm4, %v1377_v60, 0.0  ;;  %v1408_v6 = vmul.f32 %v1377_v60, %v1377_v60  ;;  %v1511_v61 = vperm.slane %v1509_v58, 0 }
 0x445   : > { %v1390_v7 = vrot.slane %v1378_v1, 4  ;;  %v1401_v9 = vsel %vm586_vm4, %v1378_v1, 0.0  ;;  %v1409_v10 = vmul.f32 %v1378_v1, %v1378_v1  ;;  %1698 = vst [vmem:[#allocation1 + $0x1] ss:$2 sm:$0xff] %v1384_v59  ;;  %v1512_v63 = vperm.slane %v1509_v58, 1 }
 0x446   : > { %1393 = vst [vmem:[#allocation2] sm:$0xf0] %v1389_v2  ;;  %v1402_v12 = vadd.f32 %v1401_v9, %v1400_v3  ;;  %v1410_v13 = vsel %vm586_vm4, %v1408_v6, 0.0 }
 0x447   : > { %1394 = vst [vmem:[#allocation2 + $0x8] sm:$0xf0] %v1390_v7  ;;  %v1395_v14 = vsel %vm586_vm4, %v1377_v60, %v1390_v7  ;;  %v1411_v16 = vsel %vm586_vm4, %v1409_v10, 0.0  ;;  %v1467_v10 = vld [vmem:[#allocation8 + $0x2] ss:$8 sm:$0x3] }
 0x448   : > { %2078 = vst [vmem:[%s2724_s9 + $0x10] sm:$0xff] %v1395_v14  ;;  %v1412_v17 = vadd.f32 %v1411_v16, %v1410_v13  ;;  %v1469_v16 = vperm.slane %v1467_v10, 0 }
 0x44d   : > { %v1427_v20 = vld [vmem:[#allocation2] sm:$0xff] }
 0x44e   : > { %1519 = vrot.lane.b32.xlu2 %v1427_v20, %s2472_s3  ;;  %v1499_v21 = vmul.f32 %v1495_v18, %v1427_v20  ;;  %1551 = vrot.lane.b32.xlu0 %v1427_v20, %s2473_s26  ;;  %v1428_v22 = vld [vmem:[#allocation2 + $0x8] sm:$0xff] }
 0x44f   : > { %1553 = vrot.lane.b32.xlu1 %v1428_v22, %s2473_s26  ;;  %v1500_v23 = vmul.f32 %v1496_v19, %v1428_v22  ;;  %s1793_s26 = sshll.u32 %s2724_s9, 4  ;;  %s2969_s26 = int_to_ptr.vmem [resolvable:$true] %s1793_s26 }
 0x451   : > { %v1501_v24 = vpack.c.bf16 %v1500_v23, %v1499_v21 }
 0x453   : > { %1502 = vst [vmem:[#allocation4 + $0x20] sm:$0xff] %v1501_v24 }
 0x456   : > { %1537 = vrot.lane.b32.xlu2 %v1428_v22, %s2474_s29  ;;  %1521 = vrot.lane.b32.xlu0 %v1428_v22, %s2472_s3  ;;  %s1792_s3 = scalar_lea.hbm %s3024_s4, %s2161_s13 }
 0x457   : > { %1535 = vrot.lane.b32.xlu1 %v1427_v20, %s2474_s29  ;;  %s1795_s29 = sshll.u32 %s1792_s3, 4  ;;  %s2971_s29 = int_to_ptr.hbm [resolvable:$true] %s1795_s29 }
 0x45e   : > { %1461 = vrot.lane.b32.xlu2 %v1427_v20, %s2476_s8  ;;  %1503 = vrot.lane.b32.xlu0 %v1427_v20, %s2475_s7 }
 0x45f   : > { %1505 = vrot.lane.b32.xlu1 %v1428_v22, %s2475_s7  ;;  %s324_s7 = scalar_select %p323_p1, %s2456_s24, 1 }
 0x460   : > { %s1770_s24 = scalar_lea.sflag [#allocation7], %s2617_s18 }
 0x466   : > { %1479 = vrot.lane.b32.xlu2 %v1428_v22, %s2477_s12  ;;  %1463 = vrot.lane.b32.xlu0 %v1428_v22, %s2476_s8  ;;  %s1959_s8 = sshll.u32 %s324_s7, 2  ;;  %s2392_s7 = sshra.s32 %s2971_s29, 4  ;;  %s2393_s7 = int_to_ptr.hbm [resolvable:$true] %s2392_s7 }
 0x467   : > { %1477 = vrot.lane.b32.xlu1 %v1427_v20, %s2477_s12  ;;  %s2931_s30 = scalar_lea.vmem %s3026_s6, %s1959_s8  ;;  %p2399_p12 = scmp.lt.s32.totalorder %s2393_s7, %s3024_s4 }
 0x468   : > { %341 = vst.msk [vmem:[%s2931_s30] sm:$0xf] %vm339_vm10, %v2471_v0 }
 0x46e   : > { %1445 = vrot.lane.b32.xlu2 %v1427_v20, %s2479_s19  ;;  %1429 = vrot.lane.b32.xlu0 %v1427_v20, %s2478_s17 }
 0x46f   : > { %1431 = vrot.lane.b32.xlu1 %v1428_v22, %s2478_s17 }
 0x476   : > { %1587 = vperm.xlu2 %2252, %v1579_v27   ;;  %1447 = vrot.lane.b32.xlu0 %v1428_v22, %s2479_s19  ;;  %s2926_s19 = scalar_lea.vmem %s3025_s5, %s1959_s8  ;;  %s2394_s8 = scalar_lea.hbm %s2393_s7, 32 }
 0x477   : > { %1582 = vperm.xlu1 %2251, %v1578_v28   ;;  %340 = vst.msk [vmem:[%s2926_s19] sm:$0xf] %vm339_vm10, %v2471_v0  ;;  %p2395_p4 = scmp.ne.s32.totalorder %s2393_s7, %s2394_s8  ;;  %p2400_p13 = scmp.lt.s32.totalorder %s2398_s15, %s2394_s8 }
 0x479   : > { %p2396_p8 = pnand %p2395_p4, %p2597_p5  ;;  %p2401_p0 = por %p2400_p13, %p2399_p12 }
 0x47b   : > { %p2397_p10 = pneg %p2396_p8 }
 0x47d   : > { %p2402_p3 = pnand %p2401_p0, %p2397_p10 }
 0x49f   : > { %1051 = vadd.xlane.f32.xlu2 %v2789_v5 }
 0x4a0   : > { %698 = vadd.xlane.f32.xlu0 %v2717_v62 }
 0x4a1   : > { %709 = vadd.xlane.f32.xlu1 %v2727_v4  ;;  %v1541_v4 = vld [vmem:[#allocation8 + $0x7] ss:$8 sm:$0x3] }
 0x4a2   : > { %v1543_v39 = vperm.slane %v1541_v4, 0  ;;  %v1544_v40 = vperm.slane %v1541_v4, 1  ;;  %v2102_v4 = vld [vmem:[#allocation4 + $0x20] sm:$0xf] }
 0x4a7   : > { %1061 = vadd.xlane.f32.xlu2 %v2795_v11 }
 0x4a8   : > { %1403 = vadd.xlane.f32.xlu0 %v1402_v12  ;;  %v1520_v29 = vpop.permute.xlu2 %1519  ;;  %v1483_v12 = vld [vmem:[#allocation8 + $0x3] ss:$8 sm:$0x3] }
 0x4a9   : > { %1413 = vadd.xlane.f32.xlu1 %v1412_v17  ;;  %v1470_v17 = vperm.slane %v1467_v10, 1  ;;  %v1485_v22 = vperm.slane %v1483_v12, 0  ;;  %v1486_v23 = vperm.slane %v1483_v12, 1  ;;  %v2152_v12 = vld [vmem:[%s3021_s1] sm:$0xff] }
 0x4b0   : > { %v1538_v36 = vpop.permute.xlu2 %1537 }
 0x4b8   : > { %v1462_v60 = vpop.permute.xlu2 %1461 }
 0x4c0   : > { %v1552_v32 = vpop.permute.xlu0 %1551  ;;  %v1480_v27 = vpop.permute.xlu2 %1479 }
 0x4c1   : > { %v1554_v33 = vpop.permute.xlu1 %1553 }
 0x4c2   : > { %v1555_v34 = vsel %vm495_vm2, %v1552_v32, %v1554_v33  ;;  %v1556_v5 = vsel %vm495_vm2, %v1554_v33, %v1552_v32 }
 0x4c3   : > { %v1563_v25 = vmul.f32 %v1559_v31, %v1555_v34  ;;  %v1564_v62 = vmul.f32 %v1560_v26, %v1556_v5 }
 0x4c5   : > { %v1565_v11 = vpack.c.bf16 %v1564_v62, %v1563_v25  ;;  %v1435_v62 = vld [vmem:[#allocation8] ss:$8 sm:$0x3] }
 0x4c7   : > { %v1620_v41 = vunpack.c.l.b16 %v1565_v11  ;;  %v1621_v42 = vunpack.c.h.b16 %v1565_v11 }
 0x4c8   : > { %v1522_v43 = vpop.permute.xlu0 %1521  ;;  %v1446_v58 = vpop.permute.xlu2 %1445 }
 0x4c9   : > { %v1523_v44 = vsel %vm459_vm1, %v1520_v29, %v1522_v43  ;;  %v1524_v45 = vsel %vm459_vm1, %v1522_v43, %v1520_v29  ;;  %v1536_v46 = vpop.permute.xlu1 %1535  ;;  %v1630_v47 = vpack.c.b16 %v1620_v41, %v1620_v41  ;;  %v1631_v48 = vpack.c.b16 %v1621_v42, %v1621_v42 }
 0x4ca   : > { %v1531_v49 = vmul.f32 %v1527_v37, %v1523_v44  ;;  %v1532_v50 = vmul.f32 %v1528_v38, %v1524_v45  ;;  %v1539_v51 = vsel %vm477_vm0, %v1536_v46, %v1538_v36  ;;  %v1540_v52 = vsel %vm477_vm0, %v1538_v36, %v1536_v46  ;;  %v2157_v36 = vld [vmem:[#allocation4 + $0x24] sm:$0xf] }
 0x4cb   : > { %v1547_v53 = vmul.f32 %v1543_v39, %v1539_v51  ;;  %v1548_v54 = vmul.f32 %v1544_v40, %v1540_v52  ;;  %v1644_v55 = vsel %vm586_vm4, %v1630_v47, 0  ;;  %v1647_v56 = vsel %vm586_vm4, %v1631_v48, 0  ;;  %v1451_v48 = vld [vmem:[#allocation8 + $0x1] ss:$8 sm:$0x3] }
 0x4cc   : > { %v1533_v57 = vpack.c.bf16 %v1532_v50, %v1531_v49  ;;  %1652 = vmatpush.bf16.msrb.mxu2 %v1644_v55  ;;  %1666 = vmatpush.bf16.msrb.mxu3 %v1647_v56  ;;  %v1437_v38 = vperm.slane %v1435_v62, 0  ;;  %v1438_v39 = vperm.slane %v1435_v62, 1  ;;  %v1453_v52 = vperm.slane %v1451_v48, 0 }
 0x4cd   : > { %v1549_v59 = vpack.c.bf16 %v1548_v54, %v1547_v53  ;;  %v1454_v53 = vperm.slane %v1451_v48, 1 }
 0x4ce   : > { %1534 = vst [vmem:[#allocation4 + $0x30] sm:$0xff] %v1533_v57 }
 0x4cf   : > { %1550 = vst [vmem:[#allocation4 + $0x38] sm:$0xff] %v1549_v59 }
 0x4d0   : > { %v1504_v1 = vpop.permute.xlu0 %1503  ;;  %v1588_v0 = vpop.permute.xlu2 %1587 }
 0x4d1   : > { %v1506_v2 = vpop.permute.xlu1 %1505 }
 0x4d2   : > { %v1507_v3 = vsel %vm441_vm3, %v1504_v1, %v1506_v2  ;;  %v1508_v6 = vsel %vm441_vm3, %v1506_v2, %v1504_v1 }
 0x4d3   : > { %v1515_v7 = vmul.f32 %v1511_v61, %v1507_v3  ;;  %v1516_v9 = vmul.f32 %v1512_v63, %v1508_v6 }
 0x4d5   : > { %v1517_v13 = vpack.c.bf16 %v1516_v9, %v1515_v7  ;;  %v2110_v14 = vld [vmem:[#allocation4 + $0x30] sm:$0xf]  ;;  %v2159_v15 = vld [vmem:[#allocation4 + $0x34] sm:$0xf] }
 0x4d6   : > { %v2160_v18 = vld [vmem:[#allocation4 + $0x34] sm:$0xf0]  ;;  %v2112_v19 = vld [vmem:[#allocation4 + $0x38] sm:$0xf0] }
 0x4d7   : > { %1518 = vst [vmem:[#allocation4 + $0x28] sm:$0xff] %v1517_v13  ;;  %v2111_v20 = vor.u32 %v2160_v18, %v2110_v14  ;;  %v2115_v21 = vor.u32 %v2159_v15, %v2112_v19  ;;  %v694_v14 = vld [vmem:[%s2926_s19] sm:$0xf] }
 0x4d8   : > { %v1464_v24 = vpop.permute.xlu0 %1463  ;;  %v703_v15 = vld [vmem:[%s2931_s30] sm:$0xf] }
 0x4d9   : > { %v1465_v28 = vsel %vm394_vm6, %v1462_v60, %v1464_v24  ;;  %v1466_v29 = vsel %vm394_vm6, %v1464_v24, %v1462_v60  ;;  %1653 = vmatpush.bf16.msrb.mxu2 %v2111_v20  ;;  %1667 = vmatpush.bf16.msrb.mxu3 %v2115_v21  ;;  %v1478_v30 = vpop.permute.xlu1 %1477 }
 0x4da   : > { %v1473_v31 = vmul.f32 %v1469_v16, %v1466_v29  ;;  %v1474_v26 = vmul.f32 %v1470_v17, %v1465_v28  ;;  %v1481_v32 = vsel %vm412_vm5, %v1478_v30, %v1480_v27  ;;  %v1482_v33 = vsel %vm412_vm5, %v1480_v27, %v1478_v30 }
 0x4db   : > { %v1489_v34 = vmul.f32 %v1485_v22, %v1482_v33  ;;  %v1490_v5 = vmul.f32 %v1486_v23, %v1481_v32 }
 0x4dc   : > { %v1475_v25 = vpack.c.bf16 %v1474_v26, %v1473_v31 }
 0x4dd   : > { %v1491_v35 = vpack.c.bf16 %v1490_v5, %v1489_v34 }
 0x4de   : > { %1476 = vst [vmem:[#allocation4 + $0x10] sm:$0xff] %v1475_v25  ;;  %v2158_v11 = vld [vmem:[#allocation4 + $0x24] sm:$0xf0]  ;;  %v2104_v37 = vld [vmem:[#allocation4 + $0x28] sm:$0xf0] }
 0x4df   : > { %1492 = vst [vmem:[#allocation4 + $0x18] sm:$0xff] %v1491_v35  ;;  %v2103_v40 = vor.u32 %v2158_v11, %v2102_v4  ;;  %v2107_v41 = vor.u32 %v2157_v36, %v2104_v37 }
 0x4e0   : > { %v1430_v42 = vpop.permute.xlu0 %1429 }
 0x4e1   : > { %v1432_v43 = vpop.permute.xlu1 %1431  ;;  %1654 = vmatpush.bf16.msrb.mxu2 %v2103_v40  ;;  %1668 = vmatpush.bf16.msrb.mxu3 %v2107_v41 }
 0x4e2   : > { %v1433_v44 = vsel %vm359_vm7, %v1430_v42, %v1432_v43  ;;  %v1434_v45 = vsel %vm359_vm7, %v1432_v43, %v1430_v42 }
 0x4e3   : > { %v1441_v46 = vmul.f32 %v1437_v38, %v1434_v45  ;;  %v1442_v47 = vmul.f32 %v1438_v39, %v1433_v44 }
 0x4e5   : > { %v1443_v49 = vpack.c.bf16 %v1442_v47, %v1441_v46  ;;  %v2094_v50 = vld [vmem:[#allocation4 + $0x10] sm:$0xf]  ;;  %v2155_v51 = vld [vmem:[#allocation4 + $0x14] sm:$0xf] }
 0x4e6   : > { %v2156_v54 = vld [vmem:[#allocation4 + $0x14] sm:$0xf0]  ;;  %v2096_v55 = vld [vmem:[#allocation4 + $0x18] sm:$0xf0] }
 0x4e7   : > { %1444 = vst [vmem:[#allocation4] sm:$0xff] %v1443_v49  ;;  %v2095_v56 = vor.u32 %v2156_v54, %v2094_v50  ;;  %v2099_v57 = vor.u32 %v2155_v51, %v2096_v55  ;;  %v1699_v51 = vld.sshfl [vmem:[#allocation1] sm:$0xff pattern:$0x75316420] }
 0x4e8   : > { %v1448_v59 = vpop.permute.xlu0 %1447  ;;  %v1700_v54 = vld.sshfl [vmem:[#allocation1 + $0x8] sm:$0xff pattern:$0x75316420] }
 0x4e9   : > { %v1449_v60 = vsel %vm376_vm8, %v1446_v58, %v1448_v59  ;;  %v1450_v61 = vsel %vm376_vm8, %v1448_v59, %v1446_v58  ;;  %1655 = vmatpush.bf16.msrb.mxu2 %v2095_v56  ;;  %1669 = vmatpush.bf16.msrb.mxu3 %v2099_v57  ;;  %v1583_v13 = vpop.permute.xlu1 %1582 }
 0x4ea   : > { %v1457_v63 = vmul.f32 %v1453_v52, %v1450_v61  ;;  %v1458_v1 = vmul.f32 %v1454_v53, %v1449_v60 }
 0x4ec   : > { %v1459_v2 = vpack.c.bf16 %v1458_v1, %v1457_v63 }
 0x4ee   : > { %1460 = vst [vmem:[#allocation4 + $0x8] sm:$0xff] %v1459_v2  ;;  %v2086_v8 = vld [vmem:[#allocation4] sm:$0xf]  ;;  %v2153_v6 = vld [vmem:[#allocation4 + $0x4] sm:$0xf] }
 0x4f5   : > { %v2154_v3 = vld [vmem:[#allocation4 + $0x4] sm:$0xf0]  ;;  %v2088_v7 = vld [vmem:[#allocation4 + $0x8] sm:$0xf0] }
 0x4f6   : > { %v2087_v9 = vor.u32 %v2154_v3, %v2086_v8  ;;  %v2091_v10 = vor.u32 %v2153_v6, %v2088_v7 }
 0x4f8   : > { %1656 = vmatpush.bf16.msrb.mxu2 %v2087_v9  ;;  %1670 = vmatpush.bf16.msrb.mxu3 %v2091_v10 }
 0x4fb   : > { %2116 = vmatmul.msk.bf16.vlgmr.msrb.gmra.mxu2 %vm582_vm9, %v2152_v12  ;;  %2117 = vmatmul.msk.bf16.vlgmr.msrb.gmra.mxu3 %vm582_vm9, %v2152_v12 }
 0x512   : > { %v1052_v17 = vpop.xlane.xlu2 %1051 }
 0x513   : > { %v699_v16 = vpop.xlane.xlu0 %698 }
 0x514   : > { %v700_v18 = vadd.f32 %v699_v16, %v694_v14  ;;  %v710_v19 = vpop.xlane.xlu1 %709 }
 0x515   : > { %v711_v20 = vadd.f32 %v710_v19, %v703_v15 }
 0x516   : > { %702 = vst.msk [vmem:[%s2926_s19] sm:$0xf] %vm339_vm10, %v700_v18 }
 0x517   : > { %712 = vst.msk [vmem:[%s2931_s30] sm:$0xf] %vm339_vm10, %v711_v20 }
 0x51a   : > { %v1062_v23 = vpop.xlane.xlu2 %1061 }
 0x51b   : > { %v1404_v29 = vpop.xlane.xlu0 %1403 }
 0x51c   : > { %v1414_v26 = vpop.xlane.xlu1 %1413 }
 0x51d   : > { %v1047_v21 = vld [vmem:[%s2926_s19] sm:$0xf] }
 0x51e   : > { %v1053_v22 = vadd.f32 %v1052_v17, %v1047_v21  ;;  %v1055_v24 = vld [vmem:[%s2931_s30] sm:$0xf] }
 0x51f   : > { %v1063_v27 = vadd.f32 %v1062_v23, %v1055_v24 }
 0x520   : > { %1054 = vst.msk [vmem:[%s2926_s19] sm:$0xf] %vm339_vm10, %v1053_v22 }
 0x521   : > { %1064 = vst.msk [vmem:[%s2931_s30] sm:$0xf] %vm339_vm10, %v1063_v27 }
 0x527   : > { %v1399_v28 = vld [vmem:[%s2926_s19] sm:$0xf] }
 0x528   : > { %v1405_v30 = vadd.f32 %v1404_v29, %v1399_v28  ;;  %v1407_v31 = vld [vmem:[%s2931_s30] sm:$0xf] }
 0x529   : > { %v1415_v32 = vadd.f32 %v1414_v26, %v1407_v31 }
 0x52a   : > { %1406 = vst.msk [vmem:[%s2926_s19] sm:$0xf] %vm339_vm10, %v1405_v30 }
 0x52b   : > { %1416 = vst.msk [vmem:[%s2931_s30] sm:$0xf] %vm339_vm10, %v1415_v32 }
 0x57e   : > { %v1658_v33 = vpop.f32.mrf.mxu2  ;;  %v1672_v34 = vpop.f32.mrf.mxu3 }
 0x57f   : > { %v1659_v5 = vadd.f32 %v1658_v33, %v1583_v13  ;;  %v1673_v25 = vadd.f32 %v1672_v34, %v1583_v13 }
 0x581   : > { %v1677_v62 = vmul.f32 0.5, %v1659_v5  ;;  %v1678_v35 = vmul.f32 0.5, %v1673_v25 }
 0x583   : > { %2302 = vtanh.f32 %v1677_v62 }
 0x584   : > { %2304 = vtanh.f32 %v1678_v35 }
 0x586   : > { %v1660_v4 = vpop.f32.mrf.mxu2  ;;  %v1674_v36 = vpop.f32.mrf.mxu3 }
 0x587   : > { %v1661_v11 = vadd.f32 %v1660_v4, %v1588_v0  ;;  %v1675_v37 = vadd.f32 %v1674_v36, %v1588_v0 }
 0x589   : > { %v2303_v38 = vpop.eup %2302  ;;  %2306 = vtanh.f32 %v1661_v11  ;;  %v1685_v42 = vmul.f32 0.5, %v1661_v11  ;;  %v1686_v44 = vmul.f32 0.5, %v1675_v37 }
 0x58a   : > { %v2305_v39 = vpop.eup %2304  ;;  %2308 = vtanh.f32 %v1675_v37  ;;  %v1681_v40 = vmul.f32 0.5, %v2303_v38 }
 0x58b   : > { %v1682_v41 = vmul.f32 0.5, %v2305_v39  ;;  %2310 = vtanh.f32 %v1685_v42 }
 0x58c   : > { %v1683_v46 = vadd.f32 0.5, %v1681_v40  ;;  %2312 = vtanh.f32 %v1686_v44 }
 0x58d   : > { %v1684_v48 = vadd.f32 0.5, %v1682_v41 }
 0x58e   : > { %v1703_v53 = vmul.f32 %v1699_v51, %v1683_v46 }
 0x58f   : > { %v2307_v43 = vpop.eup %2306  ;;  %v1704_v56 = vmul.f32 %v1700_v54, %v1684_v48 }
 0x590   : > { %v2309_v45 = vpop.eup %2308  ;;  %v1707_v47 = vrot.slane %v2307_v43, 4 }
 0x591   : > { %v1708_v49 = vrot.slane %v2309_v45, 4  ;;  %v2311_v60 = vpop.eup %2310 }
 0x592   : > { %v1711_v50 = vmul.f32 %v1707_v47, %v1683_v46  ;;  %v2313_v61 = vpop.eup %2312  ;;  %v1689_v63 = vmul.f32 0.5, %v2311_v60 }
 0x593   : > { %v1712_v52 = vmul.f32 %v1708_v49, %v1684_v48  ;;  %v1690_v1 = vmul.f32 0.5, %v2313_v61 }
 0x594   : > { %v1715_v55 = vrot.slane %v1711_v50, 4  ;;  %v1691_v3 = vadd.f32 0.5, %v1689_v63 }
 0x595   : > { %v1716_v57 = vrot.slane %v1712_v52, 4  ;;  %v1692_v7 = vadd.f32 0.5, %v1690_v1 }
 0x596   : > { %v1719_v58 = vadd.f32 %v1715_v55, %v1703_v53 }
 0x597   : > { %v1720_v59 = vadd.f32 %v1716_v57, %v1704_v56 }
 0x598   : > { %2314 = vtanh.f32 %v1719_v58  ;;  %1733 = vst.sshfl [vmem:[#allocation1] sm:$0xff pattern:$0x75316420] %v1719_v58 }
 0x599   : > { %1734 = vst.sshfl [vmem:[#allocation1 + $0x8] sm:$0xff pattern:$0x75316420] %v1720_v59  ;;  %2316 = vtanh.f32 %v1720_v59 }
 0x59e   : > { %v2315_v2 = vpop.eup %2314 }
 0x59f   : > { %v2317_v8 = vpop.eup %2316  ;;  %v1725_v6 = vrot.slane %v2315_v2, 4 }
 0x5a0   : > { %v1726_v9 = vrot.slane %v2317_v8, 4 }
 0x5a1   : > { %v1729_v10 = vmul.f32 %v1725_v6, %v1691_v3 }
 0x5a2   : > { %v1730_v12 = vmul.f32 %v1726_v9, %v1692_v7 }
 0x5a3   : > { %v1741_v0 = vrot.slane %v1729_v10, 4  ;;  %v1752_v13 = vsel %vm586_vm4, %v1729_v10, 0.0  ;;  %v1760_v14 = vmul.f32 %v1729_v10, %v1729_v10 }
 0x5a4   : > { %v1753_v15 = vsel %vm586_vm4, %v1730_v12, 0.0  ;;  %v1742_v16 = vrot.slane %v1730_v12, 4  ;;  %v1761_v17 = vmul.f32 %v1730_v12, %v1730_v12 }
 0x5a5   : > { %1745 = vst [vmem:[#allocation2] sm:$0xf0] %v1741_v0  ;;  %v1754_v18 = vadd.f32 %v1753_v15, %v1752_v13  ;;  %v1762_v19 = vsel %vm586_vm4, %v1760_v14, 0.0 }
 0x5a6   : > { %1746 = vst [vmem:[#allocation2 + $0x8] sm:$0xf0] %v1742_v16  ;;  %v1747_v20 = vsel %vm586_vm4, %v1729_v10, %v1742_v16  ;;  %v1763_v21 = vsel %vm586_vm4, %v1761_v17, 0.0 }
 0x5a7   : > { %1755 = vadd.xlane.f32.xlu2 %v1754_v18  ;;  %2118 = vst [vmem:[%s2724_s9 + $0x18] sm:$0xff] %v1747_v20  ;;  %v1764_v22 = vadd.f32 %v1763_v21, %v1762_v19 }
 0x5a8   : > { %2405 = shalt.err (!%p2402_p3)
}
 0x5a9   : > { %s2481_s18 = smov 128   ;;  %s2482_s9 = smov 8   ;;  %1765 = vadd.xlane.f32.xlu0 %v1764_v22  ;;  %v1751_v23 = vld [vmem:[%s2926_s19] sm:$0xf] }
 0x5aa   : > { %2168 = dma.vmem_to_hbm [thread:$0]  (%p2597_p5), %s2969_s26, 512, %s2971_s29, %s1770_s24, %s2481_s18, %s2481_s18, %s2482_s9  }
 0x5ab   : > { %v1759_v28 = vld [vmem:[%s2931_s30] sm:$0xf] }
 0x61a   : > { %v1756_v24 = vpop.xlane.xlu2 %1755 }
 0x61b   : > { %v1757_v27 = vadd.f32 %v1756_v24, %v1751_v23 }
 0x61c   : > { %v1766_v29 = vpop.xlane.xlu0 %1765 }
 0x61d   : > { %1758 = vst.msk [vmem:[%s2926_s19] sm:$0xf] %vm339_vm10, %v1757_v27  ;;  %v1767_v30 = vadd.f32 %v1766_v29, %v1759_v28 }
 0x61f   : > { %1768 = vst.msk [vmem:[%s2931_s30] sm:$0xf] %vm339_vm10, %v1767_v30 }
 0x620 PF: > { %s3044_s13 = sld [smem:[#allocation14_spill]]  ;;  %s1816_s14 = sand.u32 1, %s2444_s21  }
 0x621   : > { %p2179_p7 = pnand %p1951_p11, %p2567_p6  ;;  %s1817_s20 = scalar_lea.sflag [#allocation7], %s1816_s14 }
 0x623   : > { %p2180_p5 = pneg %p2179_p7 }
 0x625   : > { %2439 = dma.done.wait (%p2180_p5), %s1817_s20, 512  }
 0x626   : > { %2441 = vsyncadd (%p2180_p5), %s1817_s20, 4294966784  ;;  %s24_s26 = sadd.s32 1, %s3044_s13   ;;  %s3045_s19 = sld [smem:[#allocation16_spill]] }
 0x627   : > { %p21_p9 = scmp.ge.s32.totalorder %s24_s26, 4   ;;  %s3046_s21 = smov %s2448_s22 }
 0x628   : > { %s3047_s22 = smov %s2452_s23  ;;  %s3048_s23 = smov %s2606_s10 }
 0x629   : > { %s3049_s24 = smov %s2460_s25  ;;  %23 = sbr.rel (!%p21_p9) target bundleno = 9 (0x9), region = 135 }
 0x62c   : > { %s3050_s25 = smov %s3045_s19 }
 0x62e   :  { %1837 = vsyncpa [#allocation6], 1 }
 0x62f   :  { %1839 = vsyncpa [#allocation6 + $0x1], 1 }
 0x630   :  { %1840 = vsyncpa [#allocation9], 1 }
 0x631   :  { %1841 = vsyncpa [#allocation7], 1 }
 0x632   :  { %1843 = vsyncpa [#allocation7 + $0x1], 1 }

</bundles_post_ra>
